<compile_context>
chip_gen: v7x
topology: tpu7x:2x2x1
jax: 0.10.0
libtpu: 0.0.40
codegen_flags: <defaults>
</compile_context>

<pallas_src>
import functools

import jax
import jax.numpy as jnp
from jax.experimental import pallas as pl
from jax.experimental.pallas import tpu as pltpu


# ----------------------------------------------------------------------------
# Fully fused kernel: one grid step == one batch element
# ----------------------------------------------------------------------------
def _fusion_kernel(x_ref, y_ref,
                   mhw_ref, ehw_ref, g_ref, mask7_ref,
                   w1bd_ref, wy_ref, xa_vec_ref,
                   wscx_ref, wscy_ref, wc1x_ref, wc2_ref,
                   fb_vec_ref, caf1_ref, caf2_ref, saw_ref,
                   o_ref, *, H, W):
    f32 = jnp.float32
    HW = H * W
    C1 = x_ref.shape[1]

    gx = x_ref[0].astype(f32)                          # (C1, HW)  lidar
    gy = y_ref[0].astype(f32)                          # (C2, HW)  camera
    masks = mask7_ref[...]                             # (49, HW)  0/1 border masks

    def shift(xflat, dy, dx):
        """out[:, r*W+c] = xflat[:, (r+dy)*W+(c+dx)] if in-bounds else 0."""
        if dy == 0 and dx == 0:
            return xflat
        s = dy * W + dx
        shifted = pltpu.roll(xflat, shift=(-s) % HW, axis=1)
        idx = (dy + 3) * 7 + (dx + 3)
        return shifted * masks[idx:idx + 1]            # one vmul per tap

    def im2col3(xflat):                                # (C,HW) -> (9*C, HW)
        return jnp.concatenate(
            [shift(xflat, dy, dx) for dy in (-1, 0, 1) for dx in (-1, 0, 1)],
            axis=0)

    xa_vec = xa_vec_ref[...]                           # (C1,4) = [b1|b3|gn_g|gn_b]
    fb_vec = fb_vec_ref[...]                           # (Cout,3) = [scb|bn1b|bn2b]

    # ---------------- camera patches, reused twice (x2 + conv1's y-half) -------
    patches_y = im2col3(gy)                            # (9*C2, HW)
    ystack = jnp.dot(wy_ref[...], patches_y,
                     preferred_element_type=f32)       # (C1+Cout, HW)
    x2 = ystack[:C1] + xa_vec[:, 1:2]                  # grouped 3x3 conv (+bias)
    c1y = ystack[C1:]                                  # conv1 camera half (bn folded)

    # ---------------- cross attention: coordinate gate -------------------------
    x_hw = jnp.dot(gx, mhw_ref[...], preferred_element_type=f32)   # (C1, H+W) pools
    hw = jnp.dot(w1bd_ref[...], x_hw,
                 preferred_element_type=f32) + xa_vec[:, 0:1]      # grouped 1x1 conv
    ehw = ehw_ref[...]                                              # (H+W, HW)
    gate = (jnp.dot(jax.nn.sigmoid(hw[:, :H]), ehw[:H],
                    preferred_element_type=f32)
            * jnp.dot(jax.nn.sigmoid(hw[:, H:]), ehw[H:],
                      preferred_element_type=f32))
    x1 = gx * gate

    # GroupNorm(cpg, cpg) on the grouped tensor == per-channel norm over H*W
    mu = jnp.mean(x1, axis=1, keepdims=True)
    xc = x1 - mu
    var = jnp.mean(xc * xc, axis=1, keepdims=True)
    x1n = xc * jax.lax.rsqrt(var + 1e-5) * xa_vec[:, 2:3] + xa_vec[:, 3:4]

    # ---------------- group softmax channel re-weighting -----------------------
    s = jnp.concatenate([jnp.mean(x1n, axis=1, keepdims=True),
                         jnp.mean(x2, axis=1, keepdims=True)], axis=1)   # (C1,2)
    e = jnp.exp(s - jnp.max(s, axis=0, keepdims=True))
    sm = e / jnp.dot(g_ref[...], e, preferred_element_type=f32)          # per-group
    wmap = jnp.dot(g_ref[...], sm[:, 0:1] * x2 + sm[:, 1:2] * x1n,
                   preferred_element_type=f32)
    x_att = gx * jax.nn.sigmoid(wmap)                   # cross-attention output

    # ---------------- fusion block ---------------------------------------------
    patches_x = im2col3(x_att)                          # (9*C1, HW)
    out = (jnp.dot(wc1x_ref[...], patches_x, preferred_element_type=f32)
           + c1y)                                       # conv1 (bn1 scale folded)
    out = jnp.maximum(out + fb_vec[:, 1:2], 0.0)        # + bn1 beta, relu

    out = (jnp.dot(wc2_ref[...], im2col3(out), preferred_element_type=f32)
           + fb_vec[:, 2:3])                            # conv2 + bn2 (folded)

    residual = (jnp.dot(wscx_ref[...], x_att, preferred_element_type=f32)
                + jnp.dot(wscy_ref[...], gy, preferred_element_type=f32)
                + fb_vec[:, 0:1])                       # shortcut 1x1 + BN (folded)

    # channel attention: stacked [avg|max] -> fc1 -> relu -> fc2 -> sigmoid
    pooled = jnp.concatenate([jnp.mean(out, axis=1, keepdims=True),
                              jnp.max(out, axis=1, keepdims=True)], axis=1)
    hidden = jnp.maximum(jnp.dot(caf1_ref[...], pooled,
                                 preferred_element_type=f32), 0.0)
    att = jnp.dot(caf2_ref[...], hidden, preferred_element_type=f32)     # (Cout,2)
    out = out * jax.nn.sigmoid(att[:, 0:1] + att[:, 1:2])

    # spatial attention: 7x7 conv as ONE matmul over a 49-tap im2col of the
    # (avg|max) channel stats (padded to 8 sublanes for aligned assembly)
    stats = jnp.concatenate([jnp.mean(out, axis=0, keepdims=True),
                             jnp.max(out, axis=0, keepdims=True),
                             jnp.zeros((6, HW), f32)], axis=0)            # (8, HW)
    patches_s = jnp.concatenate(
        [shift(stats, kh - 3, kw - 3) for kh in range(7) for kw in range(7)],
        axis=0)                                                           # (392, HW)
    sa = jnp.dot(saw_ref[...], patches_s, preferred_element_type=f32)     # (1, HW)
    out = out * jax.nn.sigmoid(sa)

    # residual add + relu
    out = jnp.maximum(out + residual, 0.0)
    o_ref[...] = out[None].astype(o_ref.dtype)


# ----------------------------------------------------------------------------
# Wrapper: constants, block-diag group expansion, BN folding, weight packing
# ----------------------------------------------------------------------------
def _block_diag_rep(w, groups):
    """(co, ci) -> (groups*co, groups*ci) block-diagonal with w on every block."""
    co, ci = w.shape
    eye = jnp.eye(groups, dtype=w.dtype)
    return jnp.einsum('gh,oi->gohi', eye, w).reshape(groups * co, groups * ci)


def lidar_camera_fusion(x, y, params, groups=8):
    B, C1, H, W = x.shape
    _, C2, _, _ = y.shape
    HW = H * W
    cpg = C1 // groups
    Cout = params["conv1_w"].shape[0]
    Cin_f = C1 + C2
    f32 = jnp.float32

    bn_inv = 1.0 / jnp.sqrt(1.0 + 1e-5)        # running_mean=0, running_var=1 folded

    # ---- constants (hoisted out of the kernel, DMA'd once) --------------------
    lane = jnp.arange(HW)
    row, col = lane // W, lane % W
    mh = (row[:, None] == jnp.arange(H)[None, :]).astype(f32) / W       # mean over W
    mw = (col[:, None] == jnp.arange(W)[None, :]).astype(f32) / H       # mean over H
    mhw = jnp.concatenate([mh, mw], axis=1)                             # (HW, H+W)
    eh = (jnp.arange(H)[:, None] == row[None, :]).astype(f32)           # h -> hw
    ew = (jnp.arange(W)[:, None] == col[None, :]).astype(f32)           # w -> hw
    ehw = jnp.concatenate([eh, ew], axis=0)                             # (H+W, HW)
    cidx = jnp.arange(C1)
    gmat = (cidx[:, None] // cpg == cidx[None, :] // cpg).astype(f32)   # (C1, C1)
    dys = jnp.arange(7) - 3
    dxs = jnp.arange(7) - 3
    valid = ((row[None, None, :] + dys[:, None, None] >= 0)
             & (row[None, None, :] + dys[:, None, None] < H)
             & (col[None, None, :] + dxs[None, :, None] >= 0)
             & (col[None, None, :] + dxs[None, :, None] < W))
    mask7 = valid.reshape(49, HW).astype(f32)                           # (49, HW)

    # ---- cross-attention weights (expanded to act on all groups at once) ------
    w1bd = _block_diag_rep(params["xa_conv1x1_w"].reshape(cpg, cpg), groups)
    w3 = params["xa_conv3x3_w"]                                         # (cpg,cpg_y,3,3)
    w3bd = jnp.concatenate(
        [_block_diag_rep(w3[:, :, kh, kw], groups)
         for kh in range(3) for kw in range(3)], axis=1)                # (C1, 9*C2)
    xa_vec = jnp.stack([jnp.tile(params["xa_conv1x1_b"], groups),
                        jnp.tile(params["xa_conv3x3_b"], groups),
                        jnp.tile(params["xa_gn_gamma"], groups),
                        jnp.tile(params["xa_gn_beta"], groups)], axis=1)  # (C1, 4)

    # ---- fusion-block weights: BN scales folded into the matmul weights -------
    s1 = params["bn1_gamma"] * bn_inv
    s2 = params["bn2_gamma"] * bn_inv
    ssc = params["scbn_gamma"] * bn_inv
    wc1 = jnp.transpose(params["conv1_w"], (0, 2, 3, 1)) * s1[:, None, None, None]
    wc1_x = wc1[:, :, :, :C1].reshape(Cout, 9 * C1)
    wc1_y = wc1[:, :, :, C1:].reshape(Cout, 9 * C2)
    wy_stack = jnp.concatenate([w3bd, wc1_y], axis=0)                   # (C1+Cout, 9*C2)
    wc2 = (jnp.transpose(params["conv2_w"], (0, 2, 3, 1))
           * s2[:, None, None, None]).reshape(Cout, 9 * Cout)
    wsc = params["sc_w"].reshape(Cout, Cin_f) * ssc[:, None]
    wsc_x, wsc_y = wsc[:, :C1], wsc[:, C1:]
    scb = params["scbn_beta"] + params["sc_b"] * ssc
    fb_vec = jnp.stack([scb, params["bn1_beta"], params["bn2_beta"]], axis=1)
    caf1 = params["cafc1_w"].reshape(-1, Cout)                          # (Cout//r, Cout)
    caf2 = params["cafc2_w"].reshape(Cout, -1)                          # (Cout, Cout//r)
    # spatial-attn weights: per tap [w_avg, w_max, 0,0,0,0,0,0] -> (1, 392)
    saw_taps = jnp.transpose(params["sa_conv_w"][0], (1, 2, 0)).reshape(49, 2)
    saw = jnp.pad(saw_taps, ((0, 0), (0, 6))).reshape(1, 392)

    weights = [mhw, ehw, gmat, mask7,
               w1bd, wy_stack, xa_vec, wsc_x, wsc_y, wc1_x, wc2,
               fb_vec, caf1, caf2, saw]

    # lane-dense delivery: (B, C, H*W) with H*W on the lane axis
    xf = x.reshape(B, C1, HW)
    yf = y.reshape(B, C2, HW)

    out = pl.pallas_call(
        functools.partial(_fusion_kernel, H=H, W=W),
        out_shape=jax.ShapeDtypeStruct((B, Cout, HW), jnp.float32),
        grid=(B,),
        in_specs=([pl.BlockSpec((1, C1, HW), lambda b: (b, 0, 0)),
                   pl.BlockSpec((1, C2, HW), lambda b: (b, 0, 0))]
                  + [pl.BlockSpec(wgt.shape, lambda b: (0, 0)) for wgt in weights]),
        out_specs=pl.BlockSpec((1, Cout, HW), lambda b: (b, 0, 0)),
        compiler_params=pltpu.CompilerParams(dimension_semantics=("parallel",)),
    )(xf, yf, *weights)
    return out.reshape(B, Cout, H, W)


# ----------------------------------------------------------------------------
# Deterministic synthetic parameters
# ----------------------------------------------------------------------------
def init_params(key, c1, c2, cout, groups=8, ratio=16):
    cpg = c1 // groups
    cpg_y = c2 // groups
    cin_fuse = c1 + c2
    keys = jax.random.split(key, 12)

    def rnd(k, shape, scale=0.1):
        return scale * jax.random.normal(k, shape, jnp.float32)

    p = {}
    # LidarCameraCrossAttention
    p["xa_conv1x1_w"] = rnd(keys[0], (cpg, cpg, 1, 1))
    p["xa_conv1x1_b"] = rnd(keys[1], (cpg,))
    p["xa_conv3x3_w"] = rnd(keys[2], (cpg, cpg_y, 3, 3))
    p["xa_conv3x3_b"] = rnd(keys[3], (cpg,))
    p["xa_gn_gamma"] = jnp.ones((cpg,), jnp.float32)
    p["xa_gn_beta"] = jnp.zeros((cpg,), jnp.float32)
    # LidarCameraFusion_Block
    p["conv1_w"] = rnd(keys[4], (cout, cin_fuse, 3, 3))
    p["bn1_gamma"] = jnp.ones((cout,), jnp.float32)
    p["bn1_beta"] = jnp.zeros((cout,), jnp.float32)
    p["conv2_w"] = rnd(keys[5], (cout, cout, 3, 3))
    p["bn2_gamma"] = jnp.ones((cout,), jnp.float32)
    p["bn2_beta"] = jnp.zeros((cout,), jnp.float32)
    p["sc_w"] = rnd(keys[6], (cout, cin_fuse, 1, 1))
    p["sc_b"] = rnd(keys[7], (cout,))
    p["scbn_gamma"] = jnp.ones((cout,), jnp.float32)
    p["scbn_beta"] = jnp.zeros((cout,), jnp.float32)
    p["cafc1_w"] = rnd(keys[8], (cout // ratio, cout, 1, 1))
    p["cafc2_w"] = rnd(keys[9], (cout, cout // ratio, 1, 1))
    p["sa_conv_w"] = rnd(keys[10], (1, 2, 7, 7))
    return p


if __name__ == "__main__":
    key = jax.random.PRNGKey(0)
    kx, ky, kp = jax.random.split(key, 3)

    b, c1, c2, h, w = 2, 32, 32, 16, 16        # in_channels = [32, 32]
    cout = 32                                  # out_channels = 32

    x = jax.random.normal(kx, (b, c1, h, w), jnp.float32)   # lidar features
    y = jax.random.normal(ky, (b, c2, h, w), jnp.float32)   # camera features
    params = init_params(kp, c1, c2, cout)

    fwd = jax.jit(lambda a, bb: lidar_camera_fusion(a, bb, params))
    out = jax.block_until_ready(fwd(x, y))

    assert out.shape == (b, cout, h, w), out.shape
    assert bool(jnp.all(jnp.isfinite(out)))
    print("KERNEL_OK")
</pallas_src>

<mosaic_0001>
module attributes {stable_mosaic.version = 11 : i64} {
  func.func @_fusion_kernel(%arg0: i32, %arg1: memref<1x32x256xf32, #tpu.memory_space<vmem>>, %arg2: memref<1x32x256xf32, #tpu.memory_space<vmem>>, %arg3: memref<256x32xf32, #tpu.memory_space<vmem>>, %arg4: memref<32x256xf32, #tpu.memory_space<vmem>>, %arg5: memref<32x32xf32, #tpu.memory_space<vmem>>, %arg6: memref<49x256xf32, #tpu.memory_space<vmem>>, %arg7: memref<32x32xf32, #tpu.memory_space<vmem>>, %arg8: memref<64x288xf32, #tpu.memory_space<vmem>>, %arg9: memref<32x4xf32, #tpu.memory_space<vmem>>, %arg10: memref<32x32xf32, #tpu.memory_space<vmem>>, %arg11: memref<32x32xf32, #tpu.memory_space<vmem>>, %arg12: memref<32x288xf32, #tpu.memory_space<vmem>>, %arg13: memref<32x288xf32, #tpu.memory_space<vmem>>, %arg14: memref<32x3xf32, #tpu.memory_space<vmem>>, %arg15: memref<2x32xf32, #tpu.memory_space<vmem>>, %arg16: memref<32x2xf32, #tpu.memory_space<vmem>>, %arg17: memref<1x392xf32, #tpu.memory_space<vmem>>, %arg18: memref<1x32x256xf32, #tpu.memory_space<vmem>>) attributes {dimension_semantics = [#tpu.dimension_semantics<parallel>], iteration_bounds = array<i64: 2>, scalar_prefetch = 0 : i64, scratch_operands = 0 : i64, tpu.core_type = #tpu.core_type<tc>, window_params = [{transform_indices = @transform_0, window_bounds = array<i64: 1, 32, 256>}, {transform_indices = @transform_1, window_bounds = array<i64: 1, 32, 256>}, {pipeline_mode = #tpu.pipeline_mode<synchronous>, transform_indices = @transform_2, window_bounds = array<i64: 256, 32>}, {pipeline_mode = #tpu.pipeline_mode<synchronous>, transform_indices = @transform_3, window_bounds = array<i64: 32, 256>}, {pipeline_mode = #tpu.pipeline_mode<synchronous>, transform_indices = @transform_4, window_bounds = array<i64: 32, 32>}, {pipeline_mode = #tpu.pipeline_mode<synchronous>, transform_indices = @transform_5, window_bounds = array<i64: 49, 256>}, {pipeline_mode = #tpu.pipeline_mode<synchronous>, transform_indices = @transform_6, window_bounds = array<i64: 32, 32>}, {pipeline_mode = #tpu.pipeline_mode<synchronous>, transform_indices = @transform_7, window_bounds = array<i64: 64, 288>}, {pipeline_mode = #tpu.pipeline_mode<synchronous>, transform_indices = @transform_8, window_bounds = array<i64: 32, 4>}, {pipeline_mode = #tpu.pipeline_mode<synchronous>, transform_indices = @transform_9, window_bounds = array<i64: 32, 32>}, {pipeline_mode = #tpu.pipeline_mode<synchronous>, transform_indices = @transform_10, window_bounds = array<i64: 32, 32>}, {pipeline_mode = #tpu.pipeline_mode<synchronous>, transform_indices = @transform_11, window_bounds = array<i64: 32, 288>}, {pipeline_mode = #tpu.pipeline_mode<synchronous>, transform_indices = @transform_12, window_bounds = array<i64: 32, 288>}, {pipeline_mode = #tpu.pipeline_mode<synchronous>, transform_indices = @transform_13, window_bounds = array<i64: 32, 3>}, {pipeline_mode = #tpu.pipeline_mode<synchronous>, transform_indices = @transform_14, window_bounds = array<i64: 2, 32>}, {pipeline_mode = #tpu.pipeline_mode<synchronous>, transform_indices = @transform_15, window_bounds = array<i64: 32, 2>}, {pipeline_mode = #tpu.pipeline_mode<synchronous>, transform_indices = @transform_16, window_bounds = array<i64: 1, 392>}, {transform_indices = @transform_17, window_bounds = array<i64: 1, 32, 256>}]} {
    %c0 = arith.constant 0 : index
    %c0_0 = arith.constant 0 : index
    %c0_1 = arith.constant 0 : index
    %0 = vector.load %arg1[%c0, %c0_0, %c0_1] : memref<1x32x256xf32, #tpu.memory_space<vmem>>, vector<1x32x256xf32>
    %1 = vector.shape_cast %0 : vector<1x32x256xf32> to vector<32x256xf32>
    %c0_2 = arith.constant 0 : index
    %c0_3 = arith.constant 0 : index
    %c0_4 = arith.constant 0 : index
    %2 = vector.load %arg2[%c0_2, %c0_3, %c0_4] : memref<1x32x256xf32, #tpu.memory_space<vmem>>, vector<1x32x256xf32>
    %3 = vector.shape_cast %2 : vector<1x32x256xf32> to vector<32x256xf32>
    %c0_5 = arith.constant 0 : index
    %c0_6 = arith.constant 0 : index
    %4 = vector.load %arg6[%c0_5, %c0_6] : memref<49x256xf32, #tpu.memory_space<vmem>>, vector<49x256xf32>
    %c0_7 = arith.constant 0 : index
    %c0_8 = arith.constant 0 : index
    %5 = vector.load %arg9[%c0_7, %c0_8] : memref<32x4xf32, #tpu.memory_space<vmem>>, vector<32x4xf32>
    %c0_9 = arith.constant 0 : index
    %c0_10 = arith.constant 0 : index
    %6 = vector.load %arg14[%c0_9, %c0_10] : memref<32x3xf32, #tpu.memory_space<vmem>>, vector<32x3xf32>
    %c17_i32 = arith.constant 17 : i32
    %7 = tpu.dynamic_rotate %3 by %c17_i32 dim 1 : vector<32x256xf32>, i32 -> vector<32x256xf32>
    %8 = vector.extract_strided_slice %4 {offsets = [16, 0], sizes = [1, 256], strides = [1, 1]} : vector<49x256xf32> to vector<1x256xf32>
    %9 = vector.broadcast %8 : vector<1x256xf32> to vector<32x256xf32>
    %10 = arith.mulf %7, %9 : vector<32x256xf32>
    %c16_i32 = arith.constant 16 : i32
    %11 = tpu.dynamic_rotate %3 by %c16_i32 dim 1 : vector<32x256xf32>, i32 -> vector<32x256xf32>
    %12 = vector.extract_strided_slice %4 {offsets = [17, 0], sizes = [1, 256], strides = [1, 1]} : vector<49x256xf32> to vector<1x256xf32>
    %13 = vector.broadcast %12 : vector<1x256xf32> to vector<32x256xf32>
    %14 = arith.mulf %11, %13 : vector<32x256xf32>
    %c15_i32 = arith.constant 15 : i32
    %15 = tpu.dynamic_rotate %3 by %c15_i32 dim 1 : vector<32x256xf32>, i32 -> vector<32x256xf32>
    %16 = vector.extract_strided_slice %4 {offsets = [18, 0], sizes = [1, 256], strides = [1, 1]} : vector<49x256xf32> to vector<1x256xf32>
    %17 = vector.broadcast %16 : vector<1x256xf32> to vector<32x256xf32>
    %18 = arith.mulf %15, %17 : vector<32x256xf32>
    %c1_i32 = arith.constant 1 : i32
    %19 = tpu.dynamic_rotate %3 by %c1_i32 dim 1 : vector<32x256xf32>, i32 -> vector<32x256xf32>
    %20 = vector.extract_strided_slice %4 {offsets = [23, 0], sizes = [1, 256], strides = [1, 1]} : vector<49x256xf32> to vector<1x256xf32>
    %21 = vector.broadcast %20 : vector<1x256xf32> to vector<32x256xf32>
    %22 = arith.mulf %19, %21 : vector<32x256xf32>
    %c255_i32 = arith.constant 255 : i32
    %23 = tpu.dynamic_rotate %3 by %c255_i32 dim 1 : vector<32x256xf32>, i32 -> vector<32x256xf32>
    %24 = vector.extract_strided_slice %4 {offsets = [25, 0], sizes = [1, 256], strides = [1, 1]} : vector<49x256xf32> to vector<1x256xf32>
    %25 = vector.broadcast %24 : vector<1x256xf32> to vector<32x256xf32>
    %26 = arith.mulf %23, %25 : vector<32x256xf32>
    %c241_i32 = arith.constant 241 : i32
    %27 = tpu.dynamic_rotate %3 by %c241_i32 dim 1 : vector<32x256xf32>, i32 -> vector<32x256xf32>
    %28 = vector.extract_strided_slice %4 {offsets = [30, 0], sizes = [1, 256], strides = [1, 1]} : vector<49x256xf32> to vector<1x256xf32>
    %29 = vector.broadcast %28 : vector<1x256xf32> to vector<32x256xf32>
    %30 = arith.mulf %27, %29 : vector<32x256xf32>
    %c240_i32 = arith.constant 240 : i32
    %31 = tpu.dynamic_rotate %3 by %c240_i32 dim 1 : vector<32x256xf32>, i32 -> vector<32x256xf32>
    %32 = vector.extract_strided_slice %4 {offsets = [31, 0], sizes = [1, 256], strides = [1, 1]} : vector<49x256xf32> to vector<1x256xf32>
    %33 = vector.broadcast %32 : vector<1x256xf32> to vector<32x256xf32>
    %34 = arith.mulf %31, %33 : vector<32x256xf32>
    %c239_i32 = arith.constant 239 : i32
    %35 = tpu.dynamic_rotate %3 by %c239_i32 dim 1 : vector<32x256xf32>, i32 -> vector<32x256xf32>
    %36 = vector.extract_strided_slice %4 {offsets = [32, 0], sizes = [1, 256], strides = [1, 1]} : vector<49x256xf32> to vector<1x256xf32>
    %37 = vector.broadcast %36 : vector<1x256xf32> to vector<32x256xf32>
    %38 = arith.mulf %35, %37 : vector<32x256xf32>
    %39 = tpu.concatenate %10, %14, %18, %22, %3, %26, %30, %34, %38 in 0 : vector<32x256xf32>, vector<32x256xf32>, vector<32x256xf32>, vector<32x256xf32>, vector<32x256xf32>, vector<32x256xf32>, vector<32x256xf32>, vector<32x256xf32>, vector<32x256xf32> -> vector<288x256xf32>
    %c0_11 = arith.constant 0 : index
    %c0_12 = arith.constant 0 : index
    %40 = vector.load %arg8[%c0_11, %c0_12] : memref<64x288xf32, #tpu.memory_space<vmem>>, vector<64x288xf32>
    %cst = arith.constant dense<0.000000e+00> : vector<64x256xf32>
    %41 = tpu.matmul %40, %39, %cst {dimension_numbers = #tpu.dot_dimension_numbers<[1], [0], [0], [1], [0, 0, 1, 1], [], []>} : vector<64x288xf32>, vector<288x256xf32>, vector<64x256xf32> -> vector<64x256xf32>
    %42 = vector.extract_strided_slice %41 {offsets = [0, 0], sizes = [32, 256], strides = [1, 1]} : vector<64x256xf32> to vector<32x256xf32>
    %43 = vector.extract_strided_slice %5 {offsets = [0, 1], sizes = [32, 1], strides = [1, 1]} : vector<32x4xf32> to vector<32x1xf32>
    %44 = vector.broadcast %43 : vector<32x1xf32> to vector<32x256xf32>
    %45 = arith.addf %42, %44 : vector<32x256xf32>
    %46 = vector.extract_strided_slice %41 {offsets = [32, 0], sizes = [32, 256], strides = [1, 1]} : vector<64x256xf32> to vector<32x256xf32>
    %c0_13 = arith.constant 0 : index
    %c0_14 = arith.constant 0 : index
    %47 = vector.load %arg3[%c0_13, %c0_14] : memref<256x32xf32, #tpu.memory_space<vmem>>, vector<256x32xf32>
    %cst_15 = arith.constant dense<0.000000e+00> : vector<32x32xf32>
    %48 = tpu.matmul %1, %47, %cst_15 {dimension_numbers = #tpu.dot_dimension_numbers<[1], [0], [0], [1], [0, 0, 1, 1], [], []>} : vector<32x256xf32>, vector<256x32xf32>, vector<32x32xf32> -> vector<32x32xf32>
    %c0_16 = arith.constant 0 : index
    %c0_17 = arith.constant 0 : index
    %49 = vector.load %arg7[%c0_16, %c0_17] : memref<32x32xf32, #tpu.memory_space<vmem>>, vector<32x32xf32>
    %cst_18 = arith.constant dense<0.000000e+00> : vector<32x32xf32>
    %50 = tpu.matmul %49, %48, %cst_18 {dimension_numbers = #tpu.dot_dimension_numbers<[1], [0], [0], [1], [0, 0, 1, 1], [], []>} : vector<32x32xf32>, vector<32x32xf32>, vector<32x32xf32> -> vector<32x32xf32>
    %51 = vector.extract_strided_slice %5 {offsets = [0, 0], sizes = [32, 1], strides = [1, 1]} : vector<32x4xf32> to vector<32x1xf32>
    %52 = vector.broadcast %51 : vector<32x1xf32> to vector<32x32xf32>
    %53 = arith.addf %50, %52 : vector<32x32xf32>
    %c0_19 = arith.constant 0 : index
    %c0_20 = arith.constant 0 : index
    %54 = vector.load %arg4[%c0_19, %c0_20] : memref<32x256xf32, #tpu.memory_space<vmem>>, vector<32x256xf32>
    %55 = vector.extract_strided_slice %53 {offsets = [0, 0], sizes = [32, 16], strides = [1, 1]} : vector<32x32xf32> to vector<32x16xf32>
    %56 = arith.negf %55 : vector<32x16xf32>
    %57 = math.exp %56 : vector<32x16xf32>
    %cst_21 = arith.constant 1.000000e+00 : f32
    %58 = vector.broadcast %cst_21 : f32 to vector<32x16xf32>
    %59 = arith.addf %58, %57 : vector<32x16xf32>
    %60 = arith.divf %58, %59 : vector<32x16xf32>
    %61 = vector.extract_strided_slice %54 {offsets = [0, 0], sizes = [16, 256], strides = [1, 1]} : vector<32x256xf32> to vector<16x256xf32>
    %cst_22 = arith.constant dense<0.000000e+00> : vector<32x256xf32>
    %62 = tpu.matmul %60, %61, %cst_22 {dimension_numbers = #tpu.dot_dimension_numbers<[1], [0], [0], [1], [0, 0, 1, 1], [], []>} : vector<32x16xf32>, vector<16x256xf32>, vector<32x256xf32> -> vector<32x256xf32>
    %63 = vector.extract_strided_slice %53 {offsets = [0, 16], sizes = [32, 16], strides = [1, 1]} : vector<32x32xf32> to vector<32x16xf32>
    %64 = arith.negf %63 : vector<32x16xf32>
    %65 = math.exp %64 : vector<32x16xf32>
    %cst_23 = arith.constant 1.000000e+00 : f32
    %66 = vector.broadcast %cst_23 : f32 to vector<32x16xf32>
    %67 = arith.addf %66, %65 : vector<32x16xf32>
    %68 = arith.divf %66, %67 : vector<32x16xf32>
    %69 = vector.extract_strided_slice %54 {offsets = [16, 0], sizes = [16, 256], strides = [1, 1]} : vector<32x256xf32> to vector<16x256xf32>
    %cst_24 = arith.constant dense<0.000000e+00> : vector<32x256xf32>
    %70 = tpu.matmul %68, %69, %cst_24 {dimension_numbers = #tpu.dot_dimension_numbers<[1], [0], [0], [1], [0, 0, 1, 1], [], []>} : vector<32x16xf32>, vector<16x256xf32>, vector<32x256xf32> -> vector<32x256xf32>
    %71 = arith.mulf %62, %70 : vector<32x256xf32>
    %72 = arith.mulf %1, %71 : vector<32x256xf32>
    %cst_25 = arith.constant dense<0.000000e+00> : vector<32xf32>
    %73 = vector.multi_reduction <add>, %72, %cst_25 [1] : vector<32x256xf32> to vector<32xf32>
    %74 = vector.shape_cast %73 : vector<32xf32> to vector<32x1xf32>
    %cst_26 = arith.constant 2.560000e+02 : f32
    %75 = vector.broadcast %cst_26 : f32 to vector<32x1xf32>
    %76 = arith.divf %74, %75 : vector<32x1xf32>
    %77 = vector.broadcast %76 : vector<32x1xf32> to vector<32x256xf32>
    %78 = arith.subf %72, %77 : vector<32x256xf32>
    %79 = arith.mulf %78, %78 : vector<32x256xf32>
    %cst_27 = arith.constant dense<0.000000e+00> : vector<32xf32>
    %80 = vector.multi_reduction <add>, %79, %cst_27 [1] : vector<32x256xf32> to vector<32xf32>
    %81 = vector.shape_cast %80 : vector<32xf32> to vector<32x1xf32>
    %cst_28 = arith.constant 2.560000e+02 : f32
    %82 = vector.broadcast %cst_28 : f32 to vector<32x1xf32>
    %83 = arith.divf %81, %82 : vector<32x1xf32>
    %cst_29 = arith.constant 9.99999974E-6 : f32
    %84 = vector.broadcast %cst_29 : f32 to vector<32x1xf32>
    %85 = arith.addf %83, %84 : vector<32x1xf32>
    %86 = math.rsqrt %85 : vector<32x1xf32>
    %87 = vector.broadcast %86 : vector<32x1xf32> to vector<32x256xf32>
    %88 = arith.mulf %78, %87 : vector<32x256xf32>
    %89 = vector.extract_strided_slice %5 {offsets = [0, 2], sizes = [32, 1], strides = [1, 1]} : vector<32x4xf32> to vector<32x1xf32>
    %90 = vector.broadcast %89 : vector<32x1xf32> to vector<32x256xf32>
    %91 = arith.mulf %88, %90 : vector<32x256xf32>
    %92 = vector.extract_strided_slice %5 {offsets = [0, 3], sizes = [32, 1], strides = [1, 1]} : vector<32x4xf32> to vector<32x1xf32>
    %93 = vector.broadcast %92 : vector<32x1xf32> to vector<32x256xf32>
    %94 = arith.addf %91, %93 : vector<32x256xf32>
    %cst_30 = arith.constant dense<0.000000e+00> : vector<32xf32>
    %95 = vector.multi_reduction <add>, %94, %cst_30 [1] : vector<32x256xf32> to vector<32xf32>
    %96 = vector.shape_cast %95 : vector<32xf32> to vector<32x1xf32>
    %cst_31 = arith.constant 2.560000e+02 : f32
    %97 = vector.broadcast %cst_31 : f32 to vector<32x1xf32>
    %98 = arith.divf %96, %97 : vector<32x1xf32>
    %cst_32 = arith.constant dense<0.000000e+00> : vector<32xf32>
    %99 = vector.multi_reduction <add>, %45, %cst_32 [1] : vector<32x256xf32> to vector<32xf32>
    %100 = vector.shape_cast %99 : vector<32xf32> to vector<32x1xf32>
    %cst_33 = arith.constant 2.560000e+02 : f32
    %101 = vector.broadcast %cst_33 : f32 to vector<32x1xf32>
    %102 = arith.divf %100, %101 : vector<32x1xf32>
    %103 = tpu.concatenate %98, %102 in 1 : vector<32x1xf32>, vector<32x1xf32> -> vector<32x2xf32>
    %cst_34 = arith.constant dense<0xFF800000> : vector<2xf32>
    %104 = vector.multi_reduction <maximumf>, %103, %cst_34 [0] : vector<32x2xf32> to vector<2xf32>
    %105 = vector.shape_cast %104 : vector<2xf32> to vector<1x2xf32>
    %106 = vector.broadcast %105 : vector<1x2xf32> to vector<32x2xf32>
    %107 = arith.subf %103, %106 : vector<32x2xf32>
    %108 = math.exp %107 : vector<32x2xf32>
    %c0_35 = arith.constant 0 : index
    %c0_36 = arith.constant 0 : index
    %109 = vector.load %arg5[%c0_35, %c0_36] : memref<32x32xf32, #tpu.memory_space<vmem>>, vector<32x32xf32>
    %cst_37 = arith.constant dense<0.000000e+00> : vector<32x2xf32>
    %110 = tpu.matmul %109, %108, %cst_37 {dimension_numbers = #tpu.dot_dimension_numbers<[1], [0], [0], [1], [0, 0, 1, 1], [], []>} : vector<32x32xf32>, vector<32x2xf32>, vector<32x2xf32> -> vector<32x2xf32>
    %111 = arith.divf %108, %110 : vector<32x2xf32>
    %c0_38 = arith.constant 0 : index
    %c0_39 = arith.constant 0 : index
    %112 = vector.load %arg5[%c0_38, %c0_39] : memref<32x32xf32, #tpu.memory_space<vmem>>, vector<32x32xf32>
    %113 = vector.extract_strided_slice %111 {offsets = [0, 0], sizes = [32, 1], strides = [1, 1]} : vector<32x2xf32> to vector<32x1xf32>
    %114 = vector.broadcast %113 : vector<32x1xf32> to vector<32x256xf32>
    %115 = arith.mulf %114, %45 : vector<32x256xf32>
    %116 = vector.extract_strided_slice %111 {offsets = [0, 1], sizes = [32, 1], strides = [1, 1]} : vector<32x2xf32> to vector<32x1xf32>
    %117 = vector.broadcast %116 : vector<32x1xf32> to vector<32x256xf32>
    %118 = arith.mulf %117, %94 : vector<32x256xf32>
    %119 = arith.addf %115, %118 : vector<32x256xf32>
    %cst_40 = arith.constant dense<0.000000e+00> : vector<32x256xf32>
    %120 = tpu.matmul %112, %119, %cst_40 {dimension_numbers = #tpu.dot_dimension_numbers<[1], [0], [0], [1], [0, 0, 1, 1], [], []>} : vector<32x32xf32>, vector<32x256xf32>, vector<32x256xf32> -> vector<32x256xf32>
    %121 = arith.negf %120 : vector<32x256xf32>
    %122 = math.exp %121 : vector<32x256xf32>
    %cst_41 = arith.constant 1.000000e+00 : f32
    %123 = vector.broadcast %cst_41 : f32 to vector<32x256xf32>
    %124 = arith.addf %123, %122 : vector<32x256xf32>
    %125 = arith.divf %123, %124 : vector<32x256xf32>
    %126 = arith.mulf %1, %125 : vector<32x256xf32>
    %c17_i32_42 = arith.constant 17 : i32
    %127 = tpu.dynamic_rotate %126 by %c17_i32_42 dim 1 : vector<32x256xf32>, i32 -> vector<32x256xf32>
    %128 = vector.extract_strided_slice %4 {offsets = [16, 0], sizes = [1, 256], strides = [1, 1]} : vector<49x256xf32> to vector<1x256xf32>
    %129 = vector.broadcast %128 : vector<1x256xf32> to vector<32x256xf32>
    %130 = arith.mulf %127, %129 : vector<32x256xf32>
    %c16_i32_43 = arith.constant 16 : i32
    %131 = tpu.dynamic_rotate %126 by %c16_i32_43 dim 1 : vector<32x256xf32>, i32 -> vector<32x256xf32>
    %132 = vector.extract_strided_slice %4 {offsets = [17, 0], sizes = [1, 256], strides = [1, 1]} : vector<49x256xf32> to vector<1x256xf32>
    %133 = vector.broadcast %132 : vector<1x256xf32> to vector<32x256xf32>
    %134 = arith.mulf %131, %133 : vector<32x256xf32>
    %c15_i32_44 = arith.constant 15 : i32
    %135 = tpu.dynamic_rotate %126 by %c15_i32_44 dim 1 : vector<32x256xf32>, i32 -> vector<32x256xf32>
    %136 = vector.extract_strided_slice %4 {offsets = [18, 0], sizes = [1, 256], strides = [1, 1]} : vector<49x256xf32> to vector<1x256xf32>
    %137 = vector.broadcast %136 : vector<1x256xf32> to vector<32x256xf32>
    %138 = arith.mulf %135, %137 : vector<32x256xf32>
    %c1_i32_45 = arith.constant 1 : i32
    %139 = tpu.dynamic_rotate %126 by %c1_i32_45 dim 1 : vector<32x256xf32>, i32 -> vector<32x256xf32>
    %140 = vector.extract_strided_slice %4 {offsets = [23, 0], sizes = [1, 256], strides = [1, 1]} : vector<49x256xf32> to vector<1x256xf32>
    %141 = vector.broadcast %140 : vector<1x256xf32> to vector<32x256xf32>
    %142 = arith.mulf %139, %141 : vector<32x256xf32>
    %c255_i32_46 = arith.constant 255 : i32
    %143 = tpu.dynamic_rotate %126 by %c255_i32_46 dim 1 : vector<32x256xf32>, i32 -> vector<32x256xf32>
    %144 = vector.extract_strided_slice %4 {offsets = [25, 0], sizes = [1, 256], strides = [1, 1]} : vector<49x256xf32> to vector<1x256xf32>
    %145 = vector.broadcast %144 : vector<1x256xf32> to vector<32x256xf32>
    %146 = arith.mulf %143, %145 : vector<32x256xf32>
    %c241_i32_47 = arith.constant 241 : i32
    %147 = tpu.dynamic_rotate %126 by %c241_i32_47 dim 1 : vector<32x256xf32>, i32 -> vector<32x256xf32>
    %148 = vector.extract_strided_slice %4 {offsets = [30, 0], sizes = [1, 256], strides = [1, 1]} : vector<49x256xf32> to vector<1x256xf32>
    %149 = vector.broadcast %148 : vector<1x256xf32> to vector<32x256xf32>
    %150 = arith.mulf %147, %149 : vector<32x256xf32>
    %c240_i32_48 = arith.constant 240 : i32
    %151 = tpu.dynamic_rotate %126 by %c240_i32_48 dim 1 : vector<32x256xf32>, i32 -> vector<32x256xf32>
    %152 = vector.extract_strided_slice %4 {offsets = [31, 0], sizes = [1, 256], strides = [1, 1]} : vector<49x256xf32> to vector<1x256xf32>
    %153 = vector.broadcast %152 : vector<1x256xf32> to vector<32x256xf32>
    %154 = arith.mulf %151, %153 : vector<32x256xf32>
    %c239_i32_49 = arith.constant 239 : i32
    %155 = tpu.dynamic_rotate %126 by %c239_i32_49 dim 1 : vector<32x256xf32>, i32 -> vector<32x256xf32>
    %156 = vector.extract_strided_slice %4 {offsets = [32, 0], sizes = [1, 256], strides = [1, 1]} : vector<49x256xf32> to vector<1x256xf32>
    %157 = vector.broadcast %156 : vector<1x256xf32> to vector<32x256xf32>
    %158 = arith.mulf %155, %157 : vector<32x256xf32>
    %159 = tpu.concatenate %130, %134, %138, %142, %126, %146, %150, %154, %158 in 0 : vector<32x256xf32>, vector<32x256xf32>, vector<32x256xf32>, vector<32x256xf32>, vector<32x256xf32>, vector<32x256xf32>, vector<32x256xf32>, vector<32x256xf32>, vector<32x256xf32> -> vector<288x256xf32>
    %c0_50 = arith.constant 0 : index
    %c0_51 = arith.constant 0 : index
    %160 = vector.load %arg12[%c0_50, %c0_51] : memref<32x288xf32, #tpu.memory_space<vmem>>, vector<32x288xf32>
    %cst_52 = arith.constant dense<0.000000e+00> : vector<32x256xf32>
    %161 = tpu.matmul %160, %159, %cst_52 {dimension_numbers = #tpu.dot_dimension_numbers<[1], [0], [0], [1], [0, 0, 1, 1], [], []>} : vector<32x288xf32>, vector<288x256xf32>, vector<32x256xf32> -> vector<32x256xf32>
    %162 = arith.addf %161, %46 : vector<32x256xf32>
    %163 = vector.extract_strided_slice %6 {offsets = [0, 1], sizes = [32, 1], strides = [1, 1]} : vector<32x3xf32> to vector<32x1xf32>
    %164 = vector.broadcast %163 : vector<32x1xf32> to vector<32x256xf32>
    %165 = arith.addf %162, %164 : vector<32x256xf32>
    %cst_53 = arith.constant 0.000000e+00 : f32
    %166 = vector.broadcast %cst_53 : f32 to vector<32x256xf32>
    %167 = arith.maximumf %165, %166 : vector<32x256xf32>
    %c0_54 = arith.constant 0 : index
    %c0_55 = arith.constant 0 : index
    %168 = vector.load %arg13[%c0_54, %c0_55] : memref<32x288xf32, #tpu.memory_space<vmem>>, vector<32x288xf32>
    %c17_i32_56 = arith.constant 17 : i32
    %169 = tpu.dynamic_rotate %167 by %c17_i32_56 dim 1 : vector<32x256xf32>, i32 -> vector<32x256xf32>
    %170 = vector.extract_strided_slice %4 {offsets = [16, 0], sizes = [1, 256], strides = [1, 1]} : vector<49x256xf32> to vector<1x256xf32>
    %171 = vector.broadcast %170 : vector<1x256xf32> to vector<32x256xf32>
    %172 = arith.mulf %169, %171 : vector<32x256xf32>
    %c16_i32_57 = arith.constant 16 : i32
    %173 = tpu.dynamic_rotate %167 by %c16_i32_57 dim 1 : vector<32x256xf32>, i32 -> vector<32x256xf32>
    %174 = vector.extract_strided_slice %4 {offsets = [17, 0], sizes = [1, 256], strides = [1, 1]} : vector<49x256xf32> to vector<1x256xf32>
    %175 = vector.broadcast %174 : vector<1x256xf32> to vector<32x256xf32>
    %176 = arith.mulf %173, %175 : vector<32x256xf32>
    %c15_i32_58 = arith.constant 15 : i32
    %177 = tpu.dynamic_rotate %167 by %c15_i32_58 dim 1 : vector<32x256xf32>, i32 -> vector<32x256xf32>
    %178 = vector.extract_strided_slice %4 {offsets = [18, 0], sizes = [1, 256], strides = [1, 1]} : vector<49x256xf32> to vector<1x256xf32>
    %179 = vector.broadcast %178 : vector<1x256xf32> to vector<32x256xf32>
    %180 = arith.mulf %177, %179 : vector<32x256xf32>
    %c1_i32_59 = arith.constant 1 : i32
    %181 = tpu.dynamic_rotate %167 by %c1_i32_59 dim 1 : vector<32x256xf32>, i32 -> vector<32x256xf32>
    %182 = vector.extract_strided_slice %4 {offsets = [23, 0], sizes = [1, 256], strides = [1, 1]} : vector<49x256xf32> to vector<1x256xf32>
    %183 = vector.broadcast %182 : vector<1x256xf32> to vector<32x256xf32>
    %184 = arith.mulf %181, %183 : vector<32x256xf32>
    %c255_i32_60 = arith.constant 255 : i32
    %185 = tpu.dynamic_rotate %167 by %c255_i32_60 dim 1 : vector<32x256xf32>, i32 -> vector<32x256xf32>
    %186 = vector.extract_strided_slice %4 {offsets = [25, 0], sizes = [1, 256], strides = [1, 1]} : vector<49x256xf32> to vector<1x256xf32>
    %187 = vector.broadcast %186 : vector<1x256xf32> to vector<32x256xf32>
    %188 = arith.mulf %185, %187 : vector<32x256xf32>
    %c241_i32_61 = arith.constant 241 : i32
    %189 = tpu.dynamic_rotate %167 by %c241_i32_61 dim 1 : vector<32x256xf32>, i32 -> vector<32x256xf32>
    %190 = vector.extract_strided_slice %4 {offsets = [30, 0], sizes = [1, 256], strides = [1, 1]} : vector<49x256xf32> to vector<1x256xf32>
    %191 = vector.broadcast %190 : vector<1x256xf32> to vector<32x256xf32>
    %192 = arith.mulf %189, %191 : vector<32x256xf32>
    %c240_i32_62 = arith.constant 240 : i32
    %193 = tpu.dynamic_rotate %167 by %c240_i32_62 dim 1 : vector<32x256xf32>, i32 -> vector<32x256xf32>
    %194 = vector.extract_strided_slice %4 {offsets = [31, 0], sizes = [1, 256], strides = [1, 1]} : vector<49x256xf32> to vector<1x256xf32>
    %195 = vector.broadcast %194 : vector<1x256xf32> to vector<32x256xf32>
    %196 = arith.mulf %193, %195 : vector<32x256xf32>
    %c239_i32_63 = arith.constant 239 : i32
    %197 = tpu.dynamic_rotate %167 by %c239_i32_63 dim 1 : vector<32x256xf32>, i32 -> vector<32x256xf32>
    %198 = vector.extract_strided_slice %4 {offsets = [32, 0], sizes = [1, 256], strides = [1, 1]} : vector<49x256xf32> to vector<1x256xf32>
    %199 = vector.broadcast %198 : vector<1x256xf32> to vector<32x256xf32>
    %200 = arith.mulf %197, %199 : vector<32x256xf32>
    %201 = tpu.concatenate %172, %176, %180, %184, %167, %188, %192, %196, %200 in 0 : vector<32x256xf32>, vector<32x256xf32>, vector<32x256xf32>, vector<32x256xf32>, vector<32x256xf32>, vector<32x256xf32>, vector<32x256xf32>, vector<32x256xf32>, vector<32x256xf32> -> vector<288x256xf32>
    %cst_64 = arith.constant dense<0.000000e+00> : vector<32x256xf32>
    %202 = tpu.matmul %168, %201, %cst_64 {dimension_numbers = #tpu.dot_dimension_numbers<[1], [0], [0], [1], [0, 0, 1, 1], [], []>} : vector<32x288xf32>, vector<288x256xf32>, vector<32x256xf32> -> vector<32x256xf32>
    %203 = vector.extract_strided_slice %6 {offsets = [0, 2], sizes = [32, 1], strides = [1, 1]} : vector<32x3xf32> to vector<32x1xf32>
    %204 = vector.broadcast %203 : vector<32x1xf32> to vector<32x256xf32>
    %205 = arith.addf %202, %204 : vector<32x256xf32>
    %c0_65 = arith.constant 0 : index
    %c0_66 = arith.constant 0 : index
    %206 = vector.load %arg10[%c0_65, %c0_66] : memref<32x32xf32, #tpu.memory_space<vmem>>, vector<32x32xf32>
    %cst_67 = arith.constant dense<0.000000e+00> : vector<32x256xf32>
    %207 = tpu.matmul %206, %126, %cst_67 {dimension_numbers = #tpu.dot_dimension_numbers<[1], [0], [0], [1], [0, 0, 1, 1], [], []>} : vector<32x32xf32>, vector<32x256xf32>, vector<32x256xf32> -> vector<32x256xf32>
    %c0_68 = arith.constant 0 : index
    %c0_69 = arith.constant 0 : index
    %208 = vector.load %arg11[%c0_68, %c0_69] : memref<32x32xf32, #tpu.memory_space<vmem>>, vector<32x32xf32>
    %cst_70 = arith.constant dense<0.000000e+00> : vector<32x256xf32>
    %209 = tpu.matmul %208, %3, %cst_70 {dimension_numbers = #tpu.dot_dimension_numbers<[1], [0], [0], [1], [0, 0, 1, 1], [], []>} : vector<32x32xf32>, vector<32x256xf32>, vector<32x256xf32> -> vector<32x256xf32>
    %210 = arith.addf %207, %209 : vector<32x256xf32>
    %211 = vector.extract_strided_slice %6 {offsets = [0, 0], sizes = [32, 1], strides = [1, 1]} : vector<32x3xf32> to vector<32x1xf32>
    %212 = vector.broadcast %211 : vector<32x1xf32> to vector<32x256xf32>
    %213 = arith.addf %210, %212 : vector<32x256xf32>
    %cst_71 = arith.constant dense<0.000000e+00> : vector<32xf32>
    %214 = vector.multi_reduction <add>, %205, %cst_71 [1] : vector<32x256xf32> to vector<32xf32>
    %215 = vector.shape_cast %214 : vector<32xf32> to vector<32x1xf32>
    %cst_72 = arith.constant 2.560000e+02 : f32
    %216 = vector.broadcast %cst_72 : f32 to vector<32x1xf32>
    %217 = arith.divf %215, %216 : vector<32x1xf32>
    %cst_73 = arith.constant dense<0xFF800000> : vector<32xf32>
    %218 = vector.multi_reduction <maximumf>, %205, %cst_73 [1] : vector<32x256xf32> to vector<32xf32>
    %219 = vector.shape_cast %218 : vector<32xf32> to vector<32x1xf32>
    %220 = tpu.concatenate %217, %219 in 1 : vector<32x1xf32>, vector<32x1xf32> -> vector<32x2xf32>
    %c0_74 = arith.constant 0 : index
    %c0_75 = arith.constant 0 : index
    %221 = vector.load %arg15[%c0_74, %c0_75] : memref<2x32xf32, #tpu.memory_space<vmem>>, vector<2x32xf32>
    %cst_76 = arith.constant dense<0.000000e+00> : vector<2x2xf32>
    %222 = tpu.matmul %221, %220, %cst_76 {dimension_numbers = #tpu.dot_dimension_numbers<[1], [0], [0], [1], [0, 0, 1, 1], [], []>} : vector<2x32xf32>, vector<32x2xf32>, vector<2x2xf32> -> vector<2x2xf32>
    %cst_77 = arith.constant 0.000000e+00 : f32
    %223 = vector.broadcast %cst_77 : f32 to vector<2x2xf32>
    %224 = arith.maximumf %222, %223 : vector<2x2xf32>
    %c0_78 = arith.constant 0 : index
    %c0_79 = arith.constant 0 : index
    %225 = vector.load %arg16[%c0_78, %c0_79] : memref<32x2xf32, #tpu.memory_space<vmem>>, vector<32x2xf32>
    %cst_80 = arith.constant dense<0.000000e+00> : vector<32x2xf32>
    %226 = tpu.matmul %225, %224, %cst_80 {dimension_numbers = #tpu.dot_dimension_numbers<[1], [0], [0], [1], [0, 0, 1, 1], [], []>} : vector<32x2xf32>, vector<2x2xf32>, vector<32x2xf32> -> vector<32x2xf32>
    %227 = vector.extract_strided_slice %226 {offsets = [0, 0], sizes = [32, 1], strides = [1, 1]} : vector<32x2xf32> to vector<32x1xf32>
    %228 = vector.extract_strided_slice %226 {offsets = [0, 1], sizes = [32, 1], strides = [1, 1]} : vector<32x2xf32> to vector<32x1xf32>
    %229 = arith.addf %227, %228 : vector<32x1xf32>
    %230 = arith.negf %229 : vector<32x1xf32>
    %231 = math.exp %230 : vector<32x1xf32>
    %cst_81 = arith.constant 1.000000e+00 : f32
    %232 = vector.broadcast %cst_81 : f32 to vector<32x1xf32>
    %233 = arith.addf %232, %231 : vector<32x1xf32>
    %234 = arith.divf %232, %233 : vector<32x1xf32>
    %235 = vector.broadcast %234 : vector<32x1xf32> to vector<32x256xf32>
    %236 = arith.mulf %205, %235 : vector<32x256xf32>
    %cst_82 = arith.constant dense<0.000000e+00> : vector<256xf32>
    %237 = vector.multi_reduction <add>, %236, %cst_82 [0] : vector<32x256xf32> to vector<256xf32>
    %238 = vector.shape_cast %237 : vector<256xf32> to vector<1x256xf32>
    %cst_83 = arith.constant 3.200000e+01 : f32
    %239 = vector.broadcast %cst_83 : f32 to vector<1x256xf32>
    %240 = arith.divf %238, %239 : vector<1x256xf32>
    %cst_84 = arith.constant dense<0xFF800000> : vector<256xf32>
    %241 = vector.multi_reduction <maximumf>, %236, %cst_84 [0] : vector<32x256xf32> to vector<256xf32>
    %242 = vector.shape_cast %241 : vector<256xf32> to vector<1x256xf32>
    %cst_85 = arith.constant 0.000000e+00 : f32
    %243 = vector.broadcast %cst_85 : f32 to vector<6x256xf32>
    %244 = tpu.concatenate %240, %242, %243 in 0 : vector<1x256xf32>, vector<1x256xf32>, vector<6x256xf32> -> vector<8x256xf32>
    %c51_i32 = arith.constant 51 : i32
    %245 = tpu.dynamic_rotate %244 by %c51_i32 dim 1 : vector<8x256xf32>, i32 -> vector<8x256xf32>
    %246 = vector.extract_strided_slice %4 {offsets = [0, 0], sizes = [1, 256], strides = [1, 1]} : vector<49x256xf32> to vector<1x256xf32>
    %247 = vector.broadcast %246 : vector<1x256xf32> to vector<8x256xf32>
    %248 = arith.mulf %245, %247 : vector<8x256xf32>
    %c50_i32 = arith.constant 50 : i32
    %249 = tpu.dynamic_rotate %244 by %c50_i32 dim 1 : vector<8x256xf32>, i32 -> vector<8x256xf32>
    %250 = vector.extract_strided_slice %4 {offsets = [1, 0], sizes = [1, 256], strides = [1, 1]} : vector<49x256xf32> to vector<1x256xf32>
    %251 = vector.broadcast %250 : vector<1x256xf32> to vector<8x256xf32>
    %252 = arith.mulf %249, %251 : vector<8x256xf32>
    %c49_i32 = arith.constant 49 : i32
    %253 = tpu.dynamic_rotate %244 by %c49_i32 dim 1 : vector<8x256xf32>, i32 -> vector<8x256xf32>
    %254 = vector.extract_strided_slice %4 {offsets = [2, 0], sizes = [1, 256], strides = [1, 1]} : vector<49x256xf32> to vector<1x256xf32>
    %255 = vector.broadcast %254 : vector<1x256xf32> to vector<8x256xf32>
    %256 = arith.mulf %253, %255 : vector<8x256xf32>
    %c48_i32 = arith.constant 48 : i32
    %257 = tpu.dynamic_rotate %244 by %c48_i32 dim 1 : vector<8x256xf32>, i32 -> vector<8x256xf32>
    %258 = vector.extract_strided_slice %4 {offsets = [3, 0], sizes = [1, 256], strides = [1, 1]} : vector<49x256xf32> to vector<1x256xf32>
    %259 = vector.broadcast %258 : vector<1x256xf32> to vector<8x256xf32>
    %260 = arith.mulf %257, %259 : vector<8x256xf32>
    %c47_i32 = arith.constant 47 : i32
    %261 = tpu.dynamic_rotate %244 by %c47_i32 dim 1 : vector<8x256xf32>, i32 -> vector<8x256xf32>
    %262 = vector.extract_strided_slice %4 {offsets = [4, 0], sizes = [1, 256], strides = [1, 1]} : vector<49x256xf32> to vector<1x256xf32>
    %263 = vector.broadcast %262 : vector<1x256xf32> to vector<8x256xf32>
    %264 = arith.mulf %261, %263 : vector<8x256xf32>
    %c46_i32 = arith.constant 46 : i32
    %265 = tpu.dynamic_rotate %244 by %c46_i32 dim 1 : vector<8x256xf32>, i32 -> vector<8x256xf32>
    %266 = vector.extract_strided_slice %4 {offsets = [5, 0], sizes = [1, 256], strides = [1, 1]} : vector<49x256xf32> to vector<1x256xf32>
    %267 = vector.broadcast %266 : vector<1x256xf32> to vector<8x256xf32>
    %268 = arith.mulf %265, %267 : vector<8x256xf32>
    %c45_i32 = arith.constant 45 : i32
    %269 = tpu.dynamic_rotate %244 by %c45_i32 dim 1 : vector<8x256xf32>, i32 -> vector<8x256xf32>
    %270 = vector.extract_strided_slice %4 {offsets = [6, 0], sizes = [1, 256], strides = [1, 1]} : vector<49x256xf32> to vector<1x256xf32>
    %271 = vector.broadcast %270 : vector<1x256xf32> to vector<8x256xf32>
    %272 = arith.mulf %269, %271 : vector<8x256xf32>
    %c35_i32 = arith.constant 35 : i32
    %273 = tpu.dynamic_rotate %244 by %c35_i32 dim 1 : vector<8x256xf32>, i32 -> vector<8x256xf32>
    %274 = vector.extract_strided_slice %4 {offsets = [7, 0], sizes = [1, 256], strides = [1, 1]} : vector<49x256xf32> to vector<1x256xf32>
    %275 = vector.broadcast %274 : vector<1x256xf32> to vector<8x256xf32>
    %276 = arith.mulf %273, %275 : vector<8x256xf32>
    %c34_i32 = arith.constant 34 : i32
    %277 = tpu.dynamic_rotate %244 by %c34_i32 dim 1 : vector<8x256xf32>, i32 -> vector<8x256xf32>
    %278 = vector.extract_strided_slice %4 {offsets = [8, 0], sizes = [1, 256], strides = [1, 1]} : vector<49x256xf32> to vector<1x256xf32>
    %279 = vector.broadcast %278 : vector<1x256xf32> to vector<8x256xf32>
    %280 = arith.mulf %277, %279 : vector<8x256xf32>
    %c33_i32 = arith.constant 33 : i32
    %281 = tpu.dynamic_rotate %244 by %c33_i32 dim 1 : vector<8x256xf32>, i32 -> vector<8x256xf32>
    %282 = vector.extract_strided_slice %4 {offsets = [9, 0], sizes = [1, 256], strides = [1, 1]} : vector<49x256xf32> to vector<1x256xf32>
    %283 = vector.broadcast %282 : vector<1x256xf32> to vector<8x256xf32>
    %284 = arith.mulf %281, %283 : vector<8x256xf32>
    %c32_i32 = arith.constant 32 : i32
    %285 = tpu.dynamic_rotate %244 by %c32_i32 dim 1 : vector<8x256xf32>, i32 -> vector<8x256xf32>
    %286 = vector.extract_strided_slice %4 {offsets = [10, 0], sizes = [1, 256], strides = [1, 1]} : vector<49x256xf32> to vector<1x256xf32>
    %287 = vector.broadcast %286 : vector<1x256xf32> to vector<8x256xf32>
    %288 = arith.mulf %285, %287 : vector<8x256xf32>
    %c31_i32 = arith.constant 31 : i32
    %289 = tpu.dynamic_rotate %244 by %c31_i32 dim 1 : vector<8x256xf32>, i32 -> vector<8x256xf32>
    %290 = vector.extract_strided_slice %4 {offsets = [11, 0], sizes = [1, 256], strides = [1, 1]} : vector<49x256xf32> to vector<1x256xf32>
    %291 = vector.broadcast %290 : vector<1x256xf32> to vector<8x256xf32>
    %292 = arith.mulf %289, %291 : vector<8x256xf32>
    %c30_i32 = arith.constant 30 : i32
    %293 = tpu.dynamic_rotate %244 by %c30_i32 dim 1 : vector<8x256xf32>, i32 -> vector<8x256xf32>
    %294 = vector.extract_strided_slice %4 {offsets = [12, 0], sizes = [1, 256], strides = [1, 1]} : vector<49x256xf32> to vector<1x256xf32>
    %295 = vector.broadcast %294 : vector<1x256xf32> to vector<8x256xf32>
    %296 = arith.mulf %293, %295 : vector<8x256xf32>
    %c29_i32 = arith.constant 29 : i32
    %297 = tpu.dynamic_rotate %244 by %c29_i32 dim 1 : vector<8x256xf32>, i32 -> vector<8x256xf32>
    %298 = vector.extract_strided_slice %4 {offsets = [13, 0], sizes = [1, 256], strides = [1, 1]} : vector<49x256xf32> to vector<1x256xf32>
    %299 = vector.broadcast %298 : vector<1x256xf32> to vector<8x256xf32>
    %300 = arith.mulf %297, %299 : vector<8x256xf32>
    %c19_i32 = arith.constant 19 : i32
    %301 = tpu.dynamic_rotate %244 by %c19_i32 dim 1 : vector<8x256xf32>, i32 -> vector<8x256xf32>
    %302 = vector.extract_strided_slice %4 {offsets = [14, 0], sizes = [1, 256], strides = [1, 1]} : vector<49x256xf32> to vector<1x256xf32>
    %303 = vector.broadcast %302 : vector<1x256xf32> to vector<8x256xf32>
    %304 = arith.mulf %301, %303 : vector<8x256xf32>
    %c18_i32 = arith.constant 18 : i32
    %305 = tpu.dynamic_rotate %244 by %c18_i32 dim 1 : vector<8x256xf32>, i32 -> vector<8x256xf32>
    %306 = vector.extract_strided_slice %4 {offsets = [15, 0], sizes = [1, 256], strides = [1, 1]} : vector<49x256xf32> to vector<1x256xf32>
    %307 = vector.broadcast %306 : vector<1x256xf32> to vector<8x256xf32>
    %308 = arith.mulf %305, %307 : vector<8x256xf32>
    %c17_i32_86 = arith.constant 17 : i32
    %309 = tpu.dynamic_rotate %244 by %c17_i32_86 dim 1 : vector<8x256xf32>, i32 -> vector<8x256xf32>
    %310 = vector.extract_strided_slice %4 {offsets = [16, 0], sizes = [1, 256], strides = [1, 1]} : vector<49x256xf32> to vector<1x256xf32>
    %311 = vector.broadcast %310 : vector<1x256xf32> to vector<8x256xf32>
    %312 = arith.mulf %309, %311 : vector<8x256xf32>
    %c16_i32_87 = arith.constant 16 : i32
    %313 = tpu.dynamic_rotate %244 by %c16_i32_87 dim 1 : vector<8x256xf32>, i32 -> vector<8x256xf32>
    %314 = vector.extract_strided_slice %4 {offsets = [17, 0], sizes = [1, 256], strides = [1, 1]} : vector<49x256xf32> to vector<1x256xf32>
    %315 = vector.broadcast %314 : vector<1x256xf32> to vector<8x256xf32>
    %316 = arith.mulf %313, %315 : vector<8x256xf32>
    %c15_i32_88 = arith.constant 15 : i32
    %317 = tpu.dynamic_rotate %244 by %c15_i32_88 dim 1 : vector<8x256xf32>, i32 -> vector<8x256xf32>
    %318 = vector.extract_strided_slice %4 {offsets = [18, 0], sizes = [1, 256], strides = [1, 1]} : vector<49x256xf32> to vector<1x256xf32>
    %319 = vector.broadcast %318 : vector<1x256xf32> to vector<8x256xf32>
    %320 = arith.mulf %317, %319 : vector<8x256xf32>
    %c14_i32 = arith.constant 14 : i32
    %321 = tpu.dynamic_rotate %244 by %c14_i32 dim 1 : vector<8x256xf32>, i32 -> vector<8x256xf32>
    %322 = vector.extract_strided_slice %4 {offsets = [19, 0], sizes = [1, 256], strides = [1, 1]} : vector<49x256xf32> to vector<1x256xf32>
    %323 = vector.broadcast %322 : vector<1x256xf32> to vector<8x256xf32>
    %324 = arith.mulf %321, %323 : vector<8x256xf32>
    %c13_i32 = arith.constant 13 : i32
    %325 = tpu.dynamic_rotate %244 by %c13_i32 dim 1 : vector<8x256xf32>, i32 -> vector<8x256xf32>
    %326 = vector.extract_strided_slice %4 {offsets = [20, 0], sizes = [1, 256], strides = [1, 1]} : vector<49x256xf32> to vector<1x256xf32>
    %327 = vector.broadcast %326 : vector<1x256xf32> to vector<8x256xf32>
    %328 = arith.mulf %325, %327 : vector<8x256xf32>
    %c3_i32 = arith.constant 3 : i32
    %329 = tpu.dynamic_rotate %244 by %c3_i32 dim 1 : vector<8x256xf32>, i32 -> vector<8x256xf32>
    %330 = vector.extract_strided_slice %4 {offsets = [21, 0], sizes = [1, 256], strides = [1, 1]} : vector<49x256xf32> to vector<1x256xf32>
    %331 = vector.broadcast %330 : vector<1x256xf32> to vector<8x256xf32>
    %332 = arith.mulf %329, %331 : vector<8x256xf32>
    %c2_i32 = arith.constant 2 : i32
    %333 = tpu.dynamic_rotate %244 by %c2_i32 dim 1 : vector<8x256xf32>, i32 -> vector<8x256xf32>
    %334 = vector.extract_strided_slice %4 {offsets = [22, 0], sizes = [1, 256], strides = [1, 1]} : vector<49x256xf32> to vector<1x256xf32>
    %335 = vector.broadcast %334 : vector<1x256xf32> to vector<8x256xf32>
    %336 = arith.mulf %333, %335 : vector<8x256xf32>
    %c1_i32_89 = arith.constant 1 : i32
    %337 = tpu.dynamic_rotate %244 by %c1_i32_89 dim 1 : vector<8x256xf32>, i32 -> vector<8x256xf32>
    %338 = vector.extract_strided_slice %4 {offsets = [23, 0], sizes = [1, 256], strides = [1, 1]} : vector<49x256xf32> to vector<1x256xf32>
    %339 = vector.broadcast %338 : vector<1x256xf32> to vector<8x256xf32>
    %340 = arith.mulf %337, %339 : vector<8x256xf32>
    %c255_i32_90 = arith.constant 255 : i32
    %341 = tpu.dynamic_rotate %244 by %c255_i32_90 dim 1 : vector<8x256xf32>, i32 -> vector<8x256xf32>
    %342 = vector.extract_strided_slice %4 {offsets = [25, 0], sizes = [1, 256], strides = [1, 1]} : vector<49x256xf32> to vector<1x256xf32>
    %343 = vector.broadcast %342 : vector<1x256xf32> to vector<8x256xf32>
    %344 = arith.mulf %341, %343 : vector<8x256xf32>
    %c254_i32 = arith.constant 254 : i32
    %345 = tpu.dynamic_rotate %244 by %c254_i32 dim 1 : vector<8x256xf32>, i32 -> vector<8x256xf32>
    %346 = vector.extract_strided_slice %4 {offsets = [26, 0], sizes = [1, 256], strides = [1, 1]} : vector<49x256xf32> to vector<1x256xf32>
    %347 = vector.broadcast %346 : vector<1x256xf32> to vector<8x256xf32>
    %348 = arith.mulf %345, %347 : vector<8x256xf32>
    %c253_i32 = arith.constant 253 : i32
    %349 = tpu.dynamic_rotate %244 by %c253_i32 dim 1 : vector<8x256xf32>, i32 -> vector<8x256xf32>
    %350 = vector.extract_strided_slice %4 {offsets = [27, 0], sizes = [1, 256], strides = [1, 1]} : vector<49x256xf32> to vector<1x256xf32>
    %351 = vector.broadcast %350 : vector<1x256xf32> to vector<8x256xf32>
    %352 = arith.mulf %349, %351 : vector<8x256xf32>
    %c243_i32 = arith.constant 243 : i32
    %353 = tpu.dynamic_rotate %244 by %c243_i32 dim 1 : vector<8x256xf32>, i32 -> vector<8x256xf32>
    %354 = vector.extract_strided_slice %4 {offsets = [28, 0], sizes = [1, 256], strides = [1, 1]} : vector<49x256xf32> to vector<1x256xf32>
    %355 = vector.broadcast %354 : vector<1x256xf32> to vector<8x256xf32>
    %356 = arith.mulf %353, %355 : vector<8x256xf32>
    %c242_i32 = arith.constant 242 : i32
    %357 = tpu.dynamic_rotate %244 by %c242_i32 dim 1 : vector<8x256xf32>, i32 -> vector<8x256xf32>
    %358 = vector.extract_strided_slice %4 {offsets = [29, 0], sizes = [1, 256], strides = [1, 1]} : vector<49x256xf32> to vector<1x256xf32>
    %359 = vector.broadcast %358 : vector<1x256xf32> to vector<8x256xf32>
    %360 = arith.mulf %357, %359 : vector<8x256xf32>
    %c241_i32_91 = arith.constant 241 : i32
    %361 = tpu.dynamic_rotate %244 by %c241_i32_91 dim 1 : vector<8x256xf32>, i32 -> vector<8x256xf32>
    %362 = vector.extract_strided_slice %4 {offsets = [30, 0], sizes = [1, 256], strides = [1, 1]} : vector<49x256xf32> to vector<1x256xf32>
    %363 = vector.broadcast %362 : vector<1x256xf32> to vector<8x256xf32>
    %364 = arith.mulf %361, %363 : vector<8x256xf32>
    %c240_i32_92 = arith.constant 240 : i32
    %365 = tpu.dynamic_rotate %244 by %c240_i32_92 dim 1 : vector<8x256xf32>, i32 -> vector<8x256xf32>
    %366 = vector.extract_strided_slice %4 {offsets = [31, 0], sizes = [1, 256], strides = [1, 1]} : vector<49x256xf32> to vector<1x256xf32>
    %367 = vector.broadcast %366 : vector<1x256xf32> to vector<8x256xf32>
    %368 = arith.mulf %365, %367 : vector<8x256xf32>
    %c239_i32_93 = arith.constant 239 : i32
    %369 = tpu.dynamic_rotate %244 by %c239_i32_93 dim 1 : vector<8x256xf32>, i32 -> vector<8x256xf32>
    %370 = vector.extract_strided_slice %4 {offsets = [32, 0], sizes = [1, 256], strides = [1, 1]} : vector<49x256xf32> to vector<1x256xf32>
    %371 = vector.broadcast %370 : vector<1x256xf32> to vector<8x256xf32>
    %372 = arith.mulf %369, %371 : vector<8x256xf32>
    %c238_i32 = arith.constant 238 : i32
    %373 = tpu.dynamic_rotate %244 by %c238_i32 dim 1 : vector<8x256xf32>, i32 -> vector<8x256xf32>
    %374 = vector.extract_strided_slice %4 {offsets = [33, 0], sizes = [1, 256], strides = [1, 1]} : vector<49x256xf32> to vector<1x256xf32>
    %375 = vector.broadcast %374 : vector<1x256xf32> to vector<8x256xf32>
    %376 = arith.mulf %373, %375 : vector<8x256xf32>
    %c237_i32 = arith.constant 237 : i32
    %377 = tpu.dynamic_rotate %244 by %c237_i32 dim 1 : vector<8x256xf32>, i32 -> vector<8x256xf32>
    %378 = vector.extract_strided_slice %4 {offsets = [34, 0], sizes = [1, 256], strides = [1, 1]} : vector<49x256xf32> to vector<1x256xf32>
    %379 = vector.broadcast %378 : vector<1x256xf32> to vector<8x256xf32>
    %380 = arith.mulf %377, %379 : vector<8x256xf32>
    %c227_i32 = arith.constant 227 : i32
    %381 = tpu.dynamic_rotate %244 by %c227_i32 dim 1 : vector<8x256xf32>, i32 -> vector<8x256xf32>
    %382 = vector.extract_strided_slice %4 {offsets = [35, 0], sizes = [1, 256], strides = [1, 1]} : vector<49x256xf32> to vector<1x256xf32>
    %383 = vector.broadcast %382 : vector<1x256xf32> to vector<8x256xf32>
    %384 = arith.mulf %381, %383 : vector<8x256xf32>
    %c226_i32 = arith.constant 226 : i32
    %385 = tpu.dynamic_rotate %244 by %c226_i32 dim 1 : vector<8x256xf32>, i32 -> vector<8x256xf32>
    %386 = vector.extract_strided_slice %4 {offsets = [36, 0], sizes = [1, 256], strides = [1, 1]} : vector<49x256xf32> to vector<1x256xf32>
    %387 = vector.broadcast %386 : vector<1x256xf32> to vector<8x256xf32>
    %388 = arith.mulf %385, %387 : vector<8x256xf32>
    %c225_i32 = arith.constant 225 : i32
    %389 = tpu.dynamic_rotate %244 by %c225_i32 dim 1 : vector<8x256xf32>, i32 -> vector<8x256xf32>
    %390 = vector.extract_strided_slice %4 {offsets = [37, 0], sizes = [1, 256], strides = [1, 1]} : vector<49x256xf32> to vector<1x256xf32>
    %391 = vector.broadcast %390 : vector<1x256xf32> to vector<8x256xf32>
    %392 = arith.mulf %389, %391 : vector<8x256xf32>
    %c224_i32 = arith.constant 224 : i32
    %393 = tpu.dynamic_rotate %244 by %c224_i32 dim 1 : vector<8x256xf32>, i32 -> vector<8x256xf32>
    %394 = vector.extract_strided_slice %4 {offsets = [38, 0], sizes = [1, 256], strides = [1, 1]} : vector<49x256xf32> to vector<1x256xf32>
    %395 = vector.broadcast %394 : vector<1x256xf32> to vector<8x256xf32>
    %396 = arith.mulf %393, %395 : vector<8x256xf32>
    %c223_i32 = arith.constant 223 : i32
    %397 = tpu.dynamic_rotate %244 by %c223_i32 dim 1 : vector<8x256xf32>, i32 -> vector<8x256xf32>
    %398 = vector.extract_strided_slice %4 {offsets = [39, 0], sizes = [1, 256], strides = [1, 1]} : vector<49x256xf32> to vector<1x256xf32>
    %399 = vector.broadcast %398 : vector<1x256xf32> to vector<8x256xf32>
    %400 = arith.mulf %397, %399 : vector<8x256xf32>
    %c222_i32 = arith.constant 222 : i32
    %401 = tpu.dynamic_rotate %244 by %c222_i32 dim 1 : vector<8x256xf32>, i32 -> vector<8x256xf32>
    %402 = vector.extract_strided_slice %4 {offsets = [40, 0], sizes = [1, 256], strides = [1, 1]} : vector<49x256xf32> to vector<1x256xf32>
    %403 = vector.broadcast %402 : vector<1x256xf32> to vector<8x256xf32>
    %404 = arith.mulf %401, %403 : vector<8x256xf32>
    %c221_i32 = arith.constant 221 : i32
    %405 = tpu.dynamic_rotate %244 by %c221_i32 dim 1 : vector<8x256xf32>, i32 -> vector<8x256xf32>
    %406 = vector.extract_strided_slice %4 {offsets = [41, 0], sizes = [1, 256], strides = [1, 1]} : vector<49x256xf32> to vector<1x256xf32>
    %407 = vector.broadcast %406 : vector<1x256xf32> to vector<8x256xf32>
    %408 = arith.mulf %405, %407 : vector<8x256xf32>
    %c211_i32 = arith.constant 211 : i32
    %409 = tpu.dynamic_rotate %244 by %c211_i32 dim 1 : vector<8x256xf32>, i32 -> vector<8x256xf32>
    %410 = vector.extract_strided_slice %4 {offsets = [42, 0], sizes = [1, 256], strides = [1, 1]} : vector<49x256xf32> to vector<1x256xf32>
    %411 = vector.broadcast %410 : vector<1x256xf32> to vector<8x256xf32>
    %412 = arith.mulf %409, %411 : vector<8x256xf32>
    %c210_i32 = arith.constant 210 : i32
    %413 = tpu.dynamic_rotate %244 by %c210_i32 dim 1 : vector<8x256xf32>, i32 -> vector<8x256xf32>
    %414 = vector.extract_strided_slice %4 {offsets = [43, 0], sizes = [1, 256], strides = [1, 1]} : vector<49x256xf32> to vector<1x256xf32>
    %415 = vector.broadcast %414 : vector<1x256xf32> to vector<8x256xf32>
    %416 = arith.mulf %413, %415 : vector<8x256xf32>
    %c209_i32 = arith.constant 209 : i32
    %417 = tpu.dynamic_rotate %244 by %c209_i32 dim 1 : vector<8x256xf32>, i32 -> vector<8x256xf32>
    %418 = vector.extract_strided_slice %4 {offsets = [44, 0], sizes = [1, 256], strides = [1, 1]} : vector<49x256xf32> to vector<1x256xf32>
    %419 = vector.broadcast %418 : vector<1x256xf32> to vector<8x256xf32>
    %420 = arith.mulf %417, %419 : vector<8x256xf32>
    %c208_i32 = arith.constant 208 : i32
    %421 = tpu.dynamic_rotate %244 by %c208_i32 dim 1 : vector<8x256xf32>, i32 -> vector<8x256xf32>
    %422 = vector.extract_strided_slice %4 {offsets = [45, 0], sizes = [1, 256], strides = [1, 1]} : vector<49x256xf32> to vector<1x256xf32>
    %423 = vector.broadcast %422 : vector<1x256xf32> to vector<8x256xf32>
    %424 = arith.mulf %421, %423 : vector<8x256xf32>
    %c207_i32 = arith.constant 207 : i32
    %425 = tpu.dynamic_rotate %244 by %c207_i32 dim 1 : vector<8x256xf32>, i32 -> vector<8x256xf32>
    %426 = vector.extract_strided_slice %4 {offsets = [46, 0], sizes = [1, 256], strides = [1, 1]} : vector<49x256xf32> to vector<1x256xf32>
    %427 = vector.broadcast %426 : vector<1x256xf32> to vector<8x256xf32>
    %428 = arith.mulf %425, %427 : vector<8x256xf32>
    %c206_i32 = arith.constant 206 : i32
    %429 = tpu.dynamic_rotate %244 by %c206_i32 dim 1 : vector<8x256xf32>, i32 -> vector<8x256xf32>
    %430 = vector.extract_strided_slice %4 {offsets = [47, 0], sizes = [1, 256], strides = [1, 1]} : vector<49x256xf32> to vector<1x256xf32>
    %431 = vector.broadcast %430 : vector<1x256xf32> to vector<8x256xf32>
    %432 = arith.mulf %429, %431 : vector<8x256xf32>
    %c205_i32 = arith.constant 205 : i32
    %433 = tpu.dynamic_rotate %244 by %c205_i32 dim 1 : vector<8x256xf32>, i32 -> vector<8x256xf32>
    %434 = vector.extract_strided_slice %4 {offsets = [48, 0], sizes = [1, 256], strides = [1, 1]} : vector<49x256xf32> to vector<1x256xf32>
    %435 = vector.broadcast %434 : vector<1x256xf32> to vector<8x256xf32>
    %436 = arith.mulf %433, %435 : vector<8x256xf32>
    %437 = tpu.concatenate %248, %252, %256, %260, %264, %268, %272, %276, %280, %284, %288, %292, %296, %300, %304, %308 in 0 : vector<8x256xf32>, vector<8x256xf32>, vector<8x256xf32>, vector<8x256xf32>, vector<8x256xf32>, vector<8x256xf32>, vector<8x256xf32>, vector<8x256xf32>, vector<8x256xf32>, vector<8x256xf32>, vector<8x256xf32>, vector<8x256xf32>, vector<8x256xf32>, vector<8x256xf32>, vector<8x256xf32>, vector<8x256xf32> -> vector<128x256xf32>
    %438 = tpu.concatenate %312, %316, %320, %324, %328, %332, %336, %340, %244, %344, %348, %352, %356, %360, %364, %368 in 0 : vector<8x256xf32>, vector<8x256xf32>, vector<8x256xf32>, vector<8x256xf32>, vector<8x256xf32>, vector<8x256xf32>, vector<8x256xf32>, vector<8x256xf32>, vector<8x256xf32>, vector<8x256xf32>, vector<8x256xf32>, vector<8x256xf32>, vector<8x256xf32>, vector<8x256xf32>, vector<8x256xf32>, vector<8x256xf32> -> vector<128x256xf32>
    %439 = tpu.concatenate %372, %376, %380, %384, %388, %392, %396, %400, %404, %408, %412, %416, %420, %424, %428, %432 in 0 : vector<8x256xf32>, vector<8x256xf32>, vector<8x256xf32>, vector<8x256xf32>, vector<8x256xf32>, vector<8x256xf32>, vector<8x256xf32>, vector<8x256xf32>, vector<8x256xf32>, vector<8x256xf32>, vector<8x256xf32>, vector<8x256xf32>, vector<8x256xf32>, vector<8x256xf32>, vector<8x256xf32>, vector<8x256xf32> -> vector<128x256xf32>
    %440 = tpu.concatenate %437, %438, %439, %436 in 0 : vector<128x256xf32>, vector<128x256xf32>, vector<128x256xf32>, vector<8x256xf32> -> vector<392x256xf32>
    %c0_94 = arith.constant 0 : index
    %c0_95 = arith.constant 0 : index
    %441 = vector.load %arg17[%c0_94, %c0_95] : memref<1x392xf32, #tpu.memory_space<vmem>>, vector<1x392xf32>
    %cst_96 = arith.constant dense<0.000000e+00> : vector<1x256xf32>
    %442 = tpu.matmul %441, %440, %cst_96 {dimension_numbers = #tpu.dot_dimension_numbers<[1], [0], [0], [1], [0, 0, 1, 1], [], []>} : vector<1x392xf32>, vector<392x256xf32>, vector<1x256xf32> -> vector<1x256xf32>
    %443 = arith.negf %442 : vector<1x256xf32>
    %444 = math.exp %443 : vector<1x256xf32>
    %cst_97 = arith.constant 1.000000e+00 : f32
    %445 = vector.broadcast %cst_97 : f32 to vector<1x256xf32>
    %446 = arith.addf %445, %444 : vector<1x256xf32>
    %447 = arith.divf %445, %446 : vector<1x256xf32>
    %448 = vector.broadcast %447 : vector<1x256xf32> to vector<32x256xf32>
    %449 = arith.mulf %236, %448 : vector<32x256xf32>
    %450 = arith.addf %449, %213 : vector<32x256xf32>
    %cst_98 = arith.constant 0.000000e+00 : f32
    %451 = vector.broadcast %cst_98 : f32 to vector<32x256xf32>
    %452 = arith.maximumf %450, %451 : vector<32x256xf32>
    %453 = vector.shape_cast %452 : vector<32x256xf32> to vector<1x32x256xf32>
    %c0_99 = arith.constant 0 : index
    %c0_100 = arith.constant 0 : index
    %c0_101 = arith.constant 0 : index
    %454 = vector.load %arg18[%c0_99, %c0_100, %c0_101] : memref<1x32x256xf32, #tpu.memory_space<vmem>>, vector<1x32x256xf32>
    tpu.vector_store %arg18[%c0_99, %c0_100, %c0_101], %453 {strides = array<i32>} : memref<1x32x256xf32, #tpu.memory_space<vmem>>, vector<1x32x256xf32>,
    return
  }
  func.func @transform_0(%arg0: i32) -> (i32, i32, i32) {
    %c0_i32 = arith.constant 0 : i32
    %c0_i32_0 = arith.constant 0 : i32
    %c0_i32_1 = arith.constant 0 : i32
    return %arg0, %c0_i32, %c0_i32_0 : i32, i32, i32
  }
  func.func @transform_1(%arg0: i32) -> (i32, i32, i32) {
    %c0_i32 = arith.constant 0 : i32
    %c0_i32_0 = arith.constant 0 : i32
    %c0_i32_1 = arith.constant 0 : i32
    return %arg0, %c0_i32, %c0_i32_0 : i32, i32, i32
  }
  func.func @transform_2(%arg0: i32) -> (i32, i32) {
    %c0_i32 = arith.constant 0 : i32
    %c0_i32_0 = arith.constant 0 : i32
    %c0_i32_1 = arith.constant 0 : i32
    return %c0_i32, %c0_i32_0 : i32, i32
  }
  func.func @transform_3(%arg0: i32) -> (i32, i32) {
    %c0_i32 = arith.constant 0 : i32
    %c0_i32_0 = arith.constant 0 : i32
    %c0_i32_1 = arith.constant 0 : i32
    return %c0_i32, %c0_i32_0 : i32, i32
  }
  func.func @transform_4(%arg0: i32) -> (i32, i32) {
    %c0_i32 = arith.constant 0 : i32
    %c0_i32_0 = arith.constant 0 : i32
    %c0_i32_1 = arith.constant 0 : i32
    return %c0_i32, %c0_i32_0 : i32, i32
  }
  func.func @transform_5(%arg0: i32) -> (i32, i32) {
    %c0_i32 = arith.constant 0 : i32
    %c0_i32_0 = arith.constant 0 : i32
    %c0_i32_1 = arith.constant 0 : i32
    return %c0_i32, %c0_i32_0 : i32, i32
  }
  func.func @transform_6(%arg0: i32) -> (i32, i32) {
    %c0_i32 = arith.constant 0 : i32
    %c0_i32_0 = arith.constant 0 : i32
    %c0_i32_1 = arith.constant 0 : i32
    return %c0_i32, %c0_i32_0 : i32, i32
  }
  func.func @transform_7(%arg0: i32) -> (i32, i32) {
    %c0_i32 = arith.constant 0 : i32
    %c0_i32_0 = arith.constant 0 : i32
    %c0_i32_1 = arith.constant 0 : i32
    return %c0_i32, %c0_i32_0 : i32, i32
  }
  func.func @transform_8(%arg0: i32) -> (i32, i32) {
    %c0_i32 = arith.constant 0 : i32
    %c0_i32_0 = arith.constant 0 : i32
    %c0_i32_1 = arith.constant 0 : i32
    return %c0_i32, %c0_i32_0 : i32, i32
  }
  func.func @transform_9(%arg0: i32) -> (i32, i32) {
    %c0_i32 = arith.constant 0 : i32
    %c0_i32_0 = arith.constant 0 : i32
    %c0_i32_1 = arith.constant 0 : i32
    return %c0_i32, %c0_i32_0 : i32, i32
  }
  func.func @transform_10(%arg0: i32) -> (i32, i32) {
    %c0_i32 = arith.constant 0 : i32
    %c0_i32_0 = arith.constant 0 : i32
    %c0_i32_1 = arith.constant 0 : i32
    return %c0_i32, %c0_i32_0 : i32, i32
  }
  func.func @transform_11(%arg0: i32) -> (i32, i32) {
    %c0_i32 = arith.constant 0 : i32
    %c0_i32_0 = arith.constant 0 : i32
    %c0_i32_1 = arith.constant 0 : i32
    return %c0_i32, %c0_i32_0 : i32, i32
  }
  func.func @transform_12(%arg0: i32) -> (i32, i32) {
    %c0_i32 = arith.constant 0 : i32
    %c0_i32_0 = arith.constant 0 : i32
    %c0_i32_1 = arith.constant 0 : i32
    return %c0_i32, %c0_i32_0 : i32, i32
  }
  func.func @transform_13(%arg0: i32) -> (i32, i32) {
    %c0_i32 = arith.constant 0 : i32
    %c0_i32_0 = arith.constant 0 : i32
    %c0_i32_1 = arith.constant 0 : i32
    return %c0_i32, %c0_i32_0 : i32, i32
  }
  func.func @transform_14(%arg0: i32) -> (i32, i32) {
    %c0_i32 = arith.constant 0 : i32
    %c0_i32_0 = arith.constant 0 : i32
    %c0_i32_1 = arith.constant 0 : i32
    return %c0_i32, %c0_i32_0 : i32, i32
  }
  func.func @transform_15(%arg0: i32) -> (i32, i32) {
    %c0_i32 = arith.constant 0 : i32
    %c0_i32_0 = arith.constant 0 : i32
    %c0_i32_1 = arith.constant 0 : i32
    return %c0_i32, %c0_i32_0 : i32, i32
  }
  func.func @transform_16(%arg0: i32) -> (i32, i32) {
    %c0_i32 = arith.constant 0 : i32
    %c0_i32_0 = arith.constant 0 : i32
    %c0_i32_1 = arith.constant 0 : i32
    return %c0_i32, %c0_i32_0 : i32, i32
  }
  func.func @transform_17(%arg0: i32) -> (i32, i32, i32) {
    %c0_i32 = arith.constant 0 : i32
    %c0_i32_0 = arith.constant 0 : i32
    %c0_i32_1 = arith.constant 0 : i32
    return %arg0, %c0_i32, %c0_i32_0 : i32, i32, i32
  }
}

</mosaic_0001>

<bundles_post_ra>
// kernel: tile.14
= control target key start
LH: loop header
LB: loop body
LE: loop exit
PB: predicated region body
PF: predicated region fallthrough
CT: control target
= control target key end

     0   :  { %s22_s0 = inlined_call_operand.vmem [shape: f32[4], index: 0, kind: input, shape index: {}]   ;;  %s23_s1 = inlined_call_operand.vmem [shape: f32[8,4], index: 1, kind: output, shape index: {}]  }
   0x1   :  { %v4_v0 = vld [vmem:[%s22_s0] ss:$0 sm:$0xff] }
   0x2   :  { %5 = vst [vmem:[%s23_s1] sm:$0xff] %v4_v0 }

// kernel: tile.18
= control target key start
LH: loop header
LB: loop body
LE: loop exit
PB: predicated region body
PF: predicated region fallthrough
CT: control target
= control target key end

     0   :  { %s67_s10 = smov 28   ;;  %s68_s11 = smov 20   ;;  %vm3_vm0 = vcmask 31744   ;;  %vm9_vm1 = vcmask 261344   ;;  %vm15_vm2 = vcmask 228544   ;;  %vm21_vm3 = vcmask 195744   ;;  %s111_s0 = inlined_call_operand.vmem [shape: f32[8,4], index: 0, kind: input, shape index: {}]   ;;  %s112_s1 = inlined_call_operand.vmem [shape: f32[32,1], index: 1, kind: output, shape index: {}]  }
   0x1   :  { %v53_v0 = vld [vmem:[%s111_s0 + $0x7] sm:$0x1]   ;;  %v55_v1 = vld [vmem:[%s111_s0 + $0x5] sm:$0x1]   ;;  %v54_v2 = vld [vmem:[%s111_s0 + $0x6] sm:$0x1]  }
   0x2   :  { %7 = vrot.lane.b32.xlu0 %v53_v0, %s67_s10  ;;  %19 = vrot.lane.b32.xlu1 %v55_v1, %s68_s11  ;;  %v56_v3 = vld [vmem:[%s111_s0 + $0x4] sm:$0x1]   ;;  %v2_v4 = vld [vmem:[%s111_s0] sm:$0x1]   ;;  %s69_s18 = smov 24   ;;  %s70_s19 = smov 16  }
   0x3   :  { %4 = vst.msk [vmem:[#allocation0] sm:$0x1] %vm3_vm0, %v2_v4   ;;  %v57_v5 = vld [vmem:[%s111_s0 + $0x3] sm:$0x1]   ;;  %v58_v6 = vld [vmem:[%s111_s0 + $0x2] sm:$0x1]  }
   0x4   :  { %s71_s24 = smov 12   ;;  %s72_s25 = smov 8   ;;  %v59_v7 = vld [vmem:[%s111_s0 + $0x1] sm:$0x1]   ;;  %vm27_vm4 = vcmask 162944   ;;  %vm33_vm5 = vcmask 130144  }
   0x5   :  { %s73_s0 = smov 4   ;;  %vm39_vm6 = vcmask 97344   ;;  %vm45_vm7 = vcmask 64544  }
   0x6   :  { %13 = vrot.lane.b32.xlu0 %v54_v2, %s69_s18  ;;  %25 = vrot.lane.b32.xlu1 %v56_v3, %s70_s19 }
   0xa   :  { %31 = vrot.lane.b32.xlu0 %v57_v5, %s71_s24  ;;  %37 = vrot.lane.b32.xlu1 %v58_v6, %s72_s25 }
   0xe   :  { %43 = vrot.lane.b32.xlu0 %v59_v7, %s73_s0 }
  0x74   :  { %v8_v8 = vpop.permute.xlu0 %7   ;;  %v20_v9 = vpop.permute.xlu1 %19  }
  0x75   :  { %10 = vst.msk [vmem:[#allocation0] sm:$0x1] %vm9_vm1, %v8_v8  }
  0x78   :  { %v14_v10 = vpop.permute.xlu0 %13   ;;  %v26_v11 = vpop.permute.xlu1 %25  }
  0x79   :  { %16 = vst.msk [vmem:[#allocation0] sm:$0x1] %vm15_vm2, %v14_v10  }
  0x7a   :  { %22 = vst.msk [vmem:[#allocation0] sm:$0x1] %vm21_vm3, %v20_v9  }
  0x7b   :  { %28 = vst.msk [vmem:[#allocation0] sm:$0x1] %vm27_vm4, %v26_v11  }
  0x7c   :  { %v32_v12 = vpop.permute.xlu0 %31   ;;  %v38_v13 = vpop.permute.xlu1 %37  }
  0x7d   :  { %34 = vst.msk [vmem:[#allocation0] sm:$0x1] %vm33_vm5, %v32_v12  }
  0x7e   :  { %40 = vst.msk [vmem:[#allocation0] sm:$0x1] %vm39_vm6, %v38_v13  }
  0x80   :  { %v44_v14 = vpop.permute.xlu0 %43  }
  0x81   :  { %46 = vst.msk [vmem:[#allocation0] sm:$0x1] %vm45_vm7, %v44_v14  }
  0x88   :  { %v50_v15 = vld [vmem:[#allocation0] sm:$0x1] }
  0x89   :  { %52 = vst [vmem:[%s112_s1] sm:$0x1] %v50_v15 }

// kernel: _lambda_.1
= control target key start
LH: loop header
LB: loop body
LE: loop exit
PB: predicated region body
PF: predicated region fallthrough
CT: control target
= control target key end

     0   :  { %s5788_s24 = smov 0   ;;  %s8408_s0 = inlined_call_operand.vmem [shape: f32[2,32,256], index: 0, kind: input, shape index: {}]   ;;  %s8409_s1 = inlined_call_operand.vmem [shape: f32[2,32,256], index: 1, kind: input, shape index: {}]   ;;  %s8410_s2 = inlined_call_operand.vmem [shape: f32[256,32], index: 2, kind: input, shape index: {}]   ;;  %s8411_s3 = inlined_call_operand.vmem [shape: f32[32,256], index: 3, kind: input, shape index: {}]   ;;  %s8412_s4 = inlined_call_operand.vmem [shape: f32[32,32], index: 4, kind: input, shape index: {}]   ;;  %s8413_s5 = inlined_call_operand.vmem [shape: f32[49,256], index: 5, kind: input, shape index: {}]   ;;  %s8414_s6 = inlined_call_operand.vmem [shape: f32[32,32], index: 6, kind: input, shape index: {}]   ;;  %s8415_s7 = inlined_call_operand.vmem [shape: f32[64,288], index: 7, kind: input, shape index: {}]   ;;  %s8416_s8 = inlined_call_operand.vmem [shape: f32[32,4], index: 8, kind: input, shape index: {}]   ;;  %s8417_s9 = inlined_call_operand.vmem [shape: f32[32,32], index: 9, kind: input, shape index: {}]   ;;  %s8418_s10 = inlined_call_operand.vmem [shape: f32[32,32], index: 10, kind: input, shape index: {}]   ;;  %s8419_s11 = inlined_call_operand.vmem [shape: f32[32,288], index: 11, kind: input, shape index: {}]   ;;  %s8420_s12 = inlined_call_operand.vmem [shape: f32[32,288], index: 12, kind: input, shape index: {}]   ;;  %s8421_s13 = inlined_call_operand.vmem [shape: f32[32,3], index: 13, kind: input, shape index: {}]   ;;  %s8422_s14 = inlined_call_operand.vmem [shape: f32[2,32], index: 14, kind: input, shape index: {}]   ;;  %s8423_s15 = inlined_call_operand.vmem [shape: f32[32,2], index: 15, kind: input, shape index: {}]   ;;  %s8424_s16 = inlined_call_operand.vmem [shape: f32[1,392], index: 16, kind: input, shape index: {}]   ;;  %s8425_s17 = inlined_call_operand.vmem [shape: f32[2,32,256], index: 17, kind: output, shape index: {}]  }
   0x1   :  { %8473 = sst [smem:[#allocation16_spill]] %s8408_s0 }
   0x2   :  { %8474 = sst [smem:[#allocation17_spill]] %s8409_s1 }
   0x3 LB: > { %s4778_s25 = sadd.s32 4294967295, %s5640_s24   ;;  %p4782_p0 = scmp.ge.s32.totalorder %s5640_s24, 1  ;;  %s5640_s24 = sphi %s5788_s24, %s27_s24  }
   0x4   : > { %p497_p1 = scmp.lt.s32.totalorder %s5640_s24, 3 }
   0x6   : > { %p498_p2 = pnand %p4782_p0, %p497_p1 }
   0x8   : > { %501 = sbr.rel (%p498_p2) target bundleno = 4735 (0x127f), region = 88 }
   0xf   : > { %p554_p3 = scmp.lt.s32.totalorder %s4778_s25, 1  ;;  %s8475_s29 = sld [smem:[#allocation17_spill]]  ;;  %v938_v8 = vld [vmem:[%s8415_s7 + $0x8] sm:$0xff]  ;;  %v623_v9 = vlaneseq  ;;  %v5953_v14 = vld [vmem:[%s8413_s5 + $0x20] sm:$0xff]  ;;  %vm961_vm8 = vcmask 261120   ;;  %vm1506_vm9 = vcmask 130048  }
  0x10   : > { %s8471_s30 = smov 17   ;;  %s8436_s18 = smov 16   ;;  %1050 = vmatprep.mubr.f32.mxu0 %v938_v8  ;;  %v5947_v13 = vld [vmem:[%s8413_s5 + $0x28] sm:$0xff]  ;;  %vm1874_vm10 = vcmask 7168   ;;  %vm1879_vm11 = vcmask 15360   ;;  %vm5656_vm12 = vmmov 0  }
  0x11   : > { %s8521_s25 = smov (!%p554_p3, %s4778_s25), 1  ;;  %s8434_s19 = smov 15   ;;  %v5929_v10 = vshrl.u32 %v623_v9, 7  ;;  %v5935_v11 = vand.u32 127, %v623_v9  ;;  %vm3544_vm13 = vcmask 1041408   ;;  %vm3744_vm14 = vcmask 1040384  }
  0x12   : > { %s5796_s26 = sshll.u32 %s8521_s25, 6  ;;  %s8432_s1 = smov 1  }
  0x13   : > { %s8430_s20 = smov 127   ;;  %s8428_s21 = smov 113   ;;  %8476 = vst [vmem:[#allocation2_spill] sm:$0xff] %v5929_v10  ;;  %v5938_v12 = vsub.s32 0, %v5929_v10  ;;  %vm625_vm0 = vcmp.lt.s32.totalorder %v5935_v11, 17  ;;  %v5988_v35 = vsub.s32 1, %v5929_v10 }
  0x14   : > { %s8469_s22 = smov 112   ;;  %s8426_s27 = smov 111   ;;  %vm666_vm1 = vcmp.lt.s32.totalorder %v5935_v11, 16  ;;  %vm707_vm2 = vcmp.lt.s32.totalorder %v5935_v11, 15  ;;  %vm748_vm3 = vcmp.lt.s32.totalorder %v5935_v11, 1  ;;  %vm789_vm4 = vcmp.lt.s32.totalorder %v5935_v11, 127 }
  0x15   : > { %s563_s0 = scalar_lea.vmem %s8475_s29, %s5796_s26  ;;  %8477 = vst [vmem:[#allocation3_spill] sm:$0xff] %v5938_v12  ;;  %v5957_v17 = vrot.slane %v5947_v13, %v5938_v12  ;;  %v5967_v19 = vrot.slane %v5953_v14, %v5938_v12  ;;  %8478 = vst [vmem:[#allocation4_spill] sm:$0xff] %v5988_v35  ;;  %v6005_v48 = vrot.slane %v5953_v14, %v5988_v35  ;;  %vm830_vm5 = vcmp.lt.s32.totalorder %v5935_v11, 113  ;;  %s8492_s23 = smov 16  }
  0x16   : > { %v5802_v0 = vld [vmem:[%s563_s0 + $0x8] sm:$0xff]  ;;  %v5804_v1 = vld [vmem:[%s563_s0] sm:$0xff]  ;;  %v5810_v2 = vld [vmem:[%s563_s0 + $0x18] sm:$0xff]  ;;  %v6009_v49 = vrot.slane %v5947_v13, %v5988_v35  ;;  %vm871_vm6 = vcmp.lt.s32.totalorder %v5935_v11, 112  ;;  %vm912_vm7 = vcmp.lt.s32.totalorder %v5935_v11, 111  ;;  %s8493_s25 = smov 15  }
  0x17   : > { %615 = vrot.lane.b32.xlu1 %v5802_v0, %s8471_s30  ;;  %607 = vrot.lane.b32.xlu0 %v5804_v1, %s8471_s30  ;;  %v5812_v3 = vld [vmem:[%s563_s0 + $0x10] sm:$0xff]  ;;  %v5820_v5 = vld [vmem:[%s563_s0 + $0x20] sm:$0xff]  ;;  %s8494_s28 = smov 1   ;;  %vm3753_vm15 = vcmp.lt.s32.totalorder %v5935_v11, 51 }
  0x18   : > { %v5818_v4 = vld [vmem:[%s563_s0 + $0x30] sm:$0xff]  ;;  %v5826_v6 = vld [vmem:[%s563_s0 + $0x38] sm:$0xff]  ;;  %v5828_v7 = vld [vmem:[%s563_s0 + $0x28] sm:$0xff]  ;;  %s5659_s0 = smov 49  }
  0x1b   : > { %617 = vrot.lane.b32.xlu1 %v5810_v2, %s8471_s30  ;;  %609 = vrot.lane.b32.xlu0 %v5812_v3, %s8471_s30 }
  0x1f   : > { %613 = vrot.lane.b32.xlu1 %v5818_v4, %s8471_s30  ;;  %611 = vrot.lane.b32.xlu0 %v5820_v5, %s8471_s30 }
  0x23   : > { %621 = vrot.lane.b32.xlu1 %v5826_v6, %s8471_s30  ;;  %619 = vrot.lane.b32.xlu0 %v5828_v7, %s8471_s30 }
  0x27   : > { %652 = vrot.lane.b32.xlu1 %v5812_v3, %s8436_s18  ;;  %650 = vrot.lane.b32.xlu0 %v5804_v1, %s8436_s18 }
  0x2b   : > { %660 = vrot.lane.b32.xlu1 %v5810_v2, %s8436_s18  ;;  %658 = vrot.lane.b32.xlu0 %v5802_v0, %s8436_s18 }
  0x2f   : > { %656 = vrot.lane.b32.xlu1 %v5818_v4, %s8436_s18  ;;  %654 = vrot.lane.b32.xlu0 %v5820_v5, %s8436_s18 }
  0x33   : > { %664 = vrot.lane.b32.xlu1 %v5826_v6, %s8436_s18  ;;  %662 = vrot.lane.b32.xlu0 %v5828_v7, %s8436_s18  ;;  %s5658_s18 = smov 50  }
  0x37   : > { %693 = vrot.lane.b32.xlu1 %v5812_v3, %s8434_s19  ;;  %691 = vrot.lane.b32.xlu0 %v5804_v1, %s8434_s19 }
  0x3b   : > { %701 = vrot.lane.b32.xlu1 %v5810_v2, %s8434_s19  ;;  %699 = vrot.lane.b32.xlu0 %v5802_v0, %s8434_s19 }
  0x3f   : > { %697 = vrot.lane.b32.xlu1 %v5818_v4, %s8434_s19  ;;  %695 = vrot.lane.b32.xlu0 %v5820_v5, %s8434_s19 }
  0x43   : > { %705 = vrot.lane.b32.xlu1 %v5826_v6, %s8434_s19  ;;  %703 = vrot.lane.b32.xlu0 %v5828_v7, %s8434_s19  ;;  %s8497_s19 = smov 111  }
  0x47   : > { %734 = vrot.lane.b32.xlu1 %v5812_v3, %s8432_s1  ;;  %732 = vrot.lane.b32.xlu0 %v5804_v1, %s8432_s1 }
  0x4b   : > { %742 = vrot.lane.b32.xlu1 %v5810_v2, %s8432_s1  ;;  %740 = vrot.lane.b32.xlu0 %v5802_v0, %s8432_s1 }
  0x4f   : > { %738 = vrot.lane.b32.xlu1 %v5818_v4, %s8432_s1  ;;  %736 = vrot.lane.b32.xlu0 %v5820_v5, %s8432_s1 }
  0x53   : > { %746 = vrot.lane.b32.xlu1 %v5826_v6, %s8432_s1  ;;  %744 = vrot.lane.b32.xlu0 %v5828_v7, %s8432_s1  ;;  %s5662_s1 = smov 46  }
  0x57   : > { %775 = vrot.lane.b32.xlu1 %v5812_v3, %s8430_s20  ;;  %773 = vrot.lane.b32.xlu0 %v5804_v1, %s8430_s20 }
  0x5b   : > { %783 = vrot.lane.b32.xlu1 %v5810_v2, %s8430_s20  ;;  %781 = vrot.lane.b32.xlu0 %v5802_v0, %s8430_s20 }
  0x5f   : > { %779 = vrot.lane.b32.xlu1 %v5818_v4, %s8430_s20  ;;  %777 = vrot.lane.b32.xlu0 %v5820_v5, %s8430_s20 }
  0x63   : > { %787 = vrot.lane.b32.xlu1 %v5826_v6, %s8430_s20  ;;  %785 = vrot.lane.b32.xlu0 %v5828_v7, %s8430_s20  ;;  %s8495_s20 = smov 127  }
  0x67   : > { %816 = vrot.lane.b32.xlu1 %v5812_v3, %s8428_s21  ;;  %814 = vrot.lane.b32.xlu0 %v5804_v1, %s8428_s21 }
  0x6b   : > { %824 = vrot.lane.b32.xlu1 %v5810_v2, %s8428_s21  ;;  %822 = vrot.lane.b32.xlu0 %v5802_v0, %s8428_s21 }
  0x6f   : > { %820 = vrot.lane.b32.xlu1 %v5818_v4, %s8428_s21  ;;  %818 = vrot.lane.b32.xlu0 %v5820_v5, %s8428_s21 }
  0x73   : > { %828 = vrot.lane.b32.xlu1 %v5826_v6, %s8428_s21  ;;  %826 = vrot.lane.b32.xlu0 %v5828_v7, %s8428_s21  ;;  %s5660_s21 = smov 48  }
  0x77   : > { %857 = vrot.lane.b32.xlu1 %v5812_v3, %s8469_s22  ;;  %855 = vrot.lane.b32.xlu0 %v5804_v1, %s8469_s22 }
  0x7b   : > { %865 = vrot.lane.b32.xlu1 %v5810_v2, %s8469_s22  ;;  %863 = vrot.lane.b32.xlu0 %v5802_v0, %s8469_s22 }
  0x7f   : > { %861 = vrot.lane.b32.xlu1 %v5818_v4, %s8469_s22  ;;  %859 = vrot.lane.b32.xlu0 %v5820_v5, %s8469_s22 }
  0x83   : > { %869 = vrot.lane.b32.xlu1 %v5826_v6, %s8469_s22  ;;  %867 = vrot.lane.b32.xlu0 %v5828_v7, %s8469_s22 }
  0x87   : > { %898 = vrot.lane.b32.xlu1 %v5812_v3, %s8426_s27  ;;  %896 = vrot.lane.b32.xlu0 %v5804_v1, %s8426_s27 }
  0x89   : > { %v616_v15 = vpop.permute.xlu1 %615  ;;  %v608_v16 = vpop.permute.xlu0 %607 }
  0x8a   : > { %v626_v18 = vsel %vm625_vm0, %v608_v16, %v616_v15  ;;  %v630_v20 = vsel %vm625_vm0, %v616_v15, %v608_v16  ;;  %v6024_v15 = vsub.s32 2, %v5929_v10 }
  0x8b   : > { %906 = vrot.lane.b32.xlu1 %v5810_v2, %s8426_s27  ;;  %904 = vrot.lane.b32.xlu0 %v5802_v0, %s8426_s27  ;;  %v643_v25 = vmul.f32 %v5957_v17, %v626_v18  ;;  %v642_v27 = vmul.f32 %v5967_v19, %v630_v20 }
  0x8c   : > { %8479 = vst [vmem:[#allocation5_spill] sm:$0xff] %v6024_v15 }
  0x8d   : > { %v618_v21 = vpop.permute.xlu1 %617  ;;  %v610_v22 = vpop.permute.xlu0 %609 }
  0x8e   : > { %v631_v23 = vsel %vm625_vm0, %v618_v21, %v610_v22  ;;  %v627_v24 = vsel %vm625_vm0, %v610_v22, %v618_v21 }
  0x8f   : > { %v645_v26 = vmul.f32 %v5957_v17, %v627_v24  ;;  %v644_v28 = vmul.f32 %v5967_v19, %v631_v23  ;;  %902 = vrot.lane.b32.xlu1 %v5818_v4, %s8426_s27  ;;  %900 = vrot.lane.b32.xlu0 %v5820_v5, %s8426_s27 }
  0x91   : > { %v614_v29 = vpop.permute.xlu1 %613  ;;  %v612_v30 = vpop.permute.xlu0 %611  ;;  %v4984_v31 = vpack.c.bf16 %v645_v26, %v643_v25  ;;  %v4986_v32 = vpack.c.bf16 %v644_v28, %v642_v27 }
  0x93   : > { %4985 = vmatprep.subr.bf16.mxu0 %v4984_v31  ;;  %910 = vrot.lane.b32.xlu1 %v5826_v6, %s8426_s27  ;;  %v6045_v31 = vrot.slane %v5947_v13, %v6024_v15 }
  0x94   : > { %4987 = vmatpush1.bf16.msra.mxu0 %v4986_v32  ;;  %908 = vrot.lane.b32.xlu0 %v5828_v7, %s8426_s27  ;;  %s8488_s27 = sld [smem:[#allocation16_spill]] }
  0x95   : > { %v622_v33 = vpop.permute.xlu1 %621  ;;  %v620_v34 = vpop.permute.xlu0 %619 }
  0x96   : > { %v629_v36 = vsel %vm625_vm0, %v614_v29, %v622_v33  ;;  %v633_v37 = vsel %vm625_vm0, %v622_v33, %v614_v29  ;;  %v628_v38 = vsel %vm625_vm0, %v612_v30, %v620_v34  ;;  %v632_v39 = vsel %vm625_vm0, %v620_v34, %v612_v30 }
  0x97   : > { %v648_v40 = vmul.f32 %v5967_v19, %v633_v37  ;;  %v649_v41 = vmul.f32 %v5957_v17, %v629_v36  ;;  %v646_v42 = vmul.f32 %v5967_v19, %v632_v39  ;;  %v647_v43 = vmul.f32 %v5957_v17, %v628_v38 }
  0x98   : > { %v6041_v30 = vrot.slane %v5953_v14, %v6024_v15 }
  0x99   : > { %v653_v44 = vpop.permute.xlu1 %652  ;;  %v651_v45 = vpop.permute.xlu0 %650  ;;  %v4988_v46 = vpack.c.bf16 %v649_v41, %v647_v43  ;;  %v4990_v47 = vpack.c.bf16 %v648_v40, %v646_v42 }
  0x9a   : > { %s6455_s29 = scalar_lea.vmem %s8488_s27, %s5796_s26  ;;  %s8507_s27 = smov 112  }
  0x9b   : > { %4989 = vmatprep.subr.bf16.mxu0 %v4988_v46 }
  0x9c   : > { %4991 = vmatpush1.bf16.msra.mxu0 %v4990_v47 }
  0x9d   : > { %v661_v50 = vpop.permute.xlu1 %660  ;;  %v659_v51 = vpop.permute.xlu0 %658 }
  0x9e   : > { %v668_v52 = vsel %vm666_vm1, %v653_v44, %v661_v50  ;;  %v672_v53 = vsel %vm666_vm1, %v661_v50, %v653_v44  ;;  %v667_v54 = vsel %vm666_vm1, %v651_v45, %v659_v51  ;;  %v671_v55 = vsel %vm666_vm1, %v659_v51, %v651_v45 }
  0x9f   : > { %v685_v56 = vmul.f32 %v6005_v48, %v672_v53  ;;  %v686_v57 = vmul.f32 %v6009_v49, %v668_v52  ;;  %v683_v58 = vmul.f32 %v6005_v48, %v671_v55  ;;  %v684_v59 = vmul.f32 %v6009_v49, %v667_v54 }
  0xa0   : > { %v6060_v51 = vsub.s32 7, %v5929_v10 }
  0xa1   : > { %v657_v60 = vpop.permute.xlu1 %656  ;;  %v655_v61 = vpop.permute.xlu0 %654  ;;  %v4992_v62 = vpack.c.bf16 %v686_v57, %v684_v59  ;;  %v4994_v63 = vpack.c.bf16 %v685_v56, %v683_v58 }
  0xa2   : > { %8480 = vst [vmem:[#allocation6_spill] sm:$0xff] %v6060_v51 }
  0xa3   : > { %4993 = vmatprep.subr.bf16.mxu0 %v4992_v62 }
  0xa4   : > { %4995 = vmatpush1.bf16.msra.mxu0 %v4994_v63 }
  0xa5   : > { %v665_v8 = vpop.permute.xlu1 %664  ;;  %v663_v9 = vpop.permute.xlu0 %662 }
  0xa6   : > { %v670_v16 = vsel %vm666_vm1, %v657_v60, %v665_v8  ;;  %v674_v18 = vsel %vm666_vm1, %v665_v8, %v657_v60  ;;  %v669_v20 = vsel %vm666_vm1, %v655_v61, %v663_v9  ;;  %v673_v21 = vsel %vm666_vm1, %v663_v9, %v655_v61 }
  0xa7   : > { %v689_v22 = vmul.f32 %v6005_v48, %v674_v18  ;;  %v690_v23 = vmul.f32 %v6009_v49, %v670_v16  ;;  %v687_v24 = vmul.f32 %v6005_v48, %v673_v21  ;;  %v688_v25 = vmul.f32 %v6009_v49, %v669_v20 }
  0xa8   : > { %v6077_v8 = vrot.slane %v5953_v14, %v6060_v51  ;;  %v6081_v9 = vrot.slane %v5947_v13, %v6060_v51 }
  0xa9   : > { %v694_v26 = vpop.permute.xlu1 %693  ;;  %v692_v27 = vpop.permute.xlu0 %691  ;;  %v4996_v28 = vpack.c.bf16 %v690_v23, %v688_v25  ;;  %v4998_v29 = vpack.c.bf16 %v689_v22, %v687_v24 }
  0xab   : > { %4997 = vmatprep.subr.bf16.mxu0 %v4996_v28 }
  0xac   : > { %4999 = vmatpush1.bf16.msra.mxu0 %v4998_v29 }
  0xad   : > { %v702_v32 = vpop.permute.xlu1 %701  ;;  %v700_v33 = vpop.permute.xlu0 %699 }
  0xae   : > { %v709_v34 = vsel %vm707_vm2, %v694_v26, %v702_v32  ;;  %v713_v36 = vsel %vm707_vm2, %v702_v32, %v694_v26  ;;  %v708_v37 = vsel %vm707_vm2, %v692_v27, %v700_v33  ;;  %v712_v38 = vsel %vm707_vm2, %v700_v33, %v692_v27 }
  0xaf   : > { %v726_v39 = vmul.f32 %v6041_v30, %v713_v36  ;;  %v727_v40 = vmul.f32 %v6045_v31, %v709_v34  ;;  %v724_v41 = vmul.f32 %v6041_v30, %v712_v38  ;;  %v725_v42 = vmul.f32 %v6045_v31, %v708_v37 }
  0xb1   : > { %v698_v43 = vpop.permute.xlu1 %697  ;;  %v696_v44 = vpop.permute.xlu0 %695  ;;  %v5000_v45 = vpack.c.bf16 %v727_v40, %v725_v42  ;;  %v5002_v46 = vpack.c.bf16 %v726_v39, %v724_v41 }
  0xb3   : > { %5001 = vmatprep.subr.bf16.mxu0 %v5000_v45 }
  0xb4   : > { %5003 = vmatpush1.bf16.msra.mxu0 %v5002_v46 }
  0xb5   : > { %v706_v47 = vpop.permute.xlu1 %705  ;;  %v704_v50 = vpop.permute.xlu0 %703 }
  0xb6   : > { %v711_v52 = vsel %vm707_vm2, %v698_v43, %v706_v47  ;;  %v715_v53 = vsel %vm707_vm2, %v706_v47, %v698_v43  ;;  %v710_v54 = vsel %vm707_vm2, %v696_v44, %v704_v50  ;;  %v714_v55 = vsel %vm707_vm2, %v704_v50, %v696_v44  ;;  %v6110_v43 = vld [vmem:[%s8413_s5 + $0x38] sm:$0xff] }
  0xb7   : > { %v730_v56 = vmul.f32 %v6041_v30, %v715_v53  ;;  %v731_v57 = vmul.f32 %v6045_v31, %v711_v52  ;;  %v728_v58 = vmul.f32 %v6041_v30, %v714_v55  ;;  %v729_v59 = vmul.f32 %v6045_v31, %v710_v54  ;;  %v6119_v52 = vld [vmem:[%s8413_s5 + $0x30] sm:$0xff] }
  0xb8   : > { %v6114_v50 = vpack.c.bf16 %v5810_v2, %v5802_v0  ;;  %v6124_v53 = vrot.slane %v6110_v43, %v5988_v35  ;;  %v6128_v54 = vpack.c.bf16 %v5812_v3, %v5804_v1  ;;  %v6132_v0 = vrot.slane %v6119_v52, %v5988_v35 }
  0xb9   : > { %v735_v60 = vpop.permute.xlu1 %734  ;;  %v733_v61 = vpop.permute.xlu0 %732  ;;  %v5004_v62 = vpack.c.bf16 %v731_v57, %v729_v59  ;;  %v5006_v63 = vpack.c.bf16 %v730_v56, %v728_v58  ;;  %v6137_v56 = vpack.c.bf16 %v5826_v6, %v5828_v7  ;;  %v6152_v6 = vpack.c.bf16 %v5818_v4, %v5820_v5 }
  0xba   : > { %8481 = vst [vmem:[#allocation7_spill] sm:$0xff] %v6114_v50  ;;  %8482 = vst [vmem:[#allocation8_spill] sm:$0xff] %v6128_v54 }
  0xbb   : > { %5005 = vmatprep.subr.bf16.mxu0 %v5004_v62  ;;  %8483 = vst [vmem:[#allocation9_spill] sm:$0xff] %v6137_v56  ;;  %8484 = vst [vmem:[#allocation10_spill] sm:$0xff] %v6152_v6 }
  0xbc   : > { %5007 = vmatpush1.bf16.msra.mxu0 %v5006_v63 }
  0xbd   : > { %v743_v16 = vpop.permute.xlu1 %742  ;;  %v741_v18 = vpop.permute.xlu0 %740 }
  0xbe   : > { %v750_v20 = vsel %vm748_vm3, %v735_v60, %v743_v16  ;;  %v754_v21 = vsel %vm748_vm3, %v743_v16, %v735_v60  ;;  %v749_v22 = vsel %vm748_vm3, %v733_v61, %v741_v18  ;;  %v753_v14 = vsel %vm748_vm3, %v741_v18, %v733_v61 }
  0xbf   : > { %v767_v23 = vmul.f32 %v6077_v8, %v754_v21  ;;  %v768_v13 = vmul.f32 %v6081_v9, %v750_v20  ;;  %v765_v24 = vmul.f32 %v6077_v8, %v753_v14  ;;  %v766_v25 = vmul.f32 %v6081_v9, %v749_v22 }
  0xc0   : > { %v6159_v22 = vsub.s32 6, %v5929_v10 }
  0xc1   : > { %v739_v26 = vpop.permute.xlu1 %738  ;;  %v737_v27 = vpop.permute.xlu0 %736  ;;  %v5008_v28 = vpack.c.bf16 %v768_v13, %v766_v25  ;;  %v5010_v29 = vpack.c.bf16 %v767_v23, %v765_v24 }
  0xc2   : > { %8485 = vst [vmem:[#allocation11_spill] sm:$0xff] %v6159_v22 }
  0xc3   : > { %5009 = vmatprep.subr.bf16.mxu0 %v5008_v28 }
  0xc4   : > { %5011 = vmatpush1.bf16.msra.mxu0 %v5010_v29 }
  0xc5   : > { %v747_v32 = vpop.permute.xlu1 %746  ;;  %v745_v33 = vpop.permute.xlu0 %744 }
  0xc6   : > { %v752_v34 = vsel %vm748_vm3, %v739_v26, %v747_v32  ;;  %v756_v36 = vsel %vm748_vm3, %v747_v32, %v739_v26  ;;  %v751_v37 = vsel %vm748_vm3, %v737_v27, %v745_v33  ;;  %v755_v38 = vsel %vm748_vm3, %v745_v33, %v737_v27 }
  0xc7   : > { %v771_v39 = vmul.f32 %v6077_v8, %v756_v36  ;;  %v772_v40 = vmul.f32 %v6081_v9, %v752_v34  ;;  %v769_v41 = vmul.f32 %v6077_v8, %v755_v38  ;;  %v770_v42 = vmul.f32 %v6081_v9, %v751_v37 }
  0xc8   : > { %v6176_v33 = vrot.slane %v6119_v52, %v6159_v22  ;;  %v6180_v34 = vrot.slane %v6110_v43, %v6159_v22 }
  0xc9   : > { %v776_v44 = vpop.permute.xlu1 %775  ;;  %v774_v45 = vpop.permute.xlu0 %773  ;;  %v5012_v46 = vpack.c.bf16 %v772_v40, %v770_v42  ;;  %v5014_v47 = vpack.c.bf16 %v771_v39, %v769_v41 }
  0xcb   : > { %5013 = vmatprep.subr.bf16.mxu0 %v5012_v46 }
  0xcc   : > { %5015 = vmatpush1.bf16.msra.mxu0 %v5014_v47 }
  0xcd   : > { %v784_v2 = vpop.permute.xlu1 %783  ;;  %v782_v55 = vpop.permute.xlu0 %781  ;;  %5017 = vmatprep.subr.bf16.mxu0 %v6114_v50 }
  0xce   : > { %v791_v57 = vsel %vm789_vm4, %v776_v44, %v784_v2  ;;  %v795_v58 = vsel %vm789_vm4, %v784_v2, %v776_v44  ;;  %v790_v1 = vsel %vm789_vm4, %v774_v45, %v782_v55  ;;  %v794_v3 = vsel %vm789_vm4, %v782_v55, %v774_v45 }
  0xcf   : > { %v809_v59 = vmul.f32 %v6124_v53, %v795_v58  ;;  %v807_v60 = vmul.f32 %v6124_v53, %v794_v3  ;;  %v808_v7 = vmul.f32 %v6132_v0, %v791_v57  ;;  %v806_v61 = vmul.f32 %v6132_v0, %v790_v1 }
  0xd0   : > { %5019 = vmatpush1.bf16.msra.mxu0 %v6128_v54 }
  0xd1   : > { %v780_v62 = vpop.permute.xlu1 %779  ;;  %v778_v63 = vpop.permute.xlu0 %777  ;;  %5021 = vmatprep.subr.bf16.mxu0 %v6137_v56  ;;  %v5024_v16 = vpack.c.bf16 %v809_v59, %v807_v60  ;;  %v5026_v21 = vpack.c.bf16 %v808_v7, %v806_v61 }
  0xd4   : > { %5023 = vmatpush1.bf16.msra.mxu0 %v6152_v6 }
  0xd5   : > { %v788_v18 = vpop.permute.xlu1 %787  ;;  %v786_v20 = vpop.permute.xlu0 %785  ;;  %5025 = vmatprep.subr.bf16.mxu0 %v5024_v16 }
  0xd6   : > { %v793_v4 = vsel %vm789_vm4, %v780_v62, %v788_v18  ;;  %v797_v5 = vsel %vm789_vm4, %v788_v18, %v780_v62  ;;  %v792_v14 = vsel %vm789_vm4, %v778_v63, %v786_v20  ;;  %v796_v23 = vsel %vm789_vm4, %v786_v20, %v778_v63 }
  0xd7   : > { %v812_v13 = vmul.f32 %v6132_v0, %v793_v4  ;;  %v813_v24 = vmul.f32 %v6124_v53, %v797_v5  ;;  %v810_v25 = vmul.f32 %v6132_v0, %v792_v14  ;;  %v811_v26 = vmul.f32 %v6124_v53, %v796_v23 }
  0xd8   : > { %5027 = vmatpush1.bf16.msra.mxu0 %v5026_v21  ;;  %v6209_v5 = vrot.slane %v6119_v52, %v6060_v51  ;;  %v6213_v14 = vrot.slane %v6110_v43, %v6060_v51 }
  0xd9   : > { %v817_v27 = vpop.permute.xlu1 %816  ;;  %v815_v28 = vpop.permute.xlu0 %814  ;;  %v5028_v29 = vpack.c.bf16 %v813_v24, %v811_v26  ;;  %v5030_v32 = vpack.c.bf16 %v812_v13, %v810_v25 }
  0xdb   : > { %5029 = vmatprep.subr.bf16.mxu0 %v5028_v29 }
  0xdc   : > { %5031 = vmatpush1.bf16.msra.mxu0 %v5030_v32 }
  0xdd   : > { %v825_v36 = vpop.permute.xlu1 %824  ;;  %v823_v37 = vpop.permute.xlu0 %822 }
  0xde   : > { %v832_v38 = vsel %vm830_vm5, %v817_v27, %v825_v36  ;;  %v836_v39 = vsel %vm830_vm5, %v825_v36, %v817_v27  ;;  %v831_v40 = vsel %vm830_vm5, %v815_v28, %v823_v37  ;;  %v835_v41 = vsel %vm830_vm5, %v823_v37, %v815_v28 }
  0xdf   : > { %v849_v42 = vmul.f32 %v6176_v33, %v832_v38  ;;  %v850_v44 = vmul.f32 %v6180_v34, %v836_v39  ;;  %v847_v45 = vmul.f32 %v6176_v33, %v831_v40  ;;  %v848_v46 = vmul.f32 %v6180_v34, %v835_v41 }
  0xe1   : > { %v821_v47 = vpop.permute.xlu1 %820  ;;  %v819_v2 = vpop.permute.xlu0 %818  ;;  %v5032_v55 = vpack.c.bf16 %v850_v44, %v848_v46  ;;  %v5034_v57 = vpack.c.bf16 %v849_v42, %v847_v45 }
  0xe3   : > { %5033 = vmatprep.subr.bf16.mxu0 %v5032_v55 }
  0xe4   : > { %5035 = vmatpush1.bf16.msra.mxu0 %v5034_v57  ;;  %v593_v57 = vld [vmem:[%s8413_s5 + $0x40] sm:$0xff] }
  0xe5   : > { %v829_v58 = vpop.permute.xlu1 %828  ;;  %v827_v1 = vpop.permute.xlu0 %826 }
  0xe6   : > { %v834_v3 = vsel %vm830_vm5, %v821_v47, %v829_v58  ;;  %v838_v59 = vsel %vm830_vm5, %v829_v58, %v821_v47  ;;  %v833_v60 = vsel %vm830_vm5, %v819_v2, %v827_v1  ;;  %v837_v7 = vsel %vm830_vm5, %v827_v1, %v819_v2  ;;  %v594_v58 = vld [vmem:[%s8413_s5 + $0x48] sm:$0xff] }
  0xe7   : > { %v853_v61 = vmul.f32 %v6176_v33, %v834_v3  ;;  %v854_v62 = vmul.f32 %v6180_v34, %v838_v59  ;;  %v851_v63 = vmul.f32 %v6176_v33, %v833_v60  ;;  %v852_v16 = vmul.f32 %v6180_v34, %v837_v7 }
  0xe8   : > { %v6247_v7 = vrot.slane %v593_v57, %v5938_v12 }
  0xe9   : > { %v858_v18 = vpop.permute.xlu1 %857  ;;  %v856_v20 = vpop.permute.xlu0 %855  ;;  %v5036_v21 = vpack.c.bf16 %v854_v62, %v852_v16  ;;  %v5038_v4 = vpack.c.bf16 %v853_v61, %v851_v63  ;;  %v6250_v61 = vrot.slane %v594_v58, %v5938_v12  ;;  %v937_v62 = vld [vmem:[%s8415_s7] sm:$0xff] }
  0xea   : > { %8486 = vst [vmem:[#allocation12_spill] sm:$0xff] %v6247_v7 }
  0xeb   : > { %5037 = vmatprep.subr.bf16.mxu0 %v5036_v21  ;;  %8487 = vst [vmem:[#allocation13_spill] sm:$0xff] %v6250_v61 }
  0xec   : > { %5039 = vmatpush1.bf16.msra.mxu0 %v5038_v4 }
  0xed   : > { %v866_v23 = vpop.permute.xlu1 %865  ;;  %v864_v13 = vpop.permute.xlu0 %863 }
  0xee   : > { %v873_v24 = vsel %vm871_vm6, %v858_v18, %v866_v23  ;;  %v877_v25 = vsel %vm871_vm6, %v866_v23, %v858_v18  ;;  %v872_v26 = vsel %vm871_vm6, %v856_v20, %v864_v13  ;;  %v876_v52 = vsel %vm871_vm6, %v864_v13, %v856_v20  ;;  %v941_v18 = vld [vmem:[%s8415_s7 + $0x20] sm:$0xff] }
  0xef   : > { %v890_v27 = vmul.f32 %v6209_v5, %v873_v24  ;;  %v891_v43 = vmul.f32 %v6213_v14, %v877_v25  ;;  %v888_v28 = vmul.f32 %v6209_v5, %v872_v26  ;;  %v889_v29 = vmul.f32 %v6213_v14, %v876_v52  ;;  %v940_v52 = vld [vmem:[%s8415_s7 + $0x18] sm:$0xff] }
  0xf1   : > { %v862_v32 = vpop.permute.xlu1 %861  ;;  %v860_v36 = vpop.permute.xlu0 %859  ;;  %v5040_v37 = vpack.c.bf16 %v891_v43, %v889_v29  ;;  %v5042_v38 = vpack.c.bf16 %v890_v27, %v888_v28  ;;  %v944_v28 = vld [vmem:[%s8415_s7 + $0x38] sm:$0xff] }
  0xf3   : > { %5041 = vmatprep.subr.bf16.mxu0 %v5040_v37  ;;  %v947_v37 = vld [vmem:[%s8415_s7 + $0x50] sm:$0xff] }
  0xf4   : > { %5043 = vmatpush1.bf16.msra.mxu0 %v5042_v38 }
  0xf5   : > { %v870_v39 = vpop.permute.xlu1 %869  ;;  %v868_v40 = vpop.permute.xlu0 %867 }
  0xf6   : > { %v875_v41 = vsel %vm871_vm6, %v862_v32, %v870_v39  ;;  %v879_v42 = vsel %vm871_vm6, %v870_v39, %v862_v32  ;;  %v874_v44 = vsel %vm871_vm6, %v860_v36, %v868_v40  ;;  %v878_v45 = vsel %vm871_vm6, %v868_v40, %v860_v36  ;;  %v943_v36 = vld [vmem:[%s8415_s7 + $0x30] sm:$0xff] }
  0xf7   : > { %v894_v46 = vmul.f32 %v6209_v5, %v875_v41  ;;  %v895_v47 = vmul.f32 %v6213_v14, %v879_v42  ;;  %v892_v2 = vmul.f32 %v6209_v5, %v874_v44  ;;  %v893_v55 = vmul.f32 %v6213_v14, %v878_v45 }
  0xf9   : > { %v899_v1 = vpop.permute.xlu1 %898  ;;  %v897_v3 = vpop.permute.xlu0 %896  ;;  %v5044_v59 = vpack.c.bf16 %v895_v47, %v893_v55  ;;  %v5046_v60 = vpack.c.bf16 %v894_v46, %v892_v2  ;;  %v1256_v47 = vld [vmem:[%s8410_s2 + $0x80] sm:$0xff]  ;;  %v1257_v2 = vld [vmem:[%s8410_s2 + $0x88] sm:$0xff] }
  0xfa   : > { %v946_v55 = vld [vmem:[%s8415_s7 + $0x48] sm:$0xff] }
  0xfb   : > { %5045 = vmatprep.subr.bf16.mxu0 %v5044_v59 }
  0xfc   : > { %5047 = vmatpush1.bf16.msra.mxu0 %v5046_v60  ;;  %v5056_v60 = vpack.c.bf16 %v1257_v2, %v1256_v47  ;;  %v1246_v2 = vld [vmem:[%s8410_s2 + $0x30] sm:$0xff] }
  0xfd   : > { %v907_v63 = vpop.permute.xlu1 %906  ;;  %v905_v16 = vpop.permute.xlu0 %904 }
  0xfe   : > { %v914_v20 = vsel %vm912_vm7, %v899_v1, %v907_v63  ;;  %v918_v21 = vsel %vm912_vm7, %v907_v63, %v899_v1  ;;  %v913_v4 = vsel %vm912_vm7, %v897_v3, %v905_v16  ;;  %v917_v23 = vsel %vm912_vm7, %v905_v16, %v897_v3  ;;  %v950_v1 = vld [vmem:[%s8415_s7 + $0x68] sm:$0xff]  ;;  %v953_v63 = vld [vmem:[%s8415_s7 + $0x80] sm:$0xff]  ;;  %v952_v16 = vld [vmem:[%s8415_s7 + $0x78] sm:$0xff] }
  0xff   : > { %v931_v13 = vmul.f32 %v6247_v7, %v914_v20  ;;  %v932_v24 = vmul.f32 %v6250_v61, %v918_v21  ;;  %v929_v25 = vmul.f32 %v6247_v7, %v913_v4  ;;  %v930_v26 = vmul.f32 %v6250_v61, %v917_v23  ;;  %1051 = vmatmul.mubr.f32.vlgmr.msra.gmra.mrb[0].mxu0 %v937_v62  ;;  %v949_v62 = vld [vmem:[%s8415_s7 + $0x60] sm:$0xff]  ;;  %v955_v20 = vld [vmem:[%s8415_s7 + $0x90] sm:$0xff]  ;;  %v958_v4 = vld [vmem:[%s8415_s7 + $0xa8] sm:$0xff] }
 0x100   : > { %1056 = vmatprep.mubr.f32.mxu0 %v941_v18  ;;  %v956_v18 = vld [vmem:[%s8415_s7 + $0x98] sm:$0xff]  ;;  %v959_v21 = vld [vmem:[%s8415_s7 + $0xb0] sm:$0xff]  ;;  %v1240_v23 = vld [vmem:[%s8410_s2] sm:$0xff] }
 0x101   : > { %v5050_v27 = vpack.c.bf16 %v931_v13, %v929_v25  ;;  %v5048_v43 = vpack.c.bf16 %v932_v24, %v930_v26  ;;  %v903_v29 = vpop.permute.xlu1 %902  ;;  %v901_v32 = vpop.permute.xlu0 %900  ;;  %v1241_v13 = vld [vmem:[%s8410_s2 + $0x8] sm:$0xff]  ;;  %v1258_v24 = vld [vmem:[%s8410_s2 + $0x90] sm:$0xff]  ;;  %v1259_v25 = vld [vmem:[%s8410_s2 + $0x98] sm:$0xff]  ;;  %v8440_v26 = vmov 0.0  }
 0x103   : > { %1057 = vmatmul.mubr.f32.gmra.mrb[2].mxu0 %v940_v52  ;;  %5049 = vmatprep.subr.bf16.mxu0 %v5048_v43  ;;  %v939_v52 = vld [vmem:[%s8415_s7 + $0x10] sm:$0xff]  ;;  %v5060_v43 = vpack.c.bf16 %v1259_v25, %v1258_v24  ;;  %v1269_v24 = vld [vmem:[%s8410_s2 + $0xe8] sm:$0xff] }
 0x104   : > { %5051 = vmatpush1.bf16.msra.mxu0 %v5050_v27  ;;  %1062 = vmatprep.mubr.f32.mxu0 %v944_v28  ;;  %v5058_v27 = vpack.c.bf16 %v1241_v13, %v1240_v23  ;;  %v1242_v28 = vld [vmem:[%s8410_s2 + $0x10] sm:$0xff]  ;;  %v1251_v23 = vld [vmem:[%s8410_s2 + $0x58] sm:$0xff]  ;;  %v1268_v13 = vld [vmem:[%s8410_s2 + $0xe0] sm:$0xff] }
 0x105   : > { %v911_v38 = vpop.permute.xlu1 %910  ;;  %v954_v25 = vld [vmem:[%s8415_s7 + $0x88] sm:$0xff] }
 0x106   : > { %v916_v39 = vsel %vm912_vm7, %v903_v29, %v911_v38  ;;  %v920_v40 = vsel %vm912_vm7, %v911_v38, %v903_v29  ;;  %v909_v41 = vpop.permute.xlu0 %908  ;;  %v1243_v29 = vld [vmem:[%s8410_s2 + $0x18] sm:$0xff] }
 0x107   : > { %1063 = vmatmul.mubr.f32.gmra.mrb[4].mxu0 %v943_v36  ;;  %v935_v42 = vmul.f32 %v6247_v7, %v916_v39  ;;  %v936_v44 = vmul.f32 %v6250_v61, %v920_v40  ;;  %v915_v45 = vsel %vm912_vm7, %v901_v32, %v909_v41  ;;  %v919_v46 = vsel %vm912_vm7, %v909_v41, %v901_v32  ;;  %v1260_v32 = vld [vmem:[%s8410_s2 + $0xa0] sm:$0xff]  ;;  %v1261_v36 = vld [vmem:[%s8410_s2 + $0xa8] sm:$0xff] }
 0x108   : > { %1068 = vmatprep.mubr.f32.mxu0 %v947_v37  ;;  %v933_v57 = vmul.f32 %v6247_v7, %v915_v45  ;;  %v934_v58 = vmul.f32 %v6250_v61, %v919_v46  ;;  %v942_v37 = vld [vmem:[%s8415_s7 + $0x28] sm:$0xff]  ;;  %v5062_v38 = vpack.c.bf16 %v1243_v29, %v1242_v28  ;;  %v5064_v39 = vpack.c.bf16 %v1261_v36, %v1260_v32  ;;  %v1244_v40 = vld [vmem:[%s8410_s2 + $0x20] sm:$0xff]  ;;  %v1270_v29 = vld [vmem:[%s8410_s2 + $0xf0] sm:$0xff] }
 0x109   : > { %v1245_v41 = vld [vmem:[%s8410_s2 + $0x28] sm:$0xff]  ;;  %v945_v45 = vld [vmem:[%s8415_s7 + $0x40] sm:$0xff]  ;;  %v1271_v32 = vld [vmem:[%s8410_s2 + $0xf8] sm:$0xff] }
 0x10a   : > { %v5054_v3 = vpack.c.bf16 %v935_v42, %v933_v57  ;;  %v5052_v59 = vpack.c.bf16 %v936_v44, %v934_v58  ;;  %v1262_v42 = vld [vmem:[%s8410_s2 + $0xb0] sm:$0xff]  ;;  %v1263_v44 = vld [vmem:[%s8410_s2 + $0xb8] sm:$0xff]  ;;  %v5066_v46 = vpack.c.bf16 %v1245_v41, %v1244_v40  ;;  %v1264_v57 = vld [vmem:[%s8410_s2 + $0xc0] sm:$0xff] }
 0x10b   : > { %1069 = vmatmul.mubr.f32.gmra.mrb[6].mxu0 %v946_v55  ;;  %v5068_v47 = vpack.c.bf16 %v1263_v44, %v1262_v42  ;;  %v1247_v55 = vld [vmem:[%s8410_s2 + $0x38] sm:$0xff]  ;;  %v1265_v58 = vld [vmem:[%s8410_s2 + $0xc8] sm:$0xff]  ;;  %v957_v36 = vld [vmem:[%s8415_s7 + $0xa0] sm:$0xff] }
 0x10c   : > { %1074 = vmatprep.mubr.f32.mxu0 %v950_v1  ;;  %5053 = vmatprep.subr.bf16.mxu0 %v5052_v59  ;;  %v948_v1 = vld [vmem:[%s8415_s7 + $0x58] sm:$0xff]  ;;  %v5072_v59 = vpack.c.bf16 %v1265_v58, %v1264_v57  ;;  %v1253_v28 = vld [vmem:[%s8410_s2 + $0x68] sm:$0xff]  ;;  %v6492_v58 = vld [vmem:[%s6455_s29 + $0x30] sm:$0xff] }
 0x10d   : > { %5055 = vmatpush1.bf16.msra.mxu0 %v5054_v3  ;;  %v5070_v3 = vpack.c.bf16 %v1247_v55, %v1246_v2  ;;  %v1255_v40 = vld [vmem:[%s8410_s2 + $0x78] sm:$0xff]  ;;  %v6463_v44 = vld [vmem:[%s6455_s29 + $0x8] sm:$0xff]  ;;  %v6484_v55 = vld [vmem:[%s6455_s29 + $0x20] sm:$0xff] }
 0x10e   : > { %5057 = vmatprep.subr.bf16.mxu0 %v5056_v60  ;;  %v1248_v60 = vld [vmem:[%s8410_s2 + $0x40] sm:$0xff]  ;;  %v960_v41 = vld [vmem:[%s8415_s7 + $0xb8] sm:$0xff]  ;;  %v6479_v2 = vld [vmem:[%s6455_s29 + $0x28] sm:$0xff] }
 0x10f   : > { %1075 = vmatmul.mubr.f32.gmra.mrb[8].mxu0 %v949_v62  ;;  %v1249_v62 = vld [vmem:[%s8410_s2 + $0x48] sm:$0xff]  ;;  %v6487_v57 = vld [vmem:[%s6455_s29 + $0x38] sm:$0xff] }
 0x110   : > { %1080 = vmatprep.mubr.f32.mxu0 %v953_v63  ;;  %v1266_v63 = vld [vmem:[%s8410_s2 + $0xd0] sm:$0xff] }
 0x113   : > { %1081 = vmatmul.mubr.f32.gmra.mrb[10].mxu0 %v952_v16  ;;  %v1267_v16 = vld [vmem:[%s8410_s2 + $0xd8] sm:$0xff] }
 0x114   : > { %1086 = vmatprep.mubr.f32.mxu0 %v956_v18  ;;  %v951_v18 = vld [vmem:[%s8415_s7 + $0x70] sm:$0xff] }
 0x117   : > { %1087 = vmatmul.mubr.f32.gmra.mrb[12].mxu0 %v955_v20  ;;  %v5074_v20 = vpack.c.bf16 %v1249_v62, %v1248_v60  ;;  %v8438_v60 = vmov 0   ;;  %v6516_v62 = vld [vmem:[%s8416_s8 + $0x18] sm:$0xff] }
 0x118   : > { %1092 = vmatprep.mubr.f32.mxu0 %v959_v21  ;;  %v5076_v21 = vpack.c.bf16 %v1267_v16, %v1266_v63  ;;  %5506 = vset.pattern.permute.xlu0 %v8438_v60  ;;  %v6521_v63 = vld [vmem:[%s8416_s8 + $0x10] sm:$0xff] }
 0x119   : > { %5507 = vset.pattern.permute.xlu1 %v8438_v60 }
 0x11b   : > { %1093 = vmatmul.mubr.f32.gmra.mrb[14].mxu0 %v958_v4  ;;  %v1250_v4 = vld [vmem:[%s8410_s2 + $0x50] sm:$0xff] }
 0x11c   : > { %1163 = vmatprep.mubr.f32.mxu0 %v8440_v26 }
 0x11f   : > { %4789 = vmatmul.mubr.msk.f32.vlgmr.msra.gmra.mrb[0].mxu0 %vm961_vm8, %v939_v52  ;;  %v5078_v52 = vpack.c.bf16 %v1251_v23, %v1250_v4 }
 0x120   : > { %5059 = vmatpush3.bf16.msra.mxu0 %v5058_v27  ;;  %1169 = vmatprep.mubr.f32.mxu0 %v8440_v26  ;;  %v5080_v27 = vpack.c.bf16 %v1269_v24, %v1268_v13 }
 0x121   : > { %5061 = vmatprep.subr.bf16.mxu0 %v5060_v43  ;;  %v1252_v43 = vld [vmem:[%s8410_s2 + $0x60] sm:$0xff] }
 0x123   : > { %4790 = vmatmul.mubr.msk.f32.gmra.mrb[2].mxu0 %vm961_vm8, %v942_v37  ;;  %v5082_v37 = vpack.c.bf16 %v1253_v28, %v1252_v43 }
 0x124   : > { %5063 = vmatpush3.bf16.msra.mxu0 %v5062_v38  ;;  %1175 = vmatprep.mubr.f32.mxu0 %v8440_v26  ;;  %v5084_v38 = vpack.c.bf16 %v1271_v32, %v1270_v29 }
 0x125   : > { %5065 = vmatprep.subr.bf16.mxu0 %v5064_v39  ;;  %v1254_v39 = vld [vmem:[%s8410_s2 + $0x70] sm:$0xff] }
 0x126   : > { %v5086_v42 = vpack.c.bf16 %v1255_v40, %v1254_v39 }
 0x127   : > { %4791 = vmatmul.mubr.msk.f32.gmra.mrb[4].mxu0 %vm961_vm8, %v945_v45  ;;  %v6468_v45 = vld [vmem:[%s6455_s29] sm:$0xff] }
 0x128   : > { %5067 = vmatpush3.bf16.msra.mxu0 %v5066_v46  ;;  %1181 = vmatprep.mubr.f32.mxu0 %v8440_v26  ;;  %v6471_v46 = vld [vmem:[%s6455_s29 + $0x18] sm:$0xff] }
 0x129   : > { %5069 = vmatprep.subr.bf16.mxu0 %v5068_v47  ;;  %v6476_v47 = vld [vmem:[%s6455_s29 + $0x10] sm:$0xff] }
 0x12b   : > { %4792 = vmatmul.mubr.msk.f32.gmra.mrb[6].mxu0 %vm961_vm8, %v948_v1  ;;  %v1357_v1 = vld [vmem:[%s8414_s6] sm:$0xff] }
 0x12c   : > { %5071 = vmatpush3.bf16.msra.mxu0 %v5070_v3  ;;  %1187 = vmatprep.mubr.f32.mxu0 %v8440_v26  ;;  %v6502_v3 = vld [vmem:[%s8416_s8] sm:$0xff] }
 0x12d   : > { %5073 = vmatprep.subr.bf16.mxu0 %v5072_v59  ;;  %4945 = vmatprep.mubr.msk.f32.mxu1 %vm961_vm8, %v1357_v1  ;;  %v6507_v59 = vld [vmem:[%s8416_s8 + $0x8] sm:$0xff] }
 0x12e   : > { %1362 = vperm.xlu0 %5506, %v6502_v3   ;;  %1366 = vperm.xlu1 %5507, %v6507_v59   ;;  %v1358_v1 = vld [vmem:[%s8414_s6 + $0x8] sm:$0xff] }
 0x12f   : > { %4793 = vmatmul.mubr.msk.f32.gmra.mrb[8].mxu0 %vm961_vm8, %v951_v18 }
 0x130   : > { %5075 = vmatpush3.bf16.msra.mxu0 %v5074_v20  ;;  %1193 = vmatprep.mubr.f32.mxu0 %v8440_v26 }
 0x131   : > { %5077 = vmatprep.subr.bf16.mxu0 %v5076_v21 }
 0x132   : > { %1374 = vperm.xlu0 %5506, %v6516_v62   ;;  %1370 = vperm.xlu1 %5507, %v6521_v63  }
 0x133   : > { %4794 = vmatmul.mubr.msk.f32.gmra.mrb[10].mxu0 %vm961_vm8, %v954_v25 }
 0x134   : > { %5079 = vmatpush3.bf16.msra.mxu0 %v5078_v52  ;;  %1199 = vmatprep.mubr.f32.mxu0 %v8440_v26 }
 0x135   : > { %5081 = vmatprep.subr.bf16.mxu0 %v5080_v27 }
 0x137   : > { %4795 = vmatmul.mubr.msk.f32.gmra.mrb[12].mxu0 %vm961_vm8, %v957_v36 }
 0x138   : > { %5083 = vmatpush3.bf16.msra.mxu0 %v5082_v37  ;;  %1205 = vmatprep.mubr.f32.mxu0 %v8440_v26 }
 0x139   : > { %5085 = vmatprep.subr.bf16.mxu0 %v5084_v38 }
 0x13b   : > { %4796 = vmatmul.mubr.msk.f32.gmra.mrb[14].mxu0 %vm961_vm8, %v960_v41 }
 0x13c   : > { %5087 = vmatpush3.bf16.msra.mxu0 %v5086_v42  ;;  %1336 = vmatprep.mubr.f32.mxu0 %v6463_v44 }
 0x13f   : > { %1337 = vmatmul.mubr.f32.vlgmr.msra.gmra.mrb[16].mxu0 %v6468_v45 }
 0x140   : > { %1341 = vmatprep.mubr.f32.mxu0 %v6471_v46 }
 0x143   : > { %1342 = vmatmul.mubr.f32.gmra.mrb[18].mxu0 %v6476_v47 }
 0x144   : > { %1346 = vmatprep.mubr.f32.mxu0 %v6479_v2 }
 0x147   : > { %1347 = vmatmul.mubr.f32.gmra.mrb[20].mxu0 %v6484_v55 }
 0x148   : > { %1351 = vmatprep.mubr.f32.mxu0 %v6487_v57 }
 0x14b   : > { %1352 = vmatmul.mubr.f32.gmra.mrb[22].mxu0 %v6492_v58 }
 0x1f2   : > { %v6525_v16 = vpop.f32.mrb[0].mxu0 }
 0x1f3   : > { %v6527_v18 = vpop.f32.mrb[1].mxu0 }
 0x1f6   : > { %v6529_v20 = vpop.f32.mrb[2].mxu0 }
 0x1f7   : > { %v6531_v21 = vpop.f32.mrb[3].mxu0 }
 0x1fa   : > { %v6533_v4 = vpop.f32.mrb[4].mxu0 }
 0x1fb   : > { %v6535_v23 = vpop.f32.mrb[5].mxu0 }
 0x1fe   : > { %v6537_v13 = vpop.f32.mrb[6].mxu0 }
 0x1ff   : > { %v6539_v24 = vpop.f32.mrb[7].mxu0 }
 0x212   : > { %v4899_v25 = vpop.f32.mrb[16].mxu0 }
 0x213   : > { %v4900_v52 = vpop.f32.mrb[17].mxu0 }
 0x214   : > { %v4901_v27 = vadd.f32 %v4900_v52, %v4899_v25  ;;  %v1359_v25 = vld [vmem:[%s8414_s6 + $0x10] sm:$0xff]  ;;  %v1360_v52 = vld [vmem:[%s8414_s6 + $0x18] sm:$0xff] }
 0x216   : > { %v4902_v43 = vpop.f32.mrb[18].mxu0 }
 0x217   : > { %v4903_v28 = vpop.f32.mrb[19].mxu0 }
 0x218   : > { %v4904_v29 = vadd.f32 %v4903_v28, %v4902_v43  ;;  %v1477_v43 = vld [vmem:[%s8411_s3 + $0x18] sm:$0xff]  ;;  %v1474_v28 = vld [vmem:[%s8411_s3] sm:$0xff] }
 0x21a   : > { %v4905_v32 = vpop.f32.mrb[20].mxu0  ;;  %v5088_v36 = vpack.c.bf16 %v4904_v29, %v4901_v27  ;;  %v1475_v27 = vld [vmem:[%s8411_s3 + $0x8] sm:$0xff] }
 0x21b   : > { %v4906_v37 = vpop.f32.mrb[21].mxu0  ;;  %v5096_v29 = vpack.c.bf16 %v1477_v43, %v1475_v27 }
 0x21c   : > { %v4907_v38 = vadd.f32 %v4906_v37, %v4905_v32  ;;  %5089 = vmatprep.subr.bf16.mxu1 %v5088_v36  ;;  %v1476_v32 = vld [vmem:[%s8411_s3 + $0x10] sm:$0xff]  ;;  %v1479_v37 = vld [vmem:[%s8411_s3 + $0x28] sm:$0xff] }
 0x21d   : > { %5091 = vmatpush3.bf16.msra.mxu1 %v5088_v36  ;;  %v5098_v36 = vpack.c.bf16 %v1476_v32, %v1474_v28 }
 0x21e   : > { %v4908_v39 = vpop.f32.mrb[22].mxu0 }
 0x21f   : > { %v4909_v40 = vpop.f32.mrb[23].mxu0 }
 0x220   : > { %v4910_v41 = vadd.f32 %v4909_v40, %v4908_v39  ;;  %v1363_v40 = vpop.permute.xlu0 %1362 }
 0x222   : > { %v5092_v42 = vpack.c.bf16 %v4910_v41, %v4907_v38  ;;  %v1481_v38 = vld [vmem:[%s8411_s3 + $0x38] sm:$0xff]  ;;  %v1367_v41 = vpop.permute.xlu1 %1366 }
 0x223   : > { %v5100_v39 = vpack.c.bf16 %v1481_v38, %v1479_v37 }
 0x224   : > { %5093 = vmatprep.subr.bf16.mxu1 %v5092_v42  ;;  %v1375_v28 = vpop.permute.xlu0 %1374 }
 0x225   : > { %5095 = vmatpush3.bf16.msra.mxu1 %v5092_v42 }
 0x226   : > { %5097 = vmatprep.subr.bf16.mxu1 %v5096_v29  ;;  %v1371_v43 = vpop.permute.xlu1 %1370 }
 0x228   : > { %4946 = vmatmul.mubr.msk.f32.vlgmr.msra.gmra.mrb[0].mxu1 %vm961_vm8, %v1358_v1 }
 0x229   : > { %4948 = vmatprep.mubr.msk.f32.mxu1 %vm961_vm8, %v1359_v25  ;;  %5099 = vmatpush1.bf16.msra.mxu1 %v5098_v36 }
 0x22a   : > { %5101 = vmatprep.subr.bf16.mxu1 %v5100_v39 }
 0x22c   : > { %4949 = vmatmul.mubr.msk.f32.gmra.mrb[2].mxu1 %vm961_vm8, %v1360_v52 }
 0x22d   : > { %1583 = vmatprep.mubr.f32.mxu1 %v8440_v26 }
 0x2fb   : > { %v4947_v42 = vpop.f32.mrb[0].mxu1 }
 0x2fc   : > { %v1461_v1 = vadd.f32 %v4947_v42, %v1367_v41  ;;  %v1455_v25 = vpop.f32.mrb[1].mxu1 }
 0x2fd   : > { %v1456_v52 = vadd.f32 %v1455_v25, %v1363_v40 }
 0x2fe   : > { %v4802_v27 = vmul.f32 -1.442695, %v1461_v1 }
 0x2ff   : > { %v4801_v29 = vmul.f32 -1.442695, %v1456_v52  ;;  %v4950_v32 = vpop.f32.mrb[2].mxu1 }
 0x300   : > { %5524 = vpow2.f32 %v4802_v27  ;;  %v1471_v36 = vadd.f32 %v4950_v32, %v1375_v28  ;;  %v1465_v60 = vpop.f32.mrb[3].mxu1  ;;  %v8489_v27 = vmov 0.0  }
 0x301   : > { %5526 = vpow2.f32 %v4801_v29  ;;  %v1466_v26 = vadd.f32 %v1465_v60, %v1371_v43  ;;  %v1478_v60 = vld [vmem:[%s8411_s3 + $0x20] sm:$0xff] }
 0x302   : > { %v4804_v51 = vmul.f32 -1.442695, %v1471_v36 }
 0x303   : > { %v4803_v22 = vmul.f32 -1.442695, %v1466_v26 }
 0x304   : > { %5528 = vpow2.f32 %v4804_v51  ;;  %v1480_v51 = vld [vmem:[%s8411_s3 + $0x30] sm:$0xff] }
 0x305   : > { %5530 = vpow2.f32 %v4803_v22  ;;  %v5102_v22 = vpack.c.bf16 %v1480_v51, %v1478_v60 }
 0x30a   : > { %v5525_v37 = vpop.eup %5524 }
 0x30b   : > { %v5527_v38 = vpop.eup %5526  ;;  %v1495_v39 = vadd.f32 1.0, %v5525_v37 }
 0x30c   : > { %v1494_v41 = vadd.f32 1.0, %v5527_v38 }
 0x30d   : > { %5532 = vrcp.f32 %v1495_v39 }
 0x30e   : > { %v5529_v40 = vpop.eup %5528  ;;  %5534 = vrcp.f32 %v1494_v41 }
 0x30f   : > { %v5531_v42 = vpop.eup %5530  ;;  %v1497_v1 = vadd.f32 1.0, %v5529_v40  ;;  %v8450_v40 = vmov 2  }
 0x310   : > { %v1496_v25 = vadd.f32 1.0, %v5531_v42  ;;  %5509 = vset.pattern.permute.xlu1 %v8450_v40  ;;  %5508 = vset.pattern.permute.xlu0 %v8450_v40 }
 0x311   : > { %5536 = vrcp.f32 %v1497_v1 }
 0x312   : > { %5538 = vrcp.f32 %v1496_v25 }
 0x317   : > { %v5533_v26 = vpop.eup %5532 }
 0x318   : > { %v5535_v52 = vpop.eup %5534  ;;  %1610 = vrot.lane.b32.xlu0 %v5533_v26, %s8469_s22 }
 0x319   : > { %1608 = vrot.lane.b32.xlu1 %v5535_v52, %s8469_s22  ;;  %4805 = vmatmul.mubr.msk.f32.vlgmr.msra.gmra.mrb[4].mxu1 %vm1506_vm9, %v5535_v52 }
 0x31a   : > { %1589 = vmatprep.mubr.f32.mxu1 %v8489_v27  ;;  %5103 = vmatpush1.bf16.msra.mxu1 %v5102_v22 }
 0x31b   : > { %v5537_v43 = vpop.eup %5536 }
 0x31c   : > { %v5539_v28 = vpop.eup %5538  ;;  %1614 = vrot.lane.b32.xlu0 %v5537_v43, %s8469_s22 }
 0x31d   : > { %4806 = vmatmul.mubr.msk.f32.gmra.mrb[6].mxu1 %vm1506_vm9, %v5533_v26  ;;  %1612 = vrot.lane.b32.xlu1 %v5539_v28, %s8469_s22 }
 0x31e   : > { %1595 = vmatprep.mubr.f32.mxu1 %v8489_v27 }
 0x321   : > { %4807 = vmatmul.mubr.msk.f32.gmra.mrb[8].mxu1 %vm1506_vm9, %v5539_v28 }
 0x322   : > { %1601 = vmatprep.mubr.f32.mxu1 %v8489_v27 }
 0x325   : > { %4808 = vmatmul.mubr.msk.f32.gmra.mrb[10].mxu1 %vm1506_vm9, %v5537_v43 }
 0x326   : > { %1688 = vmatprep.mubr.f32.mxu1 %v8489_v27 }
 0x38a   : > { %v1611_v32 = vpop.permute.xlu0 %1610 }
 0x38b   : > { %v1609_v29 = vpop.permute.xlu1 %1608 }
 0x38c   : > { %4809 = vmatmul.mubr.msk.f32.vlgmr.msra.gmra.mrb[12].mxu1 %vm1506_vm9, %v1609_v29 }
 0x38d   : > { %1694 = vmatprep.mubr.f32.mxu1 %v8489_v27 }
 0x38e   : > { %v1615_v37 = vpop.permute.xlu0 %1614 }
 0x38f   : > { %v1613_v36 = vpop.permute.xlu1 %1612 }
 0x390   : > { %4810 = vmatmul.mubr.msk.f32.gmra.mrb[14].mxu1 %vm1506_vm9, %v1611_v32 }
 0x391   : > { %1700 = vmatprep.mubr.f32.mxu1 %v8489_v27 }
 0x394   : > { %4811 = vmatmul.mubr.msk.f32.gmra.mrb[16].mxu1 %vm1506_vm9, %v1613_v36 }
 0x395   : > { %1706 = vmatprep.mubr.f32.mxu1 %v8489_v27 }
 0x398   : > { %4812 = vmatmul.mubr.msk.f32.gmra.mrb[18].mxu1 %vm1506_vm9, %v1615_v37  ;;  %vm3787_vm9 = vcmp.lt.s32.totalorder %v5935_v11, 49 }
 0x3ec   : > { %v1585_v38 = vpop.f32.mrb[4].mxu1 }
 0x3ed   : > { %v1587_v39 = vpop.f32.mrb[5].mxu1 }
 0x3f0   : > { %v1591_v41 = vpop.f32.mrb[6].mxu1 }
 0x3f1   : > { %v1593_v42 = vpop.f32.mrb[7].mxu1 }
 0x3f4   : > { %v1597_v1 = vpop.f32.mrb[8].mxu1 }
 0x3f5   : > { %v1599_v25 = vpop.f32.mrb[9].mxu1 }
 0x3f8   : > { %v1603_v60 = vpop.f32.mrb[10].mxu1 }
 0x3f9   : > { %v1605_v51 = vpop.f32.mrb[11].mxu1 }
 0x45f   : > { %v1690_v22 = vpop.f32.mrb[12].mxu1 }
 0x460   : > { %v1713_v26 = vmul.f32 %v1690_v22, %v1585_v38  ;;  %v1692_v52 = vpop.f32.mrb[13].mxu1 }
 0x461   : > { %v1714_v43 = vmul.f32 %v1692_v52, %v1587_v39 }
 0x462   : > { %v1721_v28 = vmul.f32 %v1713_v26, %v6468_v45 }
 0x463   : > { %v1722_v29 = vmul.f32 %v1714_v43, %v6463_v44  ;;  %v1696_v32 = vpop.f32.mrb[14].mxu1 }
 0x464   : > { %v1715_v36 = vmul.f32 %v1696_v32, %v1591_v41  ;;  %v1698_v37 = vpop.f32.mrb[15].mxu1 }
 0x465   : > { %v1716_v15 = vmul.f32 %v1698_v37, %v1593_v42  ;;  %v1729_v10 = vadd.f32 %v1722_v29, %v1721_v28 }
 0x466   : > { %v1723_v40 = vmul.f32 %v1715_v36, %v6476_v47 }
 0x467   : > { %v1724_v35 = vmul.f32 %v1716_v15, %v6471_v46  ;;  %1730 = vadd.xlane.f32.xlu1 %v1729_v10  ;;  %v1702_v12 = vpop.f32.mrb[16].mxu1  ;;  %v8458_v10 = vmov 1  }
 0x468   : > { %v1717_v6 = vmul.f32 %v1702_v12, %v1597_v1  ;;  %v1704_v56 = vpop.f32.mrb[17].mxu1  ;;  %v5654_v12 = vmov 3  }
 0x469   : > { %v1718_v38 = vmul.f32 %v1704_v56, %v1599_v25  ;;  %v1732_v22 = vadd.f32 %v1724_v35, %v1723_v40 }
 0x46a   : > { %v1725_v39 = vmul.f32 %v1717_v6, %v6484_v55 }
 0x46b   : > { %v1726_v26 = vmul.f32 %v1718_v38, %v6479_v2  ;;  %1733 = vadd.xlane.f32.xlu0 %v1732_v22  ;;  %v1708_v52 = vpop.f32.mrb[18].mxu1 }
 0x46c   : > { %v1719_v41 = vmul.f32 %v1708_v52, %v1603_v60  ;;  %v1710_v43 = vpop.f32.mrb[19].mxu1 }
 0x46d   : > { %v1720_v42 = vmul.f32 %v1710_v43, %v1605_v51  ;;  %v1735_v32 = vadd.f32 %v1726_v26, %v1725_v39 }
 0x46e   : > { %v1727_v15 = vmul.f32 %v1719_v41, %v6492_v58 }
 0x46f   : > { %1736 = vadd.xlane.f32.xlu0 %v1735_v32  ;;  %v1728_v56 = vmul.f32 %v1720_v42, %v6487_v57 }
 0x471   : > { %v1738_v6 = vadd.f32 %v1728_v56, %v1727_v15 }
 0x478   : > { %1799 = vperm.xlu1 %5509, %v6507_v59  }
 0x47c   : > { %1803 = vperm.xlu1 %5509, %v6521_v63  }
 0x480   : > { %1807 = vperm.xlu1 %5509, %v6516_v62  }
 0x484   : > { %5510 = vset.pattern.permute.xlu1 %v8458_v10 }
 0x485   : > { %1214 = vperm.xlu1 %5510, %v6502_v3   ;;  %1795 = vperm.xlu0 %5508, %v6502_v3  }
 0x489   : > { %1219 = vperm.xlu1 %5510, %v6507_v59   ;;  %5512 = vset.pattern.permute.xlu0 %v5654_v12 }
 0x48d   : > { %1224 = vperm.xlu1 %5510, %v6521_v63  }
 0x491   : > { %1229 = vperm.xlu1 %5510, %v6516_v62  }
 0x495   : > { %5511 = vset.pattern.permute.xlu1 %v5654_v12 }
 0x4b5   : > { %1739 = vadd.xlane.f32.xlu1 %v1738_v6 }
 0x4c6   : > { %1819 = vperm.xlu1 %5511, %v6502_v3  }
 0x4f4   : > { %v1731_v2 = vpop.xlane.xlu1 %1730 }
 0x4f5   : > { %v1742_v1 = vmul.f32 0.00390625, %v1731_v2 }
 0x4f7   : > { %v6617_v25 = vsub.f32 %v1721_v28, %v1742_v1  ;;  %v6619_v60 = vsub.f32 %v1722_v29, %v1742_v1 }
 0x4f8   : > { %v1734_v51 = vpop.xlane.xlu0 %1733  ;;  %v1800_v12 = vpop.permute.xlu1 %1799 }
 0x4f9   : > { %v1743_v36 = vmul.f32 0.00390625, %v1734_v51  ;;  %v1754_v37 = vmul.f32 %v6617_v25, %v6617_v25  ;;  %v1755_v58 = vmul.f32 %v6619_v60, %v6619_v60 }
 0x4fb   : > { %v6625_v38 = vsub.f32 %v1723_v40, %v1743_v36  ;;  %v6627_v57 = vsub.f32 %v1724_v35, %v1743_v36  ;;  %v1762_v22 = vadd.f32 %v1755_v58, %v1754_v37 }
 0x4fc   : > { %v1737_v3 = vpop.xlane.xlu0 %1736  ;;  %v6643_v6 = vpop.permute.xlu1 %1803 }
 0x4fd   : > { %v1744_v52 = vmul.f32 0.00390625, %v1737_v3  ;;  %1763 = vadd.xlane.f32.xlu0 %v1762_v22  ;;  %v1756_v28 = vmul.f32 %v6625_v38, %v6625_v38  ;;  %v1757_v29 = vmul.f32 %v6627_v57, %v6627_v57 }
 0x4ff   : > { %v6633_v41 = vsub.f32 %v1725_v39, %v1744_v52  ;;  %v6635_v43 = vsub.f32 %v1726_v26, %v1744_v52  ;;  %v1765_v42 = vadd.f32 %v1757_v29, %v1756_v28  ;;  %v8490_v39 = vmov 0  }
 0x500   : > { %v6646_v26 = vpop.permute.xlu1 %1807 }
 0x501   : > { %1766 = vadd.xlane.f32.xlu1 %v1765_v42  ;;  %v1758_v35 = vmul.f32 %v6633_v41, %v6633_v41  ;;  %v1759_v40 = vmul.f32 %v6635_v43, %v6635_v43 }
 0x503   : > { %v1768_v32 = vadd.f32 %v1759_v40, %v1758_v35 }
 0x504   : > { %v1215_v2 = vpop.permute.xlu1 %1214  ;;  %v1796_v42 = vpop.permute.xlu0 %1795 }
 0x505   : > { %1769 = vadd.xlane.f32.xlu0 %v1768_v32  ;;  %v6669_v29 = vadd.f32 %v1215_v2, %v6525_v16 }
 0x508   : > { %v1220_v1 = vpop.permute.xlu1 %1219 }
 0x509   : > { %v6649_v51 = vadd.f32 %v1220_v1, %v6529_v20  ;;  %v6652_v36 = vadd.f32 %v1220_v1, %v6531_v21 }
 0x50c   : > { %v1225_v37 = vpop.permute.xlu1 %1224 }
 0x512   : > { %1827 = vperm.xlu1 %5511, %v6521_v63   ;;  %v1861_v63 = vadd.f32 %v6652_v36, %v6649_v51 }
 0x51b   : > { %1823 = vperm.xlu0 %5512, %v6507_v59   ;;  %v6656_v59 = vpop.permute.xlu1 %1229 }
 0x51f   : > { %5513 = vset.pattern.permute.xlu0 %v8490_v39 }
 0x53a   : > { %1862 = vadd.xlane.f32.xlu0 %v1861_v63 }
 0x542   : > { %v1740_v58 = vpop.xlane.xlu1 %1739 }
 0x543   : > { %v1745_v22 = vmul.f32 0.00390625, %v1740_v58 }
 0x545   : > { %v6658_v3 = vsub.f32 %v1727_v15, %v1745_v22  ;;  %v6660_v52 = vsub.f32 %v1728_v56, %v1745_v22  ;;  %v6672_v15 = vadd.f32 %v1215_v2, %v6527_v18 }
 0x546   : > { %v1820_v35 = vpop.permute.xlu1 %1819 }
 0x547   : > { %v1760_v20 = vmul.f32 %v6658_v3, %v6658_v3  ;;  %v1761_v21 = vmul.f32 %v6660_v52, %v6660_v52  ;;  %v1858_v56 = vadd.f32 %v6672_v15, %v6669_v29 }
 0x549   : > { %v1771_v28 = vadd.f32 %v1761_v21, %v1760_v20 }
 0x54b   : > { %1772 = vadd.xlane.f32.xlu1 %v1771_v28 }
 0x55c   : > { %1831 = vperm.xlu1 %5511, %v6516_v62  }
 0x560   : > { %5514 = vset.pattern.permute.xlu1 %v8458_v10 }
 0x580   : > { %1859 = vadd.xlane.f32.xlu1 %v1858_v56 }
 0x58a   : > { %v1764_v40 = vpop.xlane.xlu0 %1763 }
 0x58b   : > { %v1774_v32 = vmul.f32 0.00390625, %v1764_v40 }
 0x58d   : > { %v1778_v1 = vadd.f32 1e-05, %v1774_v32 }
 0x58e   : > { %v1767_v63 = vpop.xlane.xlu1 %1766 }
 0x58f   : > { %5540 = vrsqrt.f32 %v1778_v1  ;;  %v1775_v62 = vmul.f32 0.00390625, %v1767_v63 }
 0x591   : > { %v1779_v58 = vadd.f32 1e-05, %v1775_v62 }
 0x592   : > { %v1770_v22 = vpop.xlane.xlu0 %1769 }
 0x593   : > { %5542 = vrsqrt.f32 %v1779_v58  ;;  %v1776_v16 = vmul.f32 0.00390625, %v1770_v22 }
 0x595   : > { %v1780_v20 = vadd.f32 1e-05, %v1776_v16 }
 0x597   : > { %5544 = vrsqrt.f32 %v1780_v20 }
 0x599   : > { %v5541_v18 = vpop.eup %5540 }
 0x59a   : > { %v1786_v2 = vmul.f32 %v5541_v18, %v6617_v25  ;;  %v1787_v21 = vmul.f32 %v5541_v18, %v6619_v60  ;;  %v1824_v62 = vpop.permute.xlu0 %1823 }
 0x59c   : > { %v1810_v28 = vmul.f32 %v1796_v42, %v1786_v2  ;;  %v1811_v56 = vmul.f32 %v1796_v42, %v1787_v21  ;;  %v6696_v42 = vadd.f32 %v1225_v37, %v6535_v23  ;;  %v1828_v2 = vpop.permute.xlu1 %1827 }
 0x59d   : > { %v5543_v10 = vpop.eup %5542 }
 0x59e   : > { %v1788_v40 = vmul.f32 %v5543_v10, %v6625_v38  ;;  %v1789_v32 = vmul.f32 %v5543_v10, %v6627_v57  ;;  %v6680_v1 = vadd.f32 %v1820_v35, %v1810_v28  ;;  %v6682_v63 = vadd.f32 %v1820_v35, %v1811_v56 }
 0x59f   : > { %v6693_v57 = vadd.f32 %v1225_v37, %v6533_v4 }
 0x5a0   : > { %v1812_v58 = vmul.f32 %v1800_v12, %v1788_v40  ;;  %v1813_v22 = vmul.f32 %v1800_v12, %v1789_v32  ;;  %v1842_v16 = vadd.f32 %v6682_v63, %v6680_v1 }
 0x5a1   : > { %v5545_v25 = vpop.eup %5544  ;;  %v1864_v4 = vadd.f32 %v6696_v42, %v6693_v57 }
 0x5a2   : > { %v6686_v20 = vadd.f32 %v1824_v62, %v1812_v58  ;;  %v6688_v60 = vadd.f32 %v1824_v62, %v1813_v22  ;;  %1843 = vadd.xlane.f32.xlu0 %v1842_v16  ;;  %v1790_v38 = vmul.f32 %v5545_v25, %v6633_v41  ;;  %v1791_v10 = vmul.f32 %v5545_v25, %v6635_v43 }
 0x5a4   : > { %v1845_v12 = vadd.f32 %v6688_v60, %v6686_v20  ;;  %v1814_v35 = vmul.f32 %v6643_v6, %v1790_v38  ;;  %v1815_v18 = vmul.f32 %v6643_v6, %v1791_v10  ;;  %v6722_v38 = vadd.f32 %v6656_v59, %v6537_v13 }
 0x5a6   : > { %1846 = vadd.xlane.f32.xlu1 %v1845_v12  ;;  %v6702_v21 = vadd.f32 %v1828_v2, %v1814_v35  ;;  %v6704_v41 = vadd.f32 %v1828_v2, %v1815_v18 }
 0x5a8   : > { %v1848_v23 = vadd.f32 %v6704_v41, %v6702_v21 }
 0x5aa   : > { %1865 = vadd.xlane.f32.xlu1 %v1864_v4  ;;  %1849 = vadd.xlane.f32.xlu0 %v1848_v23 }
 0x5c7   : > { %v1863_v10 = vpop.xlane.xlu0 %1862 }
 0x5c8   : > { %v1871_v4 = vmul.f32 0.00390625, %v1863_v10 }
 0x5d8   : > { %v1773_v43 = vpop.xlane.xlu1 %1772 }
 0x5d9   : > { %v1777_v37 = vmul.f32 0.00390625, %v1773_v43 }
 0x5db   : > { %v1781_v28 = vadd.f32 1e-05, %v1777_v37 }
 0x5dc   : > { %v1832_v58 = vpop.permute.xlu1 %1831 }
 0x5dd   : > { %5546 = vrsqrt.f32 %v1781_v28 }
 0x5e7   : > { %v5547_v56 = vpop.eup %5546 }
 0x5e8   : > { %v1792_v6 = vmul.f32 %v5547_v56, %v6658_v3  ;;  %v1793_v40 = vmul.f32 %v5547_v56, %v6660_v52  ;;  %v6726_v3 = vadd.f32 %v6656_v59, %v6539_v24  ;;  %v6733_v52 = vld [vmem:[%s8412_s4] sm:$0xff] }
 0x5e9   : > { %4959 = vmatprep.mubr.msk.f32.mxu1 %vm961_vm8, %v6733_v52 }
 0x5ea   : > { %v1816_v32 = vmul.f32 %v6646_v26, %v1792_v6  ;;  %v1817_v62 = vmul.f32 %v6646_v26, %v1793_v40  ;;  %v1867_v26 = vadd.f32 %v6726_v3, %v6722_v38 }
 0x5ec   : > { %v6714_v22 = vadd.f32 %v1832_v58, %v1816_v32  ;;  %v6716_v16 = vadd.f32 %v1832_v58, %v1817_v62 }
 0x5ee   : > { %v1851_v25 = vadd.f32 %v6716_v16, %v6714_v22 }
 0x5f0   : > { %1852 = vadd.xlane.f32.xlu0 %v1851_v25 }
 0x5f4   : > { %1868 = vadd.xlane.f32.xlu0 %v1867_v26 }
 0x60d   : > { %v1860_v13 = vpop.xlane.xlu1 %1859 }
 0x60e   : > { %v1870_v28 = vmul.f32 0.00390625, %v1860_v13 }
 0x62f   : > { %v1844_v12 = vpop.xlane.xlu0 %1843 }
 0x630   : > { %v1854_v23 = vmul.f32 0.00390625, %v1844_v12 }
 0x632   : > { %v1875_v40 = vsel %vm1874_vm10, %v1854_v23, %v1870_v28 }
 0x633   : > { %v1847_v35 = vpop.xlane.xlu1 %1846  ;;  %v1880_v10 = vsel %vm1879_vm11, %v1875_v40, -inf }
 0x634   : > { %v1855_v59 = vmul.f32 0.00390625, %v1847_v35 }
 0x636   : > { %v1876_v56 = vsel %vm1874_vm10, %v1855_v59, %v1871_v4 }
 0x637   : > { %v1850_v18 = vpop.xlane.xlu0 %1849  ;;  %v1866_v24 = vpop.xlane.xlu1 %1865  ;;  %v1881_v25 = vsel %vm1879_vm11, %v1876_v56, -inf }
 0x638   : > { %v1856_v43 = vmul.f32 0.00390625, %v1850_v18  ;;  %v1872_v37 = vmul.f32 0.00390625, %v1866_v24  ;;  %v1884_v35 = vmax.f32 %v1880_v10, %v1881_v25 }
 0x63a   : > { %v1877_v32 = vsel %vm1874_vm10, %v1856_v43, %v1872_v37 }
 0x63b   : > { %v1882_v12 = vsel %vm1879_vm11, %v1877_v32, -inf }
 0x67d   : > { %v1853_v2 = vpop.xlane.xlu0 %1852 }
 0x67e   : > { %v1857_v62 = vmul.f32 0.00390625, %v1853_v2 }
 0x681   : > { %v1869_v6 = vpop.xlane.xlu0 %1868 }
 0x682   : > { %v1873_v58 = vmul.f32 0.00390625, %v1869_v6 }
 0x684   : > { %v1878_v26 = vsel %vm1874_vm10, %v1857_v62, %v1873_v58 }
 0x685   : > { %v1883_v13 = vsel %vm1879_vm11, %v1878_v26, -inf }
 0x686   : > { %v1885_v18 = vmax.f32 %v1882_v12, %v1883_v13 }
 0x688   : > { %v1886_v24 = vmax.f32 %v1884_v35, %v1885_v18 }
 0x68a   : > { %v1887_v59 = vrot.slane %v1886_v24, 4 }
 0x68c   : > { %v1888_v4 = vmax.f32 %v1886_v24, %v1887_v59 }
 0x68e   : > { %v1889_v23 = vrot.slane %v1888_v4, 2 }
 0x690   : > { %v1890_v28 = vmax.f32 %v1888_v4, %v1889_v23  ;;  %v8491_v23 = vmov 1  }
 0x692   : > { %v1891_v43 = vrot.slane %v1890_v28, 1 }
 0x694   : > { %v1892_v2 = vmax.f32 %v1890_v28, %v1891_v43 }
 0x696   : > { %v1896_v37 = vsub.f32 %v1878_v26, %v1892_v2  ;;  %v1893_v6 = vsub.f32 %v1875_v40, %v1892_v2  ;;  %v1894_v54 = vsub.f32 %v1876_v56, %v1892_v2  ;;  %v1895_v50 = vsub.f32 %v1877_v32, %v1892_v2  ;;  %v6748_v56 = vld [vmem:[%s8412_s4 + $0x8] sm:$0xff] }
 0x698   : > { %v1903_v62 = vmul.f32 1.442695, %v1896_v37  ;;  %v1897_v58 = vmul.f32 1.442695, %v1893_v6  ;;  %v1899_v61 = vmul.f32 1.442695, %v1894_v54 }
 0x699   : > { %v1901_v7 = vmul.f32 1.442695, %v1895_v50  ;;  %v6753_v50 = vld [vmem:[%s8412_s4 + $0x10] sm:$0xff]  ;;  %v6762_v54 = vld [vmem:[%s8412_s4 + $0x18] sm:$0xff] }
 0x69a   : > { %5548 = vpow2.f32 %v1903_v62 }
 0x69b   : > { %5550 = vpow2.f32 %v1897_v58 }
 0x69c   : > { %5552 = vpow2.f32 %v1899_v61 }
 0x69d   : > { %5554 = vpow2.f32 %v1901_v7 }
 0x6a4   : > { %v5549_v25 = vpop.eup %5548 }
 0x6a5   : > { %v5551_v10 = vpop.eup %5550 }
 0x6a6   : > { %v5553_v12 = vpop.eup %5552 }
 0x6a7   : > { %v5555_v13 = vpop.eup %5554  ;;  %v5104_v35 = vpack.c.bf16 %v5553_v12, %v5551_v10 }
 0x6a8   : > { %v5108_v18 = vpack.c.bf16 %v5549_v25, %v5555_v13 }
 0x6a9   : > { %5105 = vmatprep.subr.bf16.mxu1 %v5104_v35 }
 0x6aa   : > { %5107 = vmatpush3.bf16.msra.mxu1 %v5104_v35 }
 0x6ab   : > { %5109 = vmatprep.subr.bf16.mxu1 %v5108_v18 }
 0x6ae   : > { %5111 = vmatpush3.bf16.msra.mxu1 %v5108_v18 }
 0x6b1   : > { %4960 = vmatmul.mubr.msk.f32.vlgmr.msra.gmra.mrb[20].mxu1 %vm961_vm8, %v6748_v56 }
 0x6b2   : > { %4962 = vmatprep.mubr.msk.f32.mxu1 %vm961_vm8, %v6753_v50 }
 0x6b5   : > { %4963 = vmatmul.mubr.msk.f32.gmra.mrb[22].mxu1 %vm961_vm8, %v6762_v54 }
 0x6b6   : > { %2138 = vmatprep.mubr.f32.mxu1 %v8489_v27 }
 0x784   : > { %v4961_v7 = vpop.f32.mrb[20].mxu1 }
 0x785   : > { %5556 = vrcp.f32 %v4961_v7  ;;  %v1987_v61 = vpop.f32.mrb[21].mxu1 }
 0x786   : > { %5558 = vrcp.f32 %v1987_v61 }
 0x788   : > { %v4964_v40 = vpop.f32.mrb[22].mxu1 }
 0x789   : > { %v1997_v32 = vpop.f32.mrb[23].mxu1  ;;  %5560 = vrcp.f32 %v4964_v40 }
 0x78a   : > { %5562 = vrcp.f32 %v1997_v32 }
 0x78f   : > { %v5557_v26 = vpop.eup %5556 }
 0x790   : > { %v2009_v24 = vmul.f32 %v5557_v26, %v5553_v12  ;;  %v5559_v59 = vpop.eup %5558 }
 0x791   : > { %v2007_v4 = vmul.f32 %v5559_v59, %v5551_v10 }
 0x792   : > { %2047 = vperm.xlu1 %5514, %v2009_v24   ;;  %2021 = vperm.xlu0 %5513, %v2009_v24  }
 0x793   : > { %v5561_v28 = vpop.eup %5560 }
 0x794   : > { %v2013_v43 = vmul.f32 %v5561_v28, %v5549_v25  ;;  %v5563_v2 = vpop.eup %5562 }
 0x795   : > { %v2011_v37 = vmul.f32 %v5563_v2, %v5555_v13 }
 0x796   : > { %5515 = vset.pattern.permute.xlu1 %v8490_v39  ;;  %5519 = vset.pattern.permute.xlu0 %v8491_v23 }
 0x797   : > { %2016 = vperm.xlu1 %5515, %v2007_v4  }
 0x79b   : > { %5516 = vset.pattern.permute.xlu1 %v8491_v23 }
 0x79c   : > { %2043 = vperm.xlu1 %5516, %v2007_v4  }
 0x7a0   : > { %5517 = vset.pattern.permute.xlu1 %v8490_v39 }
 0x7a1   : > { %2031 = vperm.xlu1 %5517, %v2013_v43  }
 0x7a5   : > { %2026 = vperm.xlu1 %5517, %v2011_v37  }
 0x7a9   : > { %5518 = vset.pattern.permute.xlu1 %v8491_v23 }
 0x7aa   : > { %2051 = vperm.xlu1 %5518, %v2011_v37  }
 0x7ae   : > { %2055 = vperm.xlu1 %5518, %v2013_v43  }
 0x811   : > { %v2048_v6 = vpop.permute.xlu1 %2047  ;;  %v2022_v58 = vpop.permute.xlu0 %2021 }
 0x812   : > { %v2060_v10 = vmul.f32 %v2048_v6, %v6686_v20  ;;  %v2061_v12 = vmul.f32 %v2048_v6, %v6688_v60  ;;  %v2036_v35 = vmul.f32 %v2022_v58, %v6649_v51  ;;  %v2037_v25 = vmul.f32 %v2022_v58, %v6652_v36 }
 0x814   : > { %v2068_v32 = vadd.f32 %v2060_v10, %v2036_v35  ;;  %v2069_v26 = vadd.f32 %v2061_v12, %v2037_v25 }
 0x816   : > { %v2017_v62 = vpop.permute.xlu1 %2016 }
 0x817   : > { %v2034_v7 = vmul.f32 %v2017_v62, %v6669_v29  ;;  %v2035_v13 = vmul.f32 %v2017_v62, %v6672_v15 }
 0x81b   : > { %v2044_v18 = vpop.permute.xlu1 %2043 }
 0x81c   : > { %v2058_v61 = vmul.f32 %v2044_v18, %v6680_v1  ;;  %v2059_v40 = vmul.f32 %v2044_v18, %v6682_v63 }
 0x81e   : > { %v2066_v24 = vadd.f32 %v2058_v61, %v2034_v7  ;;  %v2067_v59 = vadd.f32 %v2059_v40, %v2035_v13 }
 0x820   : > { %v2032_v20 = vpop.permute.xlu1 %2031  ;;  %v5112_v4 = vpack.c.bf16 %v2069_v26, %v2067_v59  ;;  %v5114_v60 = vpack.c.bf16 %v2068_v32, %v2066_v24 }
 0x821   : > { %v2040_v15 = vmul.f32 %v2032_v20, %v6722_v38  ;;  %v2041_v1 = vmul.f32 %v2032_v20, %v6726_v3 }
 0x822   : > { %5113 = vmatprep.subr.bf16.mxu1 %v5112_v4 }
 0x823   : > { %5115 = vmatpush1.bf16.msra.mxu1 %v5114_v60 }
 0x824   : > { %v2027_v51 = vpop.permute.xlu1 %2026 }
 0x825   : > { %v2038_v28 = vmul.f32 %v2027_v51, %v6693_v57  ;;  %v2039_v43 = vmul.f32 %v2027_v51, %v6696_v42 }
 0x829   : > { %v2052_v36 = vpop.permute.xlu1 %2051 }
 0x82a   : > { %v2062_v23 = vmul.f32 %v2052_v36, %v6702_v21  ;;  %v2063_v29 = vmul.f32 %v2052_v36, %v6704_v41 }
 0x82c   : > { %v2070_v6 = vadd.f32 %v2062_v23, %v2038_v28  ;;  %v2071_v62 = vadd.f32 %v2063_v29, %v2039_v43 }
 0x82d   : > { %v2056_v63 = vpop.permute.xlu1 %2055 }
 0x82e   : > { %v2064_v2 = vmul.f32 %v2056_v63, %v6714_v22  ;;  %v2065_v37 = vmul.f32 %v2056_v63, %v6716_v16 }
 0x830   : > { %v2072_v58 = vadd.f32 %v2064_v2, %v2040_v15  ;;  %v2073_v10 = vadd.f32 %v2065_v37, %v2041_v1 }
 0x832   : > { %v5116_v21 = vpack.c.bf16 %v2073_v10, %v2071_v62  ;;  %v5118_v12 = vpack.c.bf16 %v2072_v58, %v2070_v6 }
 0x834   : > { %5117 = vmatprep.subr.bf16.mxu1 %v5116_v21 }
 0x835   : > { %5119 = vmatpush1.bf16.msra.mxu1 %v5118_v12  ;;  %v5621_v12 = vld [vmem:[%s6455_s29 + $0x28] sm:$0xff] }
 0x838   : > { %4817 = vmatmul.mubr.msk.f32.vlgmr.msra.gmra.mrb[24].mxu1 %vm961_vm8, %v6733_v52 }
 0x839   : > { %2144 = vmatprep.mubr.f32.mxu1 %v8489_v27 }
 0x83c   : > { %4818 = vmatmul.mubr.msk.f32.gmra.mrb[26].mxu1 %vm961_vm8, %v6748_v56 }
 0x83d   : > { %2150 = vmatprep.mubr.f32.mxu1 %v8489_v27 }
 0x840   : > { %4819 = vmatmul.mubr.msk.f32.gmra.mrb[28].mxu1 %vm961_vm8, %v6753_v50 }
 0x841   : > { %2156 = vmatprep.mubr.f32.mxu1 %v8489_v27 }
 0x844   : > { %4820 = vmatmul.mubr.msk.f32.gmra.mrb[30].mxu1 %vm961_vm8, %v6762_v54 }
 0x90b   : > { %v2140_v57 = vpop.f32.mrb[24].mxu1 }
 0x90c   : > { %v4821_v42 = vmul.f32 -1.442695, %v2140_v57  ;;  %v2142_v41 = vpop.f32.mrb[25].mxu1 }
 0x90d   : > { %v4822_v25 = vmul.f32 -1.442695, %v2142_v41  ;;  %v5622_v41 = vld [vmem:[%s6455_s29 + $0x38] sm:$0xff] }
 0x90e   : > { %5564 = vpow2.f32 %v4821_v42 }
 0x90f   : > { %v2146_v22 = vpop.f32.mrb[26].mxu1 }
 0x910   : > { %v4823_v16 = vmul.f32 -1.442695, %v2146_v22  ;;  %v2148_v38 = vpop.f32.mrb[27].mxu1 }
 0x911   : > { %v4824_v13 = vmul.f32 -1.442695, %v2148_v38 }
 0x912   : > { %5566 = vpow2.f32 %v4823_v16  ;;  %v2476_v16 = vld [vmem:[%s8419_s11 + $0x8] sm:$0xff] }
 0x913   : > { %v2152_v3 = vpop.f32.mrb[28].mxu1  ;;  %2563 = vmatprep.mubr.f32.mxu0 %v2476_v16 }
 0x914   : > { %v2154_v52 = vpop.f32.mrb[29].mxu1  ;;  %v4825_v26 = vmul.f32 -1.442695, %v2152_v3 }
 0x915   : > { %v4826_v23 = vmul.f32 -1.442695, %v2154_v52 }
 0x917   : > { %v2158_v56 = vpop.f32.mrb[30].mxu1 }
 0x918   : > { %v5565_v35 = vpop.eup %5564  ;;  %v2160_v18 = vpop.f32.mrb[31].mxu1  ;;  %v4827_v60 = vmul.f32 -1.442695, %v2158_v56 }
 0x919   : > { %v2187_v50 = vadd.f32 1.0, %v5565_v35  ;;  %v4828_v63 = vmul.f32 -1.442695, %v2160_v18 }
 0x91b   : > { %5568 = vrcp.f32 %v2187_v50 }
 0x91c   : > { %v5567_v7 = vpop.eup %5566  ;;  %5570 = vpow2.f32 %v4822_v25  ;;  %v6959_v25 = vld [vmem:[%s8421_s13] sm:$0xff] }
 0x91d   : > { %v2189_v54 = vadd.f32 1.0, %v5567_v7  ;;  %v6971_v7 = vld [vmem:[%s8421_s13 + $0x10] sm:$0xff] }
 0x91e   : > { %8498 = vst [vmem:[#allocation14_spill] sm:$0xff] %v6971_v7 }
 0x91f   : > { %5572 = vrcp.f32 %v2189_v54 }
 0x920   : > { %5574 = vpow2.f32 %v4824_v13 }
 0x921   : > { %5576 = vpow2.f32 %v4825_v26 }
 0x925   : > { %v5569_v61 = vpop.eup %5568 }
 0x926   : > { %v5571_v40 = vpop.eup %5570  ;;  %v6800_v32 = vmul.f32 %v5569_v61, %v6468_v45  ;;  %v6981_v61 = vld [vmem:[%s8421_s13 + $0x18] sm:$0xff] }
 0x927   : > { %v2188_v59 = vadd.f32 1.0, %v5571_v40  ;;  %8499 = vst [vmem:[#allocation15_spill] sm:$0xff] %v6981_v61 }
 0x928   : > { %2219 = vrot.lane.b32.xlu1 %v6800_v32, %s8471_s30 }
 0x929   : > { %v5573_v24 = vpop.eup %5572  ;;  %5578 = vrcp.f32 %v2188_v59 }
 0x92a   : > { %v5575_v20 = vpop.eup %5574  ;;  %v6805_v4 = vmul.f32 %v5573_v24, %v6476_v47  ;;  %5580 = vpow2.f32 %v4827_v60 }
 0x92b   : > { %v2190_v45 = vadd.f32 1.0, %v5575_v20  ;;  %v5577_v47 = vpop.eup %5576 }
 0x92c   : > { %2251 = vrot.lane.b32.xlu1 %v6800_v32, %s8492_s23  ;;  %2221 = vrot.lane.b32.xlu0 %v6805_v4, %s8471_s30  ;;  %v2191_v36 = vadd.f32 1.0, %v5577_v47 }
 0x92d   : > { %5582 = vrcp.f32 %v2190_v45 }
 0x92e   : > { %5584 = vrcp.f32 %v2191_v36 }
 0x92f   : > { %5586 = vpow2.f32 %v4826_v23 }
 0x930   : > { %2283 = vrot.lane.b32.xlu1 %v6800_v32, %s8493_s25  ;;  %2253 = vrot.lane.b32.xlu0 %v6805_v4, %s8492_s23  ;;  %5588 = vpow2.f32 %v4828_v63 }
 0x933   : > { %v5579_v51 = vpop.eup %5578 }
 0x934   : > { %2315 = vrot.lane.b32.xlu1 %v6800_v32, %s8494_s28  ;;  %2285 = vrot.lane.b32.xlu0 %v6805_v4, %s8493_s25  ;;  %v5581_v29 = vpop.eup %5580  ;;  %v6824_v15 = vmul.f32 %v5579_v51, %v6463_v44 }
 0x935   : > { %v2193_v28 = vadd.f32 1.0, %v5581_v29 }
 0x937   : > { %v5583_v1 = vpop.eup %5582  ;;  %5590 = vrcp.f32 %v2193_v28 }
 0x938   : > { %2347 = vrot.lane.b32.xlu1 %v6800_v32, %s8495_s20  ;;  %2317 = vrot.lane.b32.xlu0 %v6805_v4, %s8494_s28  ;;  %v6831_v43 = vmul.f32 %v5583_v1, %v6471_v46  ;;  %v5585_v44 = vpop.eup %5584  ;;  %v8500_v1 = vmov 2  }
 0x939   : > { %v5587_v2 = vpop.eup %5586  ;;  %v6842_v46 = vmul.f32 %v5585_v44, %v6484_v55  ;;  %v5620_v55 = vld [vmem:[%s6455_s29 + $0x30] sm:$0xff]  ;;  %s8496_s29 = smov 113  }
 0x93a   : > { %v2192_v37 = vadd.f32 1.0, %v5587_v2  ;;  %v5589_v6 = vpop.eup %5588 }
 0x93b   : > { %v2194_v58 = vadd.f32 1.0, %v5589_v6 }
 0x93c   : > { %2227 = vrot.lane.b32.xlu1 %v6824_v15, %s8471_s30  ;;  %2349 = vrot.lane.b32.xlu0 %v6805_v4, %s8495_s20  ;;  %5592 = vrcp.f32 %v2192_v37  ;;  %v7002_v37 = vld [vmem:[%s8421_s13 + $0x8] sm:$0xff] }
 0x93d   : > { %5594 = vrcp.f32 %v2194_v58 }
 0x940   : > { %2259 = vrot.lane.b32.xlu1 %v6824_v15, %s8492_s23  ;;  %2229 = vrot.lane.b32.xlu0 %v6831_v43, %s8471_s30 }
 0x941   : > { %v5591_v62 = vpop.eup %5590 }
 0x942   : > { %v6853_v10 = vmul.f32 %v5620_v55, %v5591_v62 }
 0x944   : > { %2291 = vrot.lane.b32.xlu1 %v6824_v15, %s8493_s25  ;;  %2261 = vrot.lane.b32.xlu0 %v6831_v43, %s8492_s23 }
 0x946   : > { %v5593_v21 = vpop.eup %5592 }
 0x947   : > { %v6868_v57 = vmul.f32 %v5621_v12, %v5593_v21  ;;  %v5595_v42 = vpop.eup %5594 }
 0x948   : > { %2323 = vrot.lane.b32.xlu1 %v6824_v15, %s8494_s28  ;;  %2293 = vrot.lane.b32.xlu0 %v6831_v43, %s8493_s25  ;;  %v6875_v22 = vmul.f32 %v5622_v41, %v5595_v42 }
 0x94c   : > { %2325 = vrot.lane.b32.xlu0 %v6831_v43, %s8494_s28  ;;  %2223 = vrot.lane.b32.xlu1 %v6842_v46, %s8471_s30 }
 0x950   : > { %2255 = vrot.lane.b32.xlu1 %v6842_v46, %s8492_s23  ;;  %2225 = vrot.lane.b32.xlu0 %v6853_v10, %s8471_s30 }
 0x954   : > { %2287 = vrot.lane.b32.xlu1 %v6842_v46, %s8493_s25  ;;  %2257 = vrot.lane.b32.xlu0 %v6853_v10, %s8492_s23 }
 0x958   : > { %2319 = vrot.lane.b32.xlu1 %v6842_v46, %s8494_s28  ;;  %2289 = vrot.lane.b32.xlu0 %v6853_v10, %s8493_s25 }
 0x95c   : > { %2231 = vrot.lane.b32.xlu1 %v6868_v57, %s8471_s30  ;;  %2321 = vrot.lane.b32.xlu0 %v6853_v10, %s8494_s28 }
 0x960   : > { %2355 = vrot.lane.b32.xlu1 %v6824_v15, %s8495_s20  ;;  %2233 = vrot.lane.b32.xlu0 %v6875_v22, %s8471_s30 }
 0x964   : > { %2263 = vrot.lane.b32.xlu1 %v6868_v57, %s8492_s23  ;;  %2357 = vrot.lane.b32.xlu0 %v6831_v43, %s8495_s20 }
 0x968   : > { %2295 = vrot.lane.b32.xlu1 %v6868_v57, %s8493_s25  ;;  %2265 = vrot.lane.b32.xlu0 %v6875_v22, %s8492_s23 }
 0x96c   : > { %2327 = vrot.lane.b32.xlu1 %v6868_v57, %s8494_s28  ;;  %2353 = vrot.lane.b32.xlu0 %v6853_v10, %s8495_s20 }
 0x970   : > { %2351 = vrot.lane.b32.xlu1 %v6842_v46, %s8495_s20  ;;  %2297 = vrot.lane.b32.xlu0 %v6875_v22, %s8493_s25 }
 0x974   : > { %2359 = vrot.lane.b32.xlu1 %v6868_v57, %s8495_s20  ;;  %2381 = vrot.lane.b32.xlu0 %v6805_v4, %s8496_s29 }
 0x978   : > { %2379 = vrot.lane.b32.xlu1 %v6800_v32, %s8496_s29  ;;  %2329 = vrot.lane.b32.xlu0 %v6875_v22, %s8494_s28 }
 0x97c   : > { %2387 = vrot.lane.b32.xlu1 %v6824_v15, %s8496_s29  ;;  %2389 = vrot.lane.b32.xlu0 %v6831_v43, %s8496_s29 }
 0x980   : > { %2383 = vrot.lane.b32.xlu1 %v6842_v46, %s8496_s29  ;;  %2385 = vrot.lane.b32.xlu0 %v6853_v10, %s8496_s29 }
 0x984   : > { %2391 = vrot.lane.b32.xlu1 %v6868_v57, %s8496_s29  ;;  %2413 = vrot.lane.b32.xlu0 %v6805_v4, %s8469_s22 }
 0x988   : > { %2411 = vrot.lane.b32.xlu1 %v6800_v32, %s8469_s22  ;;  %2361 = vrot.lane.b32.xlu0 %v6875_v22, %s8495_s20 }
 0x98c   : > { %2419 = vrot.lane.b32.xlu1 %v6824_v15, %s8469_s22  ;;  %2421 = vrot.lane.b32.xlu0 %v6831_v43, %s8469_s22 }
 0x990   : > { %2415 = vrot.lane.b32.xlu1 %v6842_v46, %s8469_s22  ;;  %2393 = vrot.lane.b32.xlu0 %v6875_v22, %s8496_s29 }
 0x994   : > { %2423 = vrot.lane.b32.xlu1 %v6868_v57, %s8469_s22  ;;  %2417 = vrot.lane.b32.xlu0 %v6853_v10, %s8469_s22 }
 0x998   : > { %2443 = vrot.lane.b32.xlu1 %v6800_v32, %s8497_s19  ;;  %2425 = vrot.lane.b32.xlu0 %v6875_v22, %s8469_s22  ;;  %s5657_s22 = smov 51  }
 0x99a   : > { %v2220_v38 = vpop.permute.xlu1 %2219 }
 0x99c   : > { %2451 = vrot.lane.b32.xlu1 %v6824_v15, %s8497_s19  ;;  %2445 = vrot.lane.b32.xlu0 %v6805_v4, %s8497_s19 }
 0x99e   : > { %v6944_v3 = vpop.permute.xlu1 %2251  ;;  %v2222_v52 = vpop.permute.xlu0 %2221 }
 0x9a0   : > { %2447 = vrot.lane.b32.xlu1 %v6842_v46, %s8497_s19  ;;  %2453 = vrot.lane.b32.xlu0 %v6831_v43, %s8497_s19 }
 0x9a2   : > { %v6950_v56 = vpop.permute.xlu1 %2283  ;;  %v2254_v35 = vpop.permute.xlu0 %2253 }
 0x9a4   : > { %2455 = vrot.lane.b32.xlu1 %v6868_v57, %s8497_s19  ;;  %2449 = vrot.lane.b32.xlu0 %v6853_v10, %s8497_s19 }
 0x9a6   : > { %v6961_v18 = vpop.permute.xlu1 %2315  ;;  %v6963_v50 = vpop.permute.xlu0 %2285 }
 0x9a8   : > { %2679 = vperm.xlu1 %5518, %v6959_v25   ;;  %2457 = vrot.lane.b32.xlu0 %v6875_v22, %s8497_s19 }
 0x9aa   : > { %v6973_v13 = vpop.permute.xlu1 %2347  ;;  %v6975_v54 = vpop.permute.xlu0 %2317 }
 0x9ac   : > { %2689 = vperm.xlu1 %5518, %v6971_v7   ;;  %2684 = vperm.xlu0 %5519, %v7002_v37  }
 0x9ae   : > { %v2228_v40 = vpop.permute.xlu1 %2227  ;;  %v6983_v26 = vpop.permute.xlu0 %2349 }
 0x9af   : > { %v2235_v24 = vsel %vm625_vm0, %v2220_v38, %v2228_v40  ;;  %v2239_v59 = vsel %vm625_vm0, %v2228_v40, %v2220_v38 }
 0x9b0   : > { %2694 = vperm.xlu1 %5518, %v6981_v61   ;;  %v2243_v51 = vmul.f32 %v2239_v59, %v5967_v19  ;;  %v2244_v36 = vmul.f32 %v2235_v24, %v5957_v17  ;;  %5520 = vset.pattern.permute.xlu0 %v8500_v1 }
 0x9b2   : > { %v2260_v20 = vpop.permute.xlu1 %2259  ;;  %v2230_v60 = vpop.permute.xlu0 %2229 }
 0x9b3   : > { %v2236_v45 = vsel %vm625_vm0, %v2222_v52, %v2230_v60  ;;  %v2240_v47 = vsel %vm625_vm0, %v2230_v60, %v2222_v52 }
 0x9b4   : > { %v2245_v23 = vmul.f32 %v2240_v47, %v5967_v19  ;;  %v2246_v29 = vmul.f32 %v2236_v45, %v5957_v17  ;;  %5521 = vset.pattern.permute.xlu1 %v8500_v1  ;;  %v2267_v45 = vsel %vm666_vm1, %v6944_v3, %v2260_v20 }
 0x9b6   : > { %v5122_v63 = vpack.c.bf16 %v2245_v23, %v2243_v51  ;;  %v2292_v28 = vpop.permute.xlu1 %2291  ;;  %v2262_v44 = vpop.permute.xlu0 %2261  ;;  %v5120_v2 = vpack.c.bf16 %v2246_v29, %v2244_v36 }
 0x9b7   : > { %v2268_v24 = vsel %vm666_vm1, %v2254_v35, %v2262_v44  ;;  %v2272_v36 = vsel %vm666_vm1, %v2262_v44, %v2254_v35  ;;  %v2271_v35 = vsel %vm666_vm1, %v2260_v20, %v6944_v3  ;;  %v2276_v44 = vmul.f32 %v2267_v45, %v6009_v49 }
 0x9b8   : > { %5121 = vmatprep.subr.bf16.mxu0 %v5120_v2  ;;  %v2278_v23 = vmul.f32 %v2268_v24, %v6009_v49  ;;  %v2277_v24 = vmul.f32 %v2272_v36, %v6005_v48  ;;  %v2299_v45 = vsel %vm707_vm2, %v6950_v56, %v2292_v28 }
 0x9b9   : > { %5123 = vmatpush1.bf16.msra.mxu0 %v5122_v63 }
 0x9ba   : > { %v7004_v6 = vpop.permute.xlu1 %2323  ;;  %v2294_v62 = vpop.permute.xlu0 %2293 }
 0x9be   : > { %v7007_v58 = vpop.permute.xlu0 %2325  ;;  %v2224_v55 = vpop.permute.xlu1 %2223 }
 0x9c2   : > { %v2256_v21 = vpop.permute.xlu1 %2255  ;;  %v2226_v12 = vpop.permute.xlu0 %2225 }
 0x9c6   : > { %v2288_v42 = vpop.permute.xlu1 %2287  ;;  %v2258_v41 = vpop.permute.xlu0 %2257 }
 0x9ca   : > { %v7010_v16 = vpop.permute.xlu1 %2319  ;;  %v7012_v38 = vpop.permute.xlu0 %2289 }
 0x9ce   : > { %v2232_v52 = vpop.permute.xlu1 %2231  ;;  %v7014_v40 = vpop.permute.xlu0 %2321 }
 0x9cf   : > { %v2237_v59 = vsel %vm625_vm0, %v2224_v55, %v2232_v52  ;;  %v2241_v60 = vsel %vm625_vm0, %v2232_v52, %v2224_v55 }
 0x9d0   : > { %v2247_v63 = vmul.f32 %v2241_v60, %v5967_v19  ;;  %v2248_v2 = vmul.f32 %v2237_v59, %v5957_v17  ;;  %v2275_v60 = vmul.f32 %v2271_v35, %v6005_v48  ;;  %v2300_v59 = vsel %vm707_vm2, %v6963_v50, %v2294_v62 }
 0x9d2   : > { %v7025_v47 = vpop.permute.xlu1 %2355  ;;  %v2234_v51 = vpop.permute.xlu0 %2233  ;;  %v5130_v36 = vpack.c.bf16 %v2277_v24, %v2275_v60 }
 0x9d3   : > { %v2238_v29 = vsel %vm625_vm0, %v2226_v12, %v2234_v51  ;;  %v2242_v1 = vsel %vm625_vm0, %v2234_v51, %v2226_v12  ;;  %v5128_v51 = vpack.c.bf16 %v2278_v23, %v2276_v44  ;;  %v2310_v23 = vmul.f32 %v2300_v59, %v6045_v31 }
 0x9d4   : > { %v2249_v55 = vmul.f32 %v2242_v1, %v5967_v19  ;;  %v2250_v52 = vmul.f32 %v2238_v29, %v5957_v17  ;;  %v2332_v59 = vsel %vm748_vm3, %v6975_v54, %v7007_v58 }
 0x9d6   : > { %v5126_v39 = vpack.c.bf16 %v2249_v55, %v2247_v63  ;;  %v2264_v7 = vpop.permute.xlu1 %2263  ;;  %v7043_v61 = vpop.permute.xlu0 %2357  ;;  %v5124_v12 = vpack.c.bf16 %v2250_v52, %v2248_v2  ;;  %v2304_v63 = vsel %vm707_vm2, %v2294_v62, %v6963_v50  ;;  %v2303_v50 = vsel %vm707_vm2, %v2292_v28, %v6950_v56 }
 0x9d7   : > { %v2269_v3 = vsel %vm666_vm1, %v2256_v21, %v2264_v7  ;;  %v2273_v20 = vsel %vm666_vm1, %v2264_v7, %v2256_v21  ;;  %v2308_v62 = vmul.f32 %v2299_v45, %v6045_v31  ;;  %v2309_v35 = vmul.f32 %v2304_v63, %v6041_v30 }
 0x9d8   : > { %5125 = vmatprep.subr.bf16.mxu0 %v5124_v12  ;;  %v2279_v7 = vmul.f32 %v2273_v20, %v6005_v48  ;;  %v2280_v21 = vmul.f32 %v2269_v3, %v6009_v49  ;;  %v2307_v60 = vmul.f32 %v2303_v50, %v6041_v30  ;;  %v2331_v3 = vsel %vm748_vm3, %v6961_v18, %v7004_v6 }
 0x9d9   : > { %5127 = vmatpush1.bf16.msra.mxu0 %v5126_v39  ;;  %v2342_v63 = vmul.f32 %v2332_v59, %v6081_v9 }
 0x9da   : > { %v2296_v29 = vpop.permute.xlu1 %2295  ;;  %5129 = vmatprep.subr.bf16.mxu0 %v5128_v51  ;;  %v2266_v1 = vpop.permute.xlu0 %2265  ;;  %v5136_v51 = vpack.c.bf16 %v2310_v23, %v2308_v62  ;;  %v5138_v20 = vpack.c.bf16 %v2309_v35, %v2307_v60 }
 0x9db   : > { %v2270_v2 = vsel %vm666_vm1, %v2258_v41, %v2266_v1  ;;  %v2274_v39 = vsel %vm666_vm1, %v2266_v1, %v2258_v41  ;;  %v2301_v56 = vsel %vm707_vm2, %v2288_v42, %v2296_v29  ;;  %v2305_v28 = vsel %vm707_vm2, %v2296_v29, %v2288_v42 }
 0x9dc   : > { %v2281_v55 = vmul.f32 %v2274_v39, %v6005_v48  ;;  %v2282_v52 = vmul.f32 %v2270_v2, %v6009_v49  ;;  %v2336_v1 = vsel %vm748_vm3, %v7007_v58, %v6975_v54  ;;  %v2311_v23 = vmul.f32 %v2305_v28, %v6041_v30 }
 0x9dd   : > { %5131 = vmatpush1.bf16.msra.mxu0 %v5130_v36  ;;  %v2312_v2 = vmul.f32 %v2301_v56, %v6045_v31  ;;  %v2335_v54 = vsel %vm748_vm3, %v7004_v6, %v6961_v18  ;;  %v2340_v58 = vmul.f32 %v2331_v3, %v6081_v9  ;;  %v2341_v50 = vmul.f32 %v2336_v1, %v6077_v8 }
 0x9de   : > { %v5134_v44 = vpack.c.bf16 %v2281_v55, %v2279_v7  ;;  %v2328_v24 = vpop.permute.xlu1 %2327  ;;  %v7073_v41 = vpop.permute.xlu0 %2353  ;;  %v5132_v12 = vpack.c.bf16 %v2282_v52, %v2280_v21  ;;  %v2339_v35 = vmul.f32 %v2335_v54, %v6077_v8 }
 0x9df   : > { %v5144_v62 = vpack.c.bf16 %v2342_v63, %v2340_v58  ;;  %v2337_v18 = vsel %vm748_vm3, %v2328_v24, %v7010_v16  ;;  %v7128_v63 = vpack.c.bf16 %v6831_v43, %v6824_v15  ;;  %v2364_v15 = vsel %vm789_vm4, %v6983_v26, %v7043_v61 }
 0x9e0   : > { %5133 = vmatprep.subr.bf16.mxu0 %v5132_v12  ;;  %v5146_v60 = vpack.c.bf16 %v2341_v50, %v2339_v35  ;;  %v2343_v56 = vmul.f32 %v2337_v18, %v6077_v8  ;;  %v7145_v43 = vpack.c.bf16 %v6805_v4, %v6800_v32 }
 0x9e1   : > { %5135 = vmatpush1.bf16.msra.mxu0 %v5134_v44  ;;  %v2333_v44 = vsel %vm748_vm3, %v7010_v16, %v2328_v24 }
 0x9e2   : > { %v2352_v45 = vpop.permute.xlu1 %2351  ;;  %5137 = vmatprep.subr.bf16.mxu0 %v5136_v51  ;;  %v2298_v36 = vpop.permute.xlu0 %2297  ;;  %v2344_v28 = vmul.f32 %v2333_v44, %v6081_v9 }
 0x9e3   : > { %v2302_v42 = vsel %vm707_vm2, %v7012_v38, %v2298_v36  ;;  %v2306_v29 = vsel %vm707_vm2, %v2298_v36, %v7012_v38 }
 0x9e4   : > { %v2313_v39 = vmul.f32 %v2306_v29, %v6041_v30  ;;  %v2314_v7 = vmul.f32 %v2302_v42, %v6045_v31 }
 0x9e5   : > { %5139 = vmatpush1.bf16.msra.mxu0 %v5138_v20 }
 0x9e6   : > { %v5142_v21 = vpack.c.bf16 %v2313_v39, %v2311_v23  ;;  %v2360_v55 = vpop.permute.xlu1 %2359  ;;  %v2382_v52 = vpop.permute.xlu0 %2381  ;;  %v5140_v38 = vpack.c.bf16 %v2314_v7, %v2312_v2  ;;  %v2367_v23 = vsel %vm789_vm4, %v7025_v47, %v6973_v13  ;;  %v7150_v39 = vpack.c.bf16 %v6875_v22, %v6868_v57 }
 0x9e7   : > { %v2363_v7 = vsel %vm789_vm4, %v6973_v13, %v7025_v47  ;;  %v2372_v54 = vmul.f32 %v2367_v23, %v6124_v53  ;;  %v2365_v4 = vsel %vm789_vm4, %v2352_v45, %v2360_v55  ;;  %v2369_v57 = vsel %vm789_vm4, %v2360_v55, %v2352_v45 }
 0x9e8   : > { %5141 = vmatprep.subr.bf16.mxu0 %v5140_v38  ;;  %v7166_v22 = vpack.c.bf16 %v6853_v10, %v6842_v46  ;;  %v2371_v13 = vmul.f32 %v2363_v7, %v6132_v0  ;;  %v2375_v50 = vmul.f32 %v2365_v4, %v6132_v0  ;;  %v2376_v45 = vmul.f32 %v2369_v57, %v6124_v53 }
 0x9e9   : > { %5143 = vmatpush1.bf16.msra.mxu0 %v5142_v21 }
 0x9ea   : > { %v2380_v6 = vpop.permute.xlu1 %2379  ;;  %5145 = vmatprep.subr.bf16.mxu0 %v5144_v62  ;;  %v2330_v12 = vpop.permute.xlu0 %2329 }
 0x9eb   : > { %v2334_v59 = vsel %vm748_vm3, %v7014_v40, %v2330_v12  ;;  %v2338_v51 = vsel %vm748_vm3, %v2330_v12, %v7014_v40  ;;  %v2368_v40 = vsel %vm789_vm4, %v7043_v61, %v6983_v26  ;;  %v2373_v61 = vmul.f32 %v2364_v15, %v6132_v0 }
 0x9ec   : > { %v2345_v3 = vmul.f32 %v2338_v51, %v6077_v8  ;;  %v2346_v16 = vmul.f32 %v2334_v59, %v6081_v9  ;;  %v2374_v2 = vmul.f32 %v2368_v40, %v6124_v53 }
 0x9ed   : > { %5147 = vmatpush1.bf16.msra.mxu0 %v5146_v60  ;;  %v5162_v38 = vpack.c.bf16 %v2373_v61, %v2371_v13 }
 0x9ee   : > { %v5150_v24 = vpack.c.bf16 %v2345_v3, %v2343_v56  ;;  %v2388_v20 = vpop.permute.xlu1 %2387  ;;  %v2390_v36 = vpop.permute.xlu0 %2389  ;;  %v5148_v1 = vpack.c.bf16 %v2346_v16, %v2344_v28  ;;  %v5160_v47 = vpack.c.bf16 %v2374_v2, %v2372_v54 }
 0x9ef   : > { %v2399_v58 = vsel %vm830_vm5, %v2388_v20, %v2380_v6  ;;  %v2400_v21 = vsel %vm830_vm5, %v2390_v36, %v2382_v52  ;;  %v2395_v46 = vsel %vm830_vm5, %v2380_v6, %v2388_v20  ;;  %v2396_v10 = vsel %vm830_vm5, %v2382_v52, %v2390_v36 }
 0x9f0   : > { %5149 = vmatprep.subr.bf16.mxu0 %v5148_v1  ;;  %v2404_v18 = vmul.f32 %v2399_v58, %v6180_v34  ;;  %v2406_v12 = vmul.f32 %v2400_v21, %v6180_v34  ;;  %v2403_v6 = vmul.f32 %v2395_v46, %v6176_v33  ;;  %v2405_v52 = vmul.f32 %v2396_v10, %v6176_v33 }
 0x9f1   : > { %5151 = vmatpush1.bf16.msra.mxu0 %v5150_v24 }
 0x9f2   : > { %v2384_v42 = vpop.permute.xlu1 %2383  ;;  %5153 = vmatprep.subr.bf16.mxu0 %v7128_v63  ;;  %v2386_v29 = vpop.permute.xlu0 %2385  ;;  %v5168_v24 = vpack.c.bf16 %v2406_v12, %v2404_v18  ;;  %v5170_v1 = vpack.c.bf16 %v2405_v52, %v2403_v6 }
 0x9f5   : > { %5155 = vmatpush1.bf16.msra.mxu0 %v7145_v43 }
 0x9f6   : > { %v2392_v26 = vpop.permute.xlu1 %2391  ;;  %v2414_v32 = vpop.permute.xlu0 %2413  ;;  %5157 = vmatprep.subr.bf16.mxu0 %v7150_v39 }
 0x9f7   : > { %v2401_v16 = vsel %vm830_vm5, %v2392_v26, %v2384_v42 }
 0x9f8   : > { %v2408_v23 = vmul.f32 %v2401_v16, %v6180_v34 }
 0x9f9   : > { %5159 = vmatpush1.bf16.msra.mxu0 %v7166_v22 }
 0x9fa   : > { %v2412_v55 = vpop.permute.xlu1 %2411  ;;  %v2362_v62 = vpop.permute.xlu0 %2361  ;;  %5161 = vmatprep.subr.bf16.mxu0 %v5160_v47 }
 0x9fb   : > { %v2366_v35 = vsel %vm789_vm4, %v7073_v41, %v2362_v62  ;;  %v2370_v44 = vsel %vm789_vm4, %v2362_v62, %v7073_v41  ;;  %v2397_v41 = vsel %vm830_vm5, %v2384_v42, %v2392_v26 }
 0x9fc   : > { %v2377_v60 = vmul.f32 %v2366_v35, %v6132_v0  ;;  %v2378_v59 = vmul.f32 %v2370_v44, %v6124_v53  ;;  %v2407_v40 = vmul.f32 %v2397_v41, %v6176_v33  ;;  %v2475_v41 = vld [vmem:[%s8419_s11] sm:$0xff] }
 0x9fd   : > { %5163 = vmatpush1.bf16.msra.mxu0 %v5162_v38 }
 0x9fe   : > { %v5166_v51 = vpack.c.bf16 %v2377_v60, %v2375_v50  ;;  %v2420_v56 = vpop.permute.xlu1 %2419  ;;  %v2422_v28 = vpop.permute.xlu0 %2421  ;;  %v5164_v3 = vpack.c.bf16 %v2378_v59, %v2376_v45 }
 0x9ff   : > { %v2431_v20 = vsel %vm871_vm6, %v2420_v56, %v2412_v55  ;;  %v2432_v36 = vsel %vm871_vm6, %v2422_v28, %v2414_v32  ;;  %v2427_v42 = vsel %vm871_vm6, %v2412_v55, %v2420_v56  ;;  %v2428_v7 = vsel %vm871_vm6, %v2414_v32, %v2422_v28 }
 0xa00   : > { %5165 = vmatprep.subr.bf16.mxu0 %v5164_v3  ;;  %v2436_v26 = vmul.f32 %v2431_v20, %v6213_v14  ;;  %v2438_v4 = vmul.f32 %v2432_v36, %v6213_v14  ;;  %v2435_v32 = vmul.f32 %v2427_v42, %v6209_v5  ;;  %v2437_v50 = vmul.f32 %v2428_v7, %v6209_v5  ;;  %v2479_v20 = vld [vmem:[%s8419_s11 + $0x20] sm:$0xff] }
 0xa01   : > { %5167 = vmatpush1.bf16.msra.mxu0 %v5166_v51 }
 0xa02   : > { %v2416_v15 = vpop.permute.xlu1 %2415  ;;  %v2394_v2 = vpop.permute.xlu0 %2393  ;;  %5169 = vmatprep.subr.bf16.mxu0 %v5168_v24  ;;  %v5176_v45 = vpack.c.bf16 %v2438_v4, %v2436_v26  ;;  %v5178_v10 = vpack.c.bf16 %v2437_v50, %v2435_v32  ;;  %v2485_v32 = vld [vmem:[%s8419_s11 + $0x50] sm:$0xff] }
 0xa03   : > { %v2398_v54 = vsel %vm830_vm5, %v2386_v29, %v2394_v2  ;;  %v2402_v61 = vsel %vm830_vm5, %v2394_v2, %v2386_v29 }
 0xa04   : > { %v2409_v57 = vmul.f32 %v2398_v54, %v6176_v33  ;;  %v2410_v13 = vmul.f32 %v2402_v61, %v6180_v34  ;;  %v2478_v54 = vld [vmem:[%s8419_s11 + $0x18] sm:$0xff] }
 0xa05   : > { %5171 = vmatpush1.bf16.msra.mxu0 %v5170_v1 }
 0xa06   : > { %v5174_v47 = vpack.c.bf16 %v2409_v57, %v2407_v40  ;;  %v2424_v58 = vpop.permute.xlu1 %2423  ;;  %v2418_v21 = vpop.permute.xlu0 %2417  ;;  %v5172_v38 = vpack.c.bf16 %v2410_v13, %v2408_v23  ;;  %v8501_v40 = vld [vmem:[#allocation12_spill] sm:$0xff]  ;;  %v2482_v13 = vld [vmem:[%s8419_s11 + $0x38] sm:$0xff] }
 0xa07   : > { %v2429_v29 = vsel %vm871_vm6, %v2416_v15, %v2424_v58  ;;  %v2433_v55 = vsel %vm871_vm6, %v2424_v58, %v2416_v15  ;;  %v8502_v15 = vld [vmem:[#allocation13_spill] sm:$0xff] }
 0xa08   : > { %5173 = vmatprep.subr.bf16.mxu0 %v5172_v38  ;;  %v2439_v18 = vmul.f32 %v2429_v29, %v6209_v5  ;;  %v2440_v12 = vmul.f32 %v2433_v55, %v6213_v14 }
 0xa09   : > { %5175 = vmatpush1.bf16.msra.mxu0 %v5174_v47 }
 0xa0a   : > { %v2444_v62 = vpop.permute.xlu1 %2443  ;;  %v2426_v46 = vpop.permute.xlu0 %2425  ;;  %5177 = vmatprep.subr.bf16.mxu0 %v5176_v45 }
 0xa0b   : > { %v2430_v35 = vsel %vm871_vm6, %v2418_v21, %v2426_v46  ;;  %v2434_v44 = vsel %vm871_vm6, %v2426_v46, %v2418_v21  ;;  %v2481_v21 = vld [vmem:[%s8419_s11 + $0x30] sm:$0xff] }
 0xa0c   : > { %v2441_v60 = vmul.f32 %v2430_v35, %v6209_v5  ;;  %v2442_v59 = vmul.f32 %v2434_v44, %v6213_v14 }
 0xa0d   : > { %5179 = vmatpush1.bf16.msra.mxu0 %v5178_v10  ;;  %v2484_v10 = vld [vmem:[%s8419_s11 + $0x48] sm:$0xff] }
 0xa0e   : > { %v5182_v6 = vpack.c.bf16 %v2441_v60, %v2439_v18  ;;  %v2452_v52 = vpop.permute.xlu1 %2451  ;;  %v2446_v51 = vpop.permute.xlu0 %2445  ;;  %v5180_v56 = vpack.c.bf16 %v2442_v59, %v2440_v12  ;;  %v2477_v18 = vld [vmem:[%s8419_s11 + $0x10] sm:$0xff]  ;;  %v8503_v12 = vld [vmem:[#allocation7_spill] sm:$0xff] }
 0xa0f   : > { %v2459_v28 = vsel %vm912_vm7, %v2444_v62, %v2452_v52  ;;  %v2463_v3 = vsel %vm912_vm7, %v2452_v52, %v2444_v62  ;;  %v8504_v60 = vld [vmem:[#allocation8_spill] sm:$0xff]  ;;  %v2480_v59 = vld [vmem:[%s8419_s11 + $0x28] sm:$0xff]  ;;  %v8506_v52 = vld [vmem:[#allocation10_spill] sm:$0xff] }
 0xa10   : > { %5181 = vmatprep.subr.bf16.mxu0 %v5180_v56  ;;  %v2467_v23 = vmul.f32 %v2459_v28, %v8501_v40  ;;  %v2468_v2 = vmul.f32 %v2463_v3, %v8502_v15  ;;  %v2486_v56 = vld [vmem:[%s8419_s11 + $0x58] sm:$0xff]  ;;  %v3191_v28 = vld [vmem:[%s8418_s10] sm:$0xff] }
 0xa11   : > { %5183 = vmatpush1.bf16.msra.mxu0 %v5182_v6  ;;  %v8505_v6 = vld [vmem:[#allocation9_spill] sm:$0xff] }
 0xa12   : > { %v2448_v16 = vpop.permute.xlu1 %2447  ;;  %v2454_v24 = vpop.permute.xlu0 %2453 }
 0xa13   : > { %v2460_v36 = vsel %vm912_vm7, %v2446_v51, %v2454_v24  ;;  %v2464_v1 = vsel %vm912_vm7, %v2454_v24, %v2446_v51  ;;  %v2483_v51 = vld [vmem:[%s8419_s11 + $0x40] sm:$0xff] }
 0xa14   : > { %v2469_v42 = vmul.f32 %v2460_v36, %v8501_v40  ;;  %v2470_v7 = vmul.f32 %v2464_v1, %v8502_v15  ;;  %2564 = vmatmul.mubr.f32.vlgmr.msra.gmra.mrb[8].mxu0 %v2475_v41 }
 0xa15   : > { %2569 = vmatprep.mubr.f32.mxu0 %v2479_v20 }
 0xa16   : > { %v5186_v61 = vpack.c.bf16 %v2469_v42, %v2467_v23  ;;  %v2456_v26 = vpop.permute.xlu1 %2455  ;;  %v2450_v4 = vpop.permute.xlu0 %2449  ;;  %v5184_v57 = vpack.c.bf16 %v2470_v7, %v2468_v2 }
 0xa17   : > { %v2461_v47 = vsel %vm912_vm7, %v2448_v16, %v2456_v26  ;;  %v2465_v58 = vsel %vm912_vm7, %v2456_v26, %v2448_v16 }
 0xa18   : > { %2570 = vmatmul.mubr.f32.gmra.mrb[10].mxu0 %v2478_v54  ;;  %5185 = vmatprep.subr.bf16.mxu0 %v5184_v57  ;;  %v2471_v29 = vmul.f32 %v2461_v47, %v8501_v40  ;;  %v2472_v55 = vmul.f32 %v2465_v58, %v8502_v15 }
 0xa19   : > { %5187 = vmatpush1.bf16.msra.mxu0 %v5186_v61  ;;  %2575 = vmatprep.mubr.f32.mxu0 %v2482_v13 }
 0xa1a   : > { %v2458_v38 = vpop.permute.xlu0 %2457 }
 0xa1b   : > { %v2462_v50 = vsel %vm912_vm7, %v2450_v4, %v2458_v38  ;;  %v2466_v45 = vsel %vm912_vm7, %v2458_v38, %v2450_v4 }
 0xa1c   : > { %v2473_v62 = vmul.f32 %v2462_v50, %v8501_v40  ;;  %v2474_v46 = vmul.f32 %v2466_v45, %v8502_v15  ;;  %2576 = vmatmul.mubr.f32.gmra.mrb[12].mxu0 %v2481_v21 }
 0xa1d   : > { %2581 = vmatprep.mubr.f32.mxu0 %v2485_v32 }
 0xa1e   : > { %v5190_v35 = vpack.c.bf16 %v2473_v62, %v2471_v29  ;;  %v5188_v44 = vpack.c.bf16 %v2474_v46, %v2472_v55  ;;  %v2714_v29 = vld [vmem:[%s8420_s12 + $0x8] sm:$0xff] }
 0xa1f   : > { %3073 = vmatprep.mubr.f32.mxu1 %v2714_v29 }
 0xa20   : > { %2582 = vmatmul.mubr.f32.gmra.mrb[14].mxu0 %v2484_v10  ;;  %5189 = vmatprep.subr.bf16.mxu0 %v5188_v44 }
 0xa21   : > { %5191 = vmatpush1.bf16.msra.mxu0 %v5190_v35  ;;  %2652 = vmatprep.mubr.f32.mxu0 %v8489_v27 }
 0xa22   : > { %5265 = vmatprep.subr.bf16.mxu0 %v8503_v12 }
 0xa24   : > { %4829 = vmatmul.mubr.msk.f32.vlgmr.msra.gmra.mrb[8].mxu0 %vm961_vm8, %v2477_v18 }
 0xa25   : > { %5267 = vmatpush1.bf16.msra.mxu0 %v8504_v60  ;;  %2658 = vmatprep.mubr.f32.mxu0 %v8489_v27 }
 0xa26   : > { %5269 = vmatprep.subr.bf16.mxu0 %v8505_v6 }
 0xa28   : > { %4830 = vmatmul.mubr.msk.f32.gmra.mrb[10].mxu0 %vm961_vm8, %v2480_v59  ;;  %v8508_v59 = vld [vmem:[#allocation15_spill] sm:$0xff] }
 0xa29   : > { %5271 = vmatpush1.bf16.msra.mxu0 %v8506_v52  ;;  %2664 = vmatprep.mubr.f32.mxu0 %v8489_v27 }
 0xa2a   : > { %5273 = vmatprep.subr.bf16.mxu0 %v7128_v63  ;;  %v2680_v63 = vpop.permute.xlu1 %2679 }
 0xa2b   : > { %v2685_v24 = vpop.permute.xlu0 %2684 }
 0xa2c   : > { %4831 = vmatmul.mubr.msk.f32.gmra.mrb[12].mxu0 %vm961_vm8, %v2483_v51  ;;  %v8509_v51 = vld [vmem:[#allocation14_spill] sm:$0xff] }
 0xa2d   : > { %2670 = vmatprep.mubr.f32.mxu0 %v8489_v27 }
 0xa2e   : > { %v2690_v4 = vpop.permute.xlu1 %2689 }
 0xa30   : > { %4832 = vmatmul.mubr.msk.f32.gmra.mrb[14].mxu0 %vm961_vm8, %v2486_v56  ;;  %v8510_v56 = vmov 0  }
 0xa31   : > { %3271 = vmatprep.mubr.f32.mxu0 %v8489_v27 }
 0xa32   : > { %v2695_v13 = vpop.permute.xlu1 %2694 }
 0xa34   : > { %4837 = vmatmul.mubr.msk.f32.vlgmr.msra.gmra.mrb[24].mxu0 %vm961_vm8, %v3191_v28 }
 0xa35   : > { %5275 = vmatpush1.bf16.msra.mxu0 %v7145_v43  ;;  %3277 = vmatprep.mubr.f32.mxu0 %v8489_v27 }
 0xa36   : > { %5277 = vmatprep.subr.bf16.mxu0 %v7150_v39 }
 0xa39   : > { %5279 = vmatpush1.bf16.msra.mxu0 %v7166_v22 }
 0xaf7   : > { %v2654_v3 = vpop.f32.mrb[8].mxu0 }
 0xaf8   : > { %v2697_v41 = vadd.f32 %v2680_v63, %v2654_v3  ;;  %v2656_v16 = vpop.f32.mrb[9].mxu0 }
 0xaf9   : > { %v2698_v7 = vadd.f32 %v2680_v63, %v2656_v16 }
 0xafa   : > { %v7307_v20 = vmax.f32 %v2697_v41, 0.0 }
 0xafb   : > { %v2660_v36 = vpop.f32.mrb[10].mxu0  ;;  %v7329_v54 = vmax.f32 %v2698_v7, 0.0 }
 0xafc   : > { %v2699_v1 = vadd.f32 %v2685_v24, %v2660_v36  ;;  %2725 = vrot.lane.b32.xlu0 %v7307_v20, %s8471_s30  ;;  %v2662_v23 = vpop.f32.mrb[11].mxu0 }
 0xafd   : > { %v2700_v61 = vadd.f32 %v2685_v24, %v2662_v23 }
 0xafe   : > { %v7311_v43 = vmax.f32 %v2699_v1, 0.0 }
 0xaff   : > { %v2666_v2 = vpop.f32.mrb[12].mxu0  ;;  %v7335_v26 = vmax.f32 %v2700_v61, 0.0 }
 0xb00   : > { %2757 = vrot.lane.b32.xlu0 %v7307_v20, %s8492_s23  ;;  %2727 = vrot.lane.b32.xlu1 %v7311_v43, %s8471_s30  ;;  %v2668_v39 = vpop.f32.mrb[13].mxu0  ;;  %v2701_v57 = vadd.f32 %v2690_v4, %v2666_v2 }
 0xb01   : > { %v2702_v38 = vadd.f32 %v2690_v4, %v2668_v39 }
 0xb02   : > { %v7349_v47 = vmax.f32 %v2701_v57, 0.0 }
 0xb03   : > { %v2672_v22 = vpop.f32.mrb[14].mxu0  ;;  %v7369_v32 = vmax.f32 %v2702_v38, 0.0 }
 0xb04   : > { %2789 = vrot.lane.b32.xlu0 %v7307_v20, %s8493_s25  ;;  %2759 = vrot.lane.b32.xlu1 %v7311_v43, %s8492_s23  ;;  %v2674_v42 = vpop.f32.mrb[15].mxu0  ;;  %v2703_v58 = vadd.f32 %v2695_v13, %v2672_v22 }
 0xb05   : > { %v2704_v50 = vadd.f32 %v2695_v13, %v2674_v42 }
 0xb06   : > { %v7355_v21 = vmax.f32 %v2703_v58, 0.0 }
 0xb07   : > { %v7375_v45 = vmax.f32 %v2704_v50, 0.0 }
 0xb08   : > { %2821 = vrot.lane.b32.xlu0 %v7307_v20, %s8494_s28  ;;  %2791 = vrot.lane.b32.xlu1 %v7311_v43, %s8493_s25 }
 0xb0c   : > { %2853 = vrot.lane.b32.xlu0 %v7307_v20, %s8495_s20  ;;  %2823 = vrot.lane.b32.xlu1 %v7311_v43, %s8494_s28 }
 0xb10   : > { %2733 = vrot.lane.b32.xlu0 %v7329_v54, %s8471_s30  ;;  %2855 = vrot.lane.b32.xlu1 %v7311_v43, %s8495_s20 }
 0xb14   : > { %2765 = vrot.lane.b32.xlu0 %v7329_v54, %s8492_s23  ;;  %2735 = vrot.lane.b32.xlu1 %v7335_v26, %s8471_s30 }
 0xb18   : > { %2797 = vrot.lane.b32.xlu0 %v7329_v54, %s8493_s25  ;;  %2767 = vrot.lane.b32.xlu1 %v7335_v26, %s8492_s23 }
 0xb1c   : > { %2829 = vrot.lane.b32.xlu0 %v7329_v54, %s8494_s28  ;;  %2799 = vrot.lane.b32.xlu1 %v7335_v26, %s8493_s25 }
 0xb20   : > { %2831 = vrot.lane.b32.xlu1 %v7335_v26, %s8494_s28  ;;  %2729 = vrot.lane.b32.xlu0 %v7349_v47, %s8471_s30 }
 0xb24   : > { %2761 = vrot.lane.b32.xlu0 %v7349_v47, %s8492_s23  ;;  %2731 = vrot.lane.b32.xlu1 %v7355_v21, %s8471_s30 }
 0xb28   : > { %2793 = vrot.lane.b32.xlu0 %v7349_v47, %s8493_s25  ;;  %2763 = vrot.lane.b32.xlu1 %v7355_v21, %s8492_s23 }
 0xb2c   : > { %2825 = vrot.lane.b32.xlu0 %v7349_v47, %s8494_s28  ;;  %2795 = vrot.lane.b32.xlu1 %v7355_v21, %s8493_s25 }
 0xb30   : > { %2737 = vrot.lane.b32.xlu0 %v7369_v32, %s8471_s30  ;;  %2827 = vrot.lane.b32.xlu1 %v7355_v21, %s8494_s28 }
 0xb34   : > { %2861 = vrot.lane.b32.xlu0 %v7329_v54, %s8495_s20  ;;  %2739 = vrot.lane.b32.xlu1 %v7375_v45, %s8471_s30  ;;  %s5661_s30 = smov 47  }
 0xb38   : > { %2769 = vrot.lane.b32.xlu0 %v7369_v32, %s8492_s23  ;;  %2863 = vrot.lane.b32.xlu1 %v7335_v26, %s8495_s20 }
 0xb3c   : > { %2801 = vrot.lane.b32.xlu0 %v7369_v32, %s8493_s25  ;;  %2771 = vrot.lane.b32.xlu1 %v7375_v45, %s8492_s23 }
 0xb40   : > { %2833 = vrot.lane.b32.xlu0 %v7369_v32, %s8494_s28  ;;  %2859 = vrot.lane.b32.xlu1 %v7355_v21, %s8495_s20 }
 0xb44   : > { %2857 = vrot.lane.b32.xlu0 %v7349_v47, %s8495_s20  ;;  %2803 = vrot.lane.b32.xlu1 %v7375_v45, %s8493_s25 }
 0xb48   : > { %2865 = vrot.lane.b32.xlu0 %v7369_v32, %s8495_s20  ;;  %2887 = vrot.lane.b32.xlu1 %v7311_v43, %s8496_s29 }
 0xb4c   : > { %2885 = vrot.lane.b32.xlu0 %v7307_v20, %s8496_s29  ;;  %2835 = vrot.lane.b32.xlu1 %v7375_v45, %s8494_s28 }
 0xb50   : > { %2893 = vrot.lane.b32.xlu0 %v7329_v54, %s8496_s29  ;;  %2895 = vrot.lane.b32.xlu1 %v7335_v26, %s8496_s29 }
 0xb54   : > { %2889 = vrot.lane.b32.xlu0 %v7349_v47, %s8496_s29  ;;  %2891 = vrot.lane.b32.xlu1 %v7355_v21, %s8496_s29 }
 0xb58   : > { %2897 = vrot.lane.b32.xlu0 %v7369_v32, %s8496_s29  ;;  %2919 = vrot.lane.b32.xlu1 %v7311_v43, %s8507_s27 }
 0xb5c   : > { %2917 = vrot.lane.b32.xlu0 %v7307_v20, %s8507_s27  ;;  %2867 = vrot.lane.b32.xlu1 %v7375_v45, %s8495_s20 }
 0xb60   : > { %2925 = vrot.lane.b32.xlu0 %v7329_v54, %s8507_s27  ;;  %2927 = vrot.lane.b32.xlu1 %v7335_v26, %s8507_s27 }
 0xb64   : > { %2921 = vrot.lane.b32.xlu0 %v7349_v47, %s8507_s27  ;;  %2899 = vrot.lane.b32.xlu1 %v7375_v45, %s8496_s29 }
 0xb68   : > { %2929 = vrot.lane.b32.xlu0 %v7369_v32, %s8507_s27  ;;  %2923 = vrot.lane.b32.xlu1 %v7355_v21, %s8507_s27 }
 0xb6c   : > { %2949 = vrot.lane.b32.xlu0 %v7307_v20, %s8497_s19  ;;  %2931 = vrot.lane.b32.xlu1 %v7375_v45, %s8507_s27 }
 0xb6e   : > { %v2726_v55 = vpop.permute.xlu0 %2725 }
 0xb70   : > { %2957 = vrot.lane.b32.xlu0 %v7329_v54, %s8497_s19  ;;  %2951 = vrot.lane.b32.xlu1 %v7311_v43, %s8497_s19 }
 0xb72   : > { %v7444_v62 = vpop.permute.xlu0 %2757  ;;  %v2728_v46 = vpop.permute.xlu1 %2727 }
 0xb74   : > { %2953 = vrot.lane.b32.xlu0 %v7349_v47, %s8497_s19  ;;  %2959 = vrot.lane.b32.xlu1 %v7335_v26, %s8497_s19 }
 0xb76   : > { %v7450_v10 = vpop.permute.xlu0 %2789  ;;  %v2760_v35 = vpop.permute.xlu1 %2759 }
 0xb78   : > { %2961 = vrot.lane.b32.xlu0 %v7369_v32, %s8497_s19  ;;  %2955 = vrot.lane.b32.xlu1 %v7355_v21, %s8497_s19 }
 0xb7a   : > { %v7456_v44 = vpop.permute.xlu0 %2821  ;;  %v7458_v18 = vpop.permute.xlu1 %2791 }
 0xb7c   : > { %2963 = vrot.lane.b32.xlu1 %v7375_v45, %s8497_s19  ;;  %2982 = vperm.xlu0 %5520, %v6959_v25  }
 0xb7e   : > { %v7463_v12 = vpop.permute.xlu0 %2853  ;;  %v7465_v60 = vpop.permute.xlu1 %2823 }
 0xb80   : > { %2986 = vperm.xlu1 %5521, %v7002_v37   ;;  %2994 = vperm.xlu0 %5520, %v8508_v59  }
 0xb82   : > { %v2734_v6 = vpop.permute.xlu0 %2733  ;;  %v7469_v52 = vpop.permute.xlu1 %2855 }
 0xb83   : > { %v2741_v28 = vsel %vm625_vm0, %v2726_v55, %v2734_v6  ;;  %v2745_v25 = vsel %vm625_vm0, %v2734_v6, %v2726_v55 }
 0xb84   : > { %2990 = vperm.xlu1 %5521, %v8509_v51   ;;  %5522 = vset.pattern.permute.xlu0 %v8510_v56  ;;  %v2749_v16 = vmul.f32 %v2745_v25, %v5967_v19  ;;  %v2750_v24 = vmul.f32 %v2741_v28, %v5957_v17 }
 0xb86   : > { %v2766_v63 = vpop.permute.xlu0 %2765  ;;  %v2736_v3 = vpop.permute.xlu1 %2735 }
 0xb87   : > { %v2742_v37 = vsel %vm625_vm0, %v2728_v46, %v2736_v3  ;;  %v2746_v41 = vsel %vm625_vm0, %v2736_v3, %v2728_v46 }
 0xb88   : > { %v2751_v36 = vmul.f32 %v2746_v41, %v5967_v19  ;;  %v2752_v1 = vmul.f32 %v2742_v37, %v5957_v17  ;;  %5523 = vset.pattern.permute.xlu1 %v8510_v56  ;;  %v2773_v56 = vsel %vm666_vm1, %v7444_v62, %v2766_v63 }
 0xb8a   : > { %v5194_v23 = vpack.c.bf16 %v2751_v36, %v2749_v16  ;;  %v2798_v2 = vpop.permute.xlu0 %2797  ;;  %v2768_v39 = vpop.permute.xlu1 %2767  ;;  %v5192_v22 = vpack.c.bf16 %v2752_v1, %v2750_v24 }
 0xb8b   : > { %v2774_v59 = vsel %vm666_vm1, %v2760_v35, %v2768_v39  ;;  %v2778_v3 = vsel %vm666_vm1, %v2768_v39, %v2760_v35  ;;  %v2777_v35 = vsel %vm666_vm1, %v2766_v63, %v7444_v62  ;;  %v2782_v39 = vmul.f32 %v2773_v56, %v6009_v49 }
 0xb8c   : > { %5193 = vmatprep.subr.bf16.mxu1 %v5192_v22  ;;  %v2784_v37 = vmul.f32 %v2774_v59, %v6009_v49  ;;  %v2783_v22 = vmul.f32 %v2778_v3, %v6005_v48  ;;  %v2805_v56 = vsel %vm707_vm2, %v7450_v10, %v2798_v2 }
 0xb8d   : > { %5195 = vmatpush1.bf16.msra.mxu1 %v5194_v23 }
 0xb8e   : > { %v7486_v42 = vpop.permute.xlu0 %2829  ;;  %v2800_v7 = vpop.permute.xlu1 %2799 }
 0xb92   : > { %v7488_v61 = vpop.permute.xlu1 %2831  ;;  %v2730_v4 = vpop.permute.xlu0 %2729 }
 0xb96   : > { %v2762_v57 = vpop.permute.xlu0 %2761  ;;  %v2732_v13 = vpop.permute.xlu1 %2731 }
 0xb9a   : > { %v2794_v58 = vpop.permute.xlu0 %2793  ;;  %v2764_v38 = vpop.permute.xlu1 %2763 }
 0xb9e   : > { %v7490_v50 = vpop.permute.xlu0 %2825  ;;  %v7492_v29 = vpop.permute.xlu1 %2795 }
 0xba2   : > { %v2738_v55 = vpop.permute.xlu0 %2737  ;;  %v7494_v46 = vpop.permute.xlu1 %2827 }
 0xba3   : > { %v2743_v6 = vsel %vm625_vm0, %v2730_v4, %v2738_v55  ;;  %v2747_v51 = vsel %vm625_vm0, %v2738_v55, %v2730_v4 }
 0xba4   : > { %v2753_v24 = vmul.f32 %v2747_v51, %v5967_v19  ;;  %v2754_v36 = vmul.f32 %v2743_v6, %v5957_v17  ;;  %v2781_v51 = vmul.f32 %v2777_v35, %v6005_v48  ;;  %v2806_v6 = vsel %vm707_vm2, %v7458_v18, %v2800_v7 }
 0xba6   : > { %v7505_v28 = vpop.permute.xlu0 %2861  ;;  %v2740_v25 = vpop.permute.xlu1 %2739  ;;  %v5202_v3 = vpack.c.bf16 %v2783_v22, %v2781_v51 }
 0xba7   : > { %v2744_v41 = vsel %vm625_vm0, %v2732_v13, %v2740_v25  ;;  %v2748_v16 = vsel %vm625_vm0, %v2740_v25, %v2732_v13  ;;  %v5200_v25 = vpack.c.bf16 %v2784_v37, %v2782_v39  ;;  %v2816_v37 = vmul.f32 %v2806_v6, %v6045_v31 }
 0xba8   : > { %v2755_v1 = vmul.f32 %v2748_v16, %v5967_v19  ;;  %v2756_v23 = vmul.f32 %v2744_v41, %v5957_v17  ;;  %v2838_v6 = vsel %vm748_vm3, %v7465_v60, %v7488_v61 }
 0xbaa   : > { %v5198_v4 = vpack.c.bf16 %v2755_v1, %v2753_v24  ;;  %v2770_v55 = vpop.permute.xlu0 %2769  ;;  %v7523_v59 = vpop.permute.xlu1 %2863  ;;  %v5196_v13 = vpack.c.bf16 %v2756_v23, %v2754_v36  ;;  %v2810_v24 = vsel %vm707_vm2, %v2800_v7, %v7458_v18  ;;  %v2809_v18 = vsel %vm707_vm2, %v2798_v2, %v7450_v10 }
 0xbab   : > { %v2775_v62 = vsel %vm666_vm1, %v2762_v57, %v2770_v55  ;;  %v2779_v63 = vsel %vm666_vm1, %v2770_v55, %v2762_v57  ;;  %v2814_v7 = vmul.f32 %v2805_v56, %v6045_v31  ;;  %v2815_v22 = vmul.f32 %v2810_v24, %v6041_v30 }
 0xbac   : > { %5197 = vmatprep.subr.bf16.mxu1 %v5196_v13  ;;  %v2785_v1 = vmul.f32 %v2779_v63, %v6005_v48  ;;  %v2786_v23 = vmul.f32 %v2775_v62, %v6009_v49  ;;  %v2813_v51 = vmul.f32 %v2809_v18, %v6041_v30  ;;  %v2837_v62 = vsel %vm748_vm3, %v7456_v44, %v7486_v42 }
 0xbad   : > { %5199 = vmatpush1.bf16.msra.mxu1 %v5198_v4  ;;  %v2848_v24 = vmul.f32 %v2838_v6, %v6081_v9 }
 0xbae   : > { %v2802_v41 = vpop.permute.xlu0 %2801  ;;  %5201 = vmatprep.subr.bf16.mxu1 %v5200_v25  ;;  %v2772_v16 = vpop.permute.xlu1 %2771  ;;  %v5208_v25 = vpack.c.bf16 %v2816_v37, %v2814_v7  ;;  %v5210_v63 = vpack.c.bf16 %v2815_v22, %v2813_v51 }
 0xbaf   : > { %v2776_v36 = vsel %vm666_vm1, %v2764_v38, %v2772_v16  ;;  %v2780_v57 = vsel %vm666_vm1, %v2772_v16, %v2764_v38  ;;  %v2807_v10 = vsel %vm707_vm2, %v2794_v58, %v2802_v41  ;;  %v2811_v2 = vsel %vm707_vm2, %v2802_v41, %v2794_v58 }
 0xbb0   : > { %v2787_v35 = vmul.f32 %v2780_v57, %v6005_v48  ;;  %v2788_v39 = vmul.f32 %v2776_v36, %v6009_v49  ;;  %v2842_v16 = vsel %vm748_vm3, %v7488_v61, %v7465_v60  ;;  %v2817_v37 = vmul.f32 %v2811_v2, %v6041_v30 }
 0xbb1   : > { %5203 = vmatpush1.bf16.msra.mxu1 %v5202_v3  ;;  %v2818_v36 = vmul.f32 %v2807_v10, %v6045_v31  ;;  %v2841_v60 = vsel %vm748_vm3, %v7486_v42, %v7456_v44  ;;  %v2846_v61 = vmul.f32 %v2837_v62, %v6081_v9  ;;  %v2847_v18 = vmul.f32 %v2842_v16, %v6077_v8 }
 0xbb2   : > { %v5206_v4 = vpack.c.bf16 %v2787_v35, %v2785_v1  ;;  %v2834_v55 = vpop.permute.xlu0 %2833  ;;  %v7553_v38 = vpop.permute.xlu1 %2859  ;;  %v5204_v13 = vpack.c.bf16 %v2788_v39, %v2786_v23  ;;  %v2845_v22 = vmul.f32 %v2841_v60, %v6077_v8 }
 0xbb3   : > { %v5216_v7 = vpack.c.bf16 %v2848_v24, %v2846_v61  ;;  %v2843_v44 = vsel %vm748_vm3, %v2834_v55, %v7490_v50  ;;  %v5224_v24 = vpack.c.bf16 %v7335_v26, %v7329_v54  ;;  %v5226_v54 = vpack.c.bf16 %v7311_v43, %v7307_v20 }
 0xbb4   : > { %5205 = vmatprep.subr.bf16.mxu1 %v5204_v13  ;;  %v5218_v51 = vpack.c.bf16 %v2847_v18, %v2845_v22  ;;  %v2849_v10 = vmul.f32 %v2843_v44, %v6077_v8 }
 0xbb5   : > { %5207 = vmatpush1.bf16.msra.mxu1 %v5206_v4  ;;  %v2839_v4 = vsel %vm748_vm3, %v7490_v50, %v2834_v55 }
 0xbb6   : > { %v2858_v56 = vpop.permute.xlu0 %2857  ;;  %5209 = vmatprep.subr.bf16.mxu1 %v5208_v25  ;;  %v2804_v3 = vpop.permute.xlu1 %2803  ;;  %v2850_v2 = vmul.f32 %v2839_v4, %v6081_v9 }
 0xbb7   : > { %v2808_v58 = vsel %vm707_vm2, %v7492_v29, %v2804_v3  ;;  %v2812_v41 = vsel %vm707_vm2, %v2804_v3, %v7492_v29 }
 0xbb8   : > { %v2819_v57 = vmul.f32 %v2812_v41, %v6041_v30  ;;  %v2820_v1 = vmul.f32 %v2808_v58, %v6045_v31 }
 0xbb9   : > { %5211 = vmatpush1.bf16.msra.mxu1 %v5210_v63 }
 0xbba   : > { %v5214_v23 = vpack.c.bf16 %v2819_v57, %v2817_v37  ;;  %v2866_v35 = vpop.permute.xlu0 %2865  ;;  %v2888_v39 = vpop.permute.xlu1 %2887  ;;  %v5212_v29 = vpack.c.bf16 %v2820_v1, %v2818_v36  ;;  %v2873_v37 = vsel %vm789_vm4, %v7505_v28, %v7463_v12  ;;  %v2870_v36 = vsel %vm789_vm4, %v7469_v52, %v7523_v59 }
 0xbbb   : > { %v5228_v57 = vpack.c.bf16 %v7375_v45, %v7369_v32  ;;  %v2869_v1 = vsel %vm789_vm4, %v7463_v12, %v7505_v28  ;;  %v2878_v60 = vmul.f32 %v2873_v37, %v6124_v53  ;;  %v2879_v61 = vmul.f32 %v2870_v36, %v6132_v0 }
 0xbbc   : > { %5213 = vmatprep.subr.bf16.mxu1 %v5212_v29  ;;  %v2871_v20 = vsel %vm789_vm4, %v2858_v56, %v2866_v35  ;;  %v2875_v43 = vsel %vm789_vm4, %v2866_v35, %v2858_v56  ;;  %v5230_v32 = vpack.c.bf16 %v7355_v21, %v7349_v47  ;;  %v2877_v45 = vmul.f32 %v2869_v1, %v6132_v0 }
 0xbbd   : > { %5215 = vmatpush1.bf16.msra.mxu1 %v5214_v23  ;;  %v2881_v18 = vmul.f32 %v2871_v20, %v6132_v0 }
 0xbbe   : > { %v2886_v42 = vpop.permute.xlu0 %2885  ;;  %5217 = vmatprep.subr.bf16.mxu1 %v5216_v7  ;;  %v2836_v13 = vpop.permute.xlu1 %2835  ;;  %v5234_v29 = vpack.c.bf16 %v2879_v61, %v2877_v45  ;;  %v2882_v7 = vmul.f32 %v2875_v43, %v6124_v53 }
 0xbbf   : > { %v2840_v6 = vsel %vm748_vm3, %v7494_v46, %v2836_v13  ;;  %v2844_v25 = vsel %vm748_vm3, %v2836_v13, %v7494_v46  ;;  %v2874_v46 = vsel %vm789_vm4, %v7523_v59, %v7469_v52 }
 0xbc0   : > { %v2851_v62 = vmul.f32 %v2844_v25, %v6077_v8  ;;  %v2852_v50 = vmul.f32 %v2840_v6, %v6081_v9  ;;  %v2880_v26 = vmul.f32 %v2874_v46, %v6124_v53 }
 0xbc1   : > { %5219 = vmatpush1.bf16.msra.mxu1 %v5218_v51 }
 0xbc2   : > { %v5222_v55 = vpack.c.bf16 %v2851_v62, %v2849_v10  ;;  %v2894_v63 = vpop.permute.xlu0 %2893  ;;  %v2896_v3 = vpop.permute.xlu1 %2895  ;;  %v5220_v16 = vpack.c.bf16 %v2852_v50, %v2850_v2  ;;  %v5232_v12 = vpack.c.bf16 %v2880_v26, %v2878_v60 }
 0xbc3   : > { %v2905_v28 = vsel %vm830_vm5, %v2894_v63, %v2886_v42  ;;  %v2906_v59 = vsel %vm830_vm5, %v2896_v3, %v2888_v39  ;;  %v2901_v47 = vsel %vm830_vm5, %v2886_v42, %v2894_v63  ;;  %v2902_v21 = vsel %vm830_vm5, %v2888_v39, %v2896_v3 }
 0xbc4   : > { %5221 = vmatprep.subr.bf16.mxu1 %v5220_v16  ;;  %v2910_v44 = vmul.f32 %v2905_v28, %v6180_v34  ;;  %v2912_v13 = vmul.f32 %v2906_v59, %v6180_v34  ;;  %v2909_v42 = vmul.f32 %v2901_v47, %v6176_v33  ;;  %v2911_v39 = vmul.f32 %v2902_v21, %v6176_v33 }
 0xbc5   : > { %5223 = vmatpush1.bf16.msra.mxu1 %v5222_v55 }
 0xbc6   : > { %v2890_v58 = vpop.permute.xlu0 %2889  ;;  %5225 = vmatprep.subr.bf16.mxu1 %v5224_v24  ;;  %v2892_v41 = vpop.permute.xlu1 %2891  ;;  %v5240_v55 = vpack.c.bf16 %v2912_v13, %v2910_v44  ;;  %v5242_v16 = vpack.c.bf16 %v2911_v39, %v2909_v42 }
 0xbc9   : > { %5227 = vmatpush1.bf16.msra.mxu1 %v5226_v54 }
 0xbca   : > { %v2898_v23 = vpop.permute.xlu0 %2897  ;;  %v2920_v52 = vpop.permute.xlu1 %2919  ;;  %5229 = vmatprep.subr.bf16.mxu1 %v5228_v57 }
 0xbcb   : > { %v2907_v50 = vsel %vm830_vm5, %v2898_v23, %v2890_v58 }
 0xbcc   : > { %v2914_v46 = vmul.f32 %v2907_v50, %v6180_v34 }
 0xbcd   : > { %5231 = vmatpush1.bf16.msra.mxu1 %v5230_v32 }
 0xbce   : > { %v2918_v22 = vpop.permute.xlu0 %2917  ;;  %v2868_v56 = vpop.permute.xlu1 %2867  ;;  %5233 = vmatprep.subr.bf16.mxu1 %v5232_v12 }
 0xbcf   : > { %v2872_v35 = vsel %vm789_vm4, %v7553_v38, %v2868_v56  ;;  %v2876_v4 = vsel %vm789_vm4, %v2868_v56, %v7553_v38  ;;  %v2903_v38 = vsel %vm830_vm5, %v2890_v58, %v2898_v23 }
 0xbd0   : > { %v2883_v51 = vmul.f32 %v2872_v35, %v6132_v0  ;;  %v2884_v6 = vmul.f32 %v2876_v4, %v6124_v53  ;;  %v2913_v24 = vmul.f32 %v2903_v38, %v6176_v33 }
 0xbd1   : > { %5235 = vmatpush1.bf16.msra.mxu1 %v5234_v29 }
 0xbd2   : > { %v5238_v25 = vpack.c.bf16 %v2883_v51, %v2881_v18  ;;  %v2926_v10 = vpop.permute.xlu0 %2925  ;;  %v2928_v2 = vpop.permute.xlu1 %2927  ;;  %v5236_v62 = vpack.c.bf16 %v2884_v6, %v2882_v7 }
 0xbd3   : > { %v2937_v63 = vsel %vm871_vm6, %v2926_v10, %v2918_v22  ;;  %v2938_v3 = vsel %vm871_vm6, %v2928_v2, %v2920_v52  ;;  %v2933_v58 = vsel %vm871_vm6, %v2918_v22, %v2926_v10  ;;  %v2934_v54 = vsel %vm871_vm6, %v2920_v52, %v2928_v2 }
 0xbd4   : > { %5237 = vmatprep.subr.bf16.mxu1 %v5236_v62  ;;  %v2942_v1 = vmul.f32 %v2937_v63, %v6213_v14  ;;  %v2944_v60 = vmul.f32 %v2938_v3, %v6213_v14  ;;  %v2941_v52 = vmul.f32 %v2933_v58, %v6209_v5  ;;  %v2943_v12 = vmul.f32 %v2934_v54, %v6209_v5  ;;  %v2717_v62 = vld [vmem:[%s8420_s12 + $0x20] sm:$0xff]  ;;  %v2720_v54 = vld [vmem:[%s8420_s12 + $0x38] sm:$0xff] }
 0xbd5   : > { %5239 = vmatpush1.bf16.msra.mxu1 %v5238_v25  ;;  %v2713_v25 = vld [vmem:[%s8420_s12] sm:$0xff] }
 0xbd6   : > { %v2922_v37 = vpop.permute.xlu0 %2921  ;;  %v2900_v36 = vpop.permute.xlu1 %2899  ;;  %5241 = vmatprep.subr.bf16.mxu1 %v5240_v55  ;;  %v5248_v28 = vpack.c.bf16 %v2944_v60, %v2942_v1  ;;  %v5250_v7 = vpack.c.bf16 %v2943_v12, %v2941_v52  ;;  %v2719_v1 = vld [vmem:[%s8420_s12 + $0x30] sm:$0xff]  ;;  %v2722_v12 = vld [vmem:[%s8420_s12 + $0x48] sm:$0xff] }
 0xbd7   : > { %v2904_v26 = vsel %vm830_vm5, %v2892_v41, %v2900_v36  ;;  %v2908_v57 = vsel %vm830_vm5, %v2900_v36, %v2892_v41 }
 0xbd8   : > { %v2915_v61 = vmul.f32 %v2904_v26, %v6176_v33  ;;  %v2916_v23 = vmul.f32 %v2908_v57, %v6180_v34 }
 0xbd9   : > { %5243 = vmatpush1.bf16.msra.mxu1 %v5242_v16 }
 0xbda   : > { %v5246_v20 = vpack.c.bf16 %v2915_v61, %v2913_v24  ;;  %v2930_v43 = vpop.permute.xlu0 %2929  ;;  %v2924_v32 = vpop.permute.xlu1 %2923  ;;  %v5244_v45 = vpack.c.bf16 %v2916_v23, %v2914_v46  ;;  %v2716_v24 = vld [vmem:[%s8420_s12 + $0x18] sm:$0xff]  ;;  %v2723_v61 = vld [vmem:[%s8420_s12 + $0x50] sm:$0xff] }
 0xbdb   : > { %v2935_v41 = vsel %vm871_vm6, %v2922_v37, %v2930_v43  ;;  %v2939_v59 = vsel %vm871_vm6, %v2930_v43, %v2922_v37 }
 0xbdc   : > { %5245 = vmatprep.subr.bf16.mxu1 %v5244_v45  ;;  %v2945_v47 = vmul.f32 %v2935_v41, %v6209_v5  ;;  %v2946_v21 = vmul.f32 %v2939_v59, %v6213_v14  ;;  %v2715_v59 = vld [vmem:[%s8420_s12 + $0x10] sm:$0xff] }
 0xbdd   : > { %5247 = vmatpush1.bf16.msra.mxu1 %v5246_v20 }
 0xbde   : > { %v2950_v29 = vpop.permute.xlu0 %2949  ;;  %v2932_v18 = vpop.permute.xlu1 %2931  ;;  %5249 = vmatprep.subr.bf16.mxu1 %v5248_v28 }
 0xbdf   : > { %v2936_v22 = vsel %vm871_vm6, %v2924_v32, %v2932_v18  ;;  %v2940_v56 = vsel %vm871_vm6, %v2932_v18, %v2924_v32  ;;  %v2721_v18 = vld [vmem:[%s8420_s12 + $0x40] sm:$0xff] }
 0xbe0   : > { %v2947_v35 = vmul.f32 %v2936_v22, %v6209_v5  ;;  %v2948_v4 = vmul.f32 %v2940_v56, %v6213_v14 }
 0xbe1   : > { %5251 = vmatpush1.bf16.msra.mxu1 %v5250_v7  ;;  %v2724_v7 = vld [vmem:[%s8420_s12 + $0x58] sm:$0xff] }
 0xbe2   : > { %v5254_v44 = vpack.c.bf16 %v2947_v35, %v2945_v47  ;;  %v2958_v13 = vpop.permute.xlu0 %2957  ;;  %v2952_v51 = vpop.permute.xlu1 %2951  ;;  %v5252_v6 = vpack.c.bf16 %v2948_v4, %v2946_v21 }
 0xbe3   : > { %v2965_v42 = vsel %vm912_vm7, %v2950_v29, %v2958_v13  ;;  %v2969_v39 = vsel %vm912_vm7, %v2958_v13, %v2950_v29  ;;  %v2718_v29 = vld [vmem:[%s8420_s12 + $0x28] sm:$0xff] }
 0xbe4   : > { %5253 = vmatprep.subr.bf16.mxu1 %v5252_v6  ;;  %v2973_v55 = vmul.f32 %v2965_v42, %v8501_v40  ;;  %v2974_v63 = vmul.f32 %v2969_v39, %v8502_v15 }
 0xbe5   : > { %5255 = vmatpush1.bf16.msra.mxu1 %v5254_v44 }
 0xbe6   : > { %v2954_v10 = vpop.permute.xlu0 %2953  ;;  %v2960_v2 = vpop.permute.xlu1 %2959 }
 0xbe7   : > { %v2966_v38 = vsel %vm912_vm7, %v2952_v51, %v2960_v2  ;;  %v2970_v50 = vsel %vm912_vm7, %v2960_v2, %v2952_v51 }
 0xbe8   : > { %v2975_v3 = vmul.f32 %v2966_v38, %v8501_v40  ;;  %v2976_v16 = vmul.f32 %v2970_v50, %v8502_v15  ;;  %3074 = vmatmul.mubr.f32.vlgmr.msra.gmra.mrb[32].mxu1 %v2713_v25 }
 0xbe9   : > { %3079 = vmatprep.mubr.f32.mxu1 %v2717_v62 }
 0xbea   : > { %v5258_v46 = vpack.c.bf16 %v2975_v3, %v2973_v55  ;;  %v2962_v37 = vpop.permute.xlu0 %2961  ;;  %v2956_v36 = vpop.permute.xlu1 %2955  ;;  %v5256_v58 = vpack.c.bf16 %v2976_v16, %v2974_v63 }
 0xbeb   : > { %v2967_v26 = vsel %vm912_vm7, %v2954_v10, %v2962_v37  ;;  %v2971_v57 = vsel %vm912_vm7, %v2962_v37, %v2954_v10 }
 0xbec   : > { %3080 = vmatmul.mubr.f32.gmra.mrb[34].mxu1 %v2716_v24  ;;  %5257 = vmatprep.subr.bf16.mxu1 %v5256_v58  ;;  %v2977_v43 = vmul.f32 %v2967_v26, %v8501_v40  ;;  %v2978_v32 = vmul.f32 %v2971_v57, %v8502_v15  ;;  %v5655_v26 = vmov 0.0|0.0  }
 0xbed   : > { %5259 = vmatpush1.bf16.msra.mxu1 %v5258_v46  ;;  %3085 = vmatprep.mubr.f32.mxu1 %v2720_v54 }
 0xbee   : > { %v2964_v60 = vpop.permute.xlu1 %2963 }
 0xbef   : > { %v2968_v23 = vsel %vm912_vm7, %v2956_v36, %v2964_v60  ;;  %v2972_v20 = vsel %vm912_vm7, %v2964_v60, %v2956_v36 }
 0xbf0   : > { %v2979_v45 = vmul.f32 %v2968_v23, %v8501_v40  ;;  %v2980_v52 = vmul.f32 %v2972_v20, %v8502_v15  ;;  %3086 = vmatmul.mubr.f32.gmra.mrb[36].mxu1 %v2719_v1 }
 0xbf1   : > { %3091 = vmatprep.mubr.f32.mxu1 %v2723_v61 }
 0xbf2   : > { %v5262_v28 = vpack.c.bf16 %v2979_v45, %v2977_v43  ;;  %v5260_v41 = vpack.c.bf16 %v2980_v52, %v2978_v32 }
 0xbf4   : > { %3092 = vmatmul.mubr.f32.gmra.mrb[38].mxu1 %v2722_v12  ;;  %5261 = vmatprep.subr.bf16.mxu1 %v5260_v41 }
 0xbf5   : > { %5263 = vmatpush1.bf16.msra.mxu1 %v5262_v28  ;;  %3162 = vmatprep.mubr.f32.mxu1 %v8489_v27 }
 0xbf6   : > { %5280 = vmatprep.subr.bf16.mxu1 %v5655_v26 }
 0xbf8   : > { %4833 = vmatmul.mubr.msk.f32.vlgmr.msra.gmra.mrb[32].mxu1 %vm961_vm8, %v2715_v59 }
 0xbf9   : > { %3168 = vmatprep.mubr.f32.mxu1 %v8489_v27 }
 0xbfb   : > { %v2983_v22 = vpop.permute.xlu0 %2982 }
 0xbfc   : > { %4834 = vmatmul.mubr.msk.f32.gmra.mrb[34].mxu1 %vm961_vm8, %v2718_v29 }
 0xbfd   : > { %3174 = vmatprep.mubr.f32.mxu1 %v8489_v27 }
 0xbff   : > { %v2987_v47 = vpop.permute.xlu1 %2986  ;;  %v2995_v63 = vpop.permute.xlu0 %2994 }
 0xc00   : > { %4835 = vmatmul.mubr.msk.f32.gmra.mrb[36].mxu1 %vm961_vm8, %v2721_v18 }
 0xc01   : > { %3180 = vmatprep.mubr.f32.mxu1 %v8489_v27 }
 0xc03   : > { %v2991_v25 = vpop.permute.xlu1 %2990 }
 0xc04   : > { %4836 = vmatmul.mubr.msk.f32.gmra.mrb[38].mxu1 %vm961_vm8, %v2724_v7 }
 0xc05   : > { %4973 = vmatprep.mubr.msk.f32.mxu1 %vm5656_vm12, %v8489_v27  ;;  %vm3838_vm12 = vcmp.lt.s32.totalorder %v5935_v11, 46 }
 0xccb   : > { %v3164_v56 = vpop.f32.mrb[32].mxu1 }
 0xccc   : > { %v7761_v21 = vadd.f32 %v3164_v56, %v2983_v22  ;;  %v3166_v35 = vpop.f32.mrb[33].mxu1  ;;  %v3453_v56 = vld [vmem:[%s8422_s14] sm:$0x3] }
 0xccd   : > { %v7763_v4 = vadd.f32 %v3166_v35, %v2983_v22 }
 0xccf   : > { %v3170_v44 = vpop.f32.mrb[34].mxu1  ;;  %v3437_v13 = vmax.f32 %v7761_v21, %v7763_v4  ;;  %v3421_v51 = vadd.f32 %v7763_v4, %v7761_v21 }
 0xcd0   : > { %v7769_v6 = vadd.f32 %v3170_v44, %v2987_v47  ;;  %v3172_v42 = vpop.f32.mrb[35].mxu1 }
 0xcd1   : > { %v7771_v39 = vadd.f32 %v3172_v42, %v2987_v47  ;;  %3438 = vmax.xlane.f32.xlu0 %v3437_v13  ;;  %3422 = vadd.xlane.f32.xlu1 %v3421_v51  ;;  %v3528_v47 = vld [vmem:[%s8423_s15] sm:$0xff]  ;;  %v3529_v51 = vld [vmem:[%s8423_s15 + $0x8] sm:$0xff]  ;;  %v3530_v42 = vld [vmem:[%s8423_s15 + $0x10] sm:$0xff] }
 0xcd3   : > { %v3176_v10 = vpop.f32.mrb[36].mxu1  ;;  %v3424_v2 = vadd.f32 %v7771_v39, %v7769_v6  ;;  %v3440_v62 = vmax.f32 %v7769_v6, %v7771_v39 }
 0xcd4   : > { %v7777_v38 = vadd.f32 %v3176_v10, %v2991_v25  ;;  %v3178_v50 = vpop.f32.mrb[37].mxu1 }
 0xcd5   : > { %v7779_v55 = vadd.f32 %v3178_v50, %v2991_v25  ;;  %3425 = vadd.xlane.f32.xlu0 %v3424_v2  ;;  %3441 = vmax.xlane.f32.xlu1 %v3440_v62  ;;  %v3531_v25 = vld [vmem:[%s8423_s15 + $0x18] sm:$0xff] }
 0xcd7   : > { %v3182_v3 = vpop.f32.mrb[38].mxu1  ;;  %v3427_v16 = vadd.f32 %v7779_v55, %v7777_v38  ;;  %v3443_v36 = vmax.f32 %v7777_v38, %v7779_v55 }
 0xcd8   : > { %v7783_v24 = vadd.f32 %v3182_v3, %v2995_v63  ;;  %v3184_v46 = vpop.f32.mrb[39].mxu1 }
 0xcd9   : > { %v7785_v37 = vadd.f32 %v3184_v46, %v2995_v63  ;;  %3428 = vadd.xlane.f32.xlu0 %v3427_v16 }
 0xcdb   : > { %v3430_v58 = vadd.f32 %v7785_v37, %v7783_v24  ;;  %v3446_v54 = vmax.f32 %v7783_v24, %v7785_v37 }
 0xcdd   : > { %3444 = vmax.xlane.f32.xlu0 %v3443_v36  ;;  %3431 = vadd.xlane.f32.xlu1 %v3430_v58 }
 0xce1   : > { %3447 = vmax.xlane.f32.xlu1 %v3446_v54 }
 0xd5e   : > { %v3439_v57 = vpop.xlane.xlu0 %3438  ;;  %v3423_v1 = vpop.xlane.xlu1 %3422 }
 0xd5f   : > { %v3433_v60 = vmul.f32 0.00390625, %v3423_v1 }
 0xd61   : > { %v3449_v43 = vsel %vm1874_vm10, %v3433_v60, %v3439_v57 }
 0xd62   : > { %v3426_v61 = vpop.xlane.xlu0 %3425  ;;  %v3442_v20 = vpop.xlane.xlu1 %3441 }
 0xd63   : > { %v3434_v23 = vmul.f32 0.00390625, %v3426_v61 }
 0xd65   : > { %v3450_v32 = vsel %vm1874_vm10, %v3434_v23, %v3442_v20 }
 0xd66   : > { %v5281_v45 = vpack.c.bf16 %v3450_v32, %v3449_v43  ;;  %v3429_v52 = vpop.xlane.xlu0 %3428 }
 0xd67   : > { %v3435_v41 = vmul.f32 0.00390625, %v3429_v52 }
 0xd68   : > { %5282 = vmatpush3.bf16.msra.mxu1 %v5281_v45 }
 0xd69   : > { %5283 = vmatprep.subr.bf16.mxu1 %v5655_v26 }
 0xd6a   : > { %v3432_v12 = vpop.xlane.xlu1 %3431  ;;  %v3445_v28 = vpop.xlane.xlu0 %3444 }
 0xd6b   : > { %v3436_v59 = vmul.f32 0.00390625, %v3432_v12  ;;  %v3451_v18 = vsel %vm1874_vm10, %v3435_v41, %v3445_v28 }
 0xd6e   : > { %v3448_v29 = vpop.xlane.xlu1 %3447 }
 0xd6f   : > { %v3452_v7 = vsel %vm1874_vm10, %v3436_v59, %v3448_v29  ;;  %vm3804_vm10 = vcmp.lt.s32.totalorder %v5935_v11, 48 }
 0xd70   : > { %v5284_v22 = vpack.c.bf16 %v3452_v7, %v3451_v18  ;;  %v3192_v7 = vld [vmem:[%s8418_s10 + $0x8] sm:$0xff] }
 0xd71   : > { %4838 = vmatmul.mubr.msk.f32.gmra.mrb[26].mxu0 %vm961_vm8, %v3192_v7 }
 0xd72   : > { %5285 = vmatpush3.bf16.msra.mxu1 %v5284_v22  ;;  %3283 = vmatprep.mubr.f32.mxu0 %v8489_v27  ;;  %v3193_v22 = vld [vmem:[%s8418_s10 + $0x10] sm:$0xff] }
 0xd75   : > { %4974 = vmatmul.mubr.msk.f32.vlgmr.msra.gmra.mrb[40].mxu1 %vm961_vm8, %v3453_v56  ;;  %4839 = vmatmul.mubr.msk.f32.gmra.mrb[28].mxu0 %vm961_vm8, %v3193_v22  ;;  %v3194_v56 = vld [vmem:[%s8418_s10 + $0x18] sm:$0xff] }
 0xd76   : > { %4978 = vmatprep.mubr.msk.f32.mxu1 %vm1879_vm11, %v3528_v47  ;;  %3289 = vmatprep.mubr.f32.mxu0 %v8489_v27  ;;  %v3187_v47 = vld [vmem:[%s8417_s9] sm:$0xff] }
 0xd79   : > { %4840 = vmatmul.mubr.msk.f32.gmra.mrb[30].mxu0 %vm961_vm8, %v3194_v56 }
 0xd7a   : > { %3372 = vmatprep.mubr.f32.mxu0 %v8489_v27 }
 0xd7d   : > { %4841 = vmatmul.mubr.msk.f32.vlgmr.msra.gmra.mrb[24].mxu0 %vm961_vm8, %v3187_v47 }
 0xd7e   : > { %3378 = vmatprep.mubr.f32.mxu0 %v8489_v27 }
 0xe48   : > { %v3523_v35 = vpop.f32.mrb[40].mxu1 }
 0xe49   : > { %v3527_v44 = vmax.f32 %v3523_v35, 0.0  ;;  %v4975_v13 = vpop.f32.mrb[41].mxu1 }
 0xe4a   : > { %v3188_v13 = vld [vmem:[%s8417_s9 + $0x8] sm:$0xff] }
 0xe4b   : > { %4976 = vmatprep.subr.msk.mxu1 %vm3544_vm13, %v3527_v44  ;;  %4842 = vmatmul.mubr.msk.f32.gmra.mrb[26].mxu0 %vm961_vm8, %v3188_v13 }
 0xe4c   : > { %4977 = vmatpush3.msk.msra.mxu1 %vm3544_vm13, %v3527_v44  ;;  %3384 = vmatprep.mubr.f32.mxu0 %v8489_v27 }
 0xe4d   : > { %4979 = vmatmul.mubr.msk.f32.vlgmr.msra.gmra.mrb[42].mxu1 %vm1879_vm11, %v3529_v51 }
 0xe4e   : > { %4981 = vmatprep.mubr.msk.f32.mxu1 %vm1879_vm11, %v3530_v42 }
 0xe51   : > { %4982 = vmatmul.mubr.msk.f32.gmra.mrb[44].mxu1 %vm1879_vm11, %v3531_v25  ;;  %vm3821_vm11 = vcmp.lt.s32.totalorder %v5935_v11, 47 }
 0xf20   : > { %v4980_v10 = vpop.f32.mrb[42].mxu1 }
 0xf21   : > { %3639 = vrot.lane.b32.xlu1 %v4980_v10, %s8495_s20  ;;  %v3614_v2 = vpop.f32.mrb[43].mxu1 }
 0xf22   : > { %3637 = vrot.lane.b32.xlu0 %v3614_v2, %s8495_s20 }
 0xf24   : > { %v4983_v62 = vpop.f32.mrb[44].mxu1 }
 0xf25   : > { %v3624_v50 = vpop.f32.mrb[45].mxu1 }
 0xf26   : > { %3643 = vrot.lane.b32.xlu0 %v4983_v62, %s8495_s20  ;;  %3641 = vrot.lane.b32.xlu1 %v3624_v50, %s8495_s20 }
 0xf93   : > { %v3640_v63 = vpop.permute.xlu1 %3639 }
 0xf94   : > { %v3650_v3 = vadd.f32 %v4980_v10, %v3640_v63  ;;  %v3638_v16 = vpop.permute.xlu0 %3637 }
 0xf95   : > { %v3649_v46 = vadd.f32 %v3638_v16, %v3614_v2 }
 0xf96   : > { %v4852_v36 = vmul.f32 -1.442695, %v3650_v3 }
 0xf97   : > { %v4851_v58 = vmul.f32 -1.442695, %v3649_v46 }
 0xf98   : > { %5596 = vpow2.f32 %v4852_v36  ;;  %v3644_v54 = vpop.permute.xlu0 %3643  ;;  %v3642_v26 = vpop.permute.xlu1 %3641 }
 0xf99   : > { %5598 = vpow2.f32 %v4851_v58  ;;  %v3652_v57 = vadd.f32 %v4983_v62, %v3644_v54  ;;  %v3651_v1 = vadd.f32 %v3642_v26, %v3624_v50 }
 0xf9b   : > { %v4854_v60 = vmul.f32 -1.442695, %v3652_v57  ;;  %v4853_v61 = vmul.f32 -1.442695, %v3651_v1 }
 0xf9d   : > { %5600 = vpow2.f32 %v4854_v60 }
 0xf9e   : > { %5602 = vpow2.f32 %v4853_v61 }
 0xfa2   : > { %v5597_v23 = vpop.eup %5596 }
 0xfa3   : > { %v5599_v20 = vpop.eup %5598  ;;  %v3666_v43 = vadd.f32 1.0, %v5597_v23 }
 0xfa4   : > { %v3665_v32 = vadd.f32 1.0, %v5599_v20 }
 0xfa5   : > { %5604 = vrcp.f32 %v3666_v43 }
 0xfa6   : > { %5606 = vrcp.f32 %v3665_v32 }
 0xfa7   : > { %v5601_v45 = vpop.eup %5600 }
 0xfa8   : > { %v5603_v52 = vpop.eup %5602  ;;  %v3668_v12 = vadd.f32 1.0, %v5601_v45 }
 0xfa9   : > { %v3667_v28 = vadd.f32 1.0, %v5603_v52 }
 0xfaa   : > { %5608 = vrcp.f32 %v3668_v12 }
 0xfab   : > { %5610 = vrcp.f32 %v3667_v28 }
 0xfaf   : > { %v5605_v41 = vpop.eup %5604 }
 0xfb0   : > { %v5607_v59 = vpop.eup %5606  ;;  %3684 = vperm.xlu0 %5522, %v5605_v41  }
 0xfb1   : > { %3679 = vperm.xlu1 %5523, %v5607_v59  }
 0xfb4   : > { %v5609_v29 = vpop.eup %5608 }
 0xfb5   : > { %3694 = vperm.xlu1 %5523, %v5609_v29   ;;  %v5611_v18 = vpop.eup %5610 }
 0xfb9   : > { %3689 = vperm.xlu1 %5523, %v5611_v18  }
0x102f   : > { %v3685_v44 = vpop.permute.xlu0 %3684 }
0x1030   : > { %v3680_v35 = vpop.permute.xlu1 %3679  ;;  %v7849_v42 = vmul.f32 %v7769_v6, %v3685_v44  ;;  %v7852_v25 = vmul.f32 %v7771_v39, %v3685_v44  ;;  %v3189_v6 = vld [vmem:[%s8417_s9 + $0x10] sm:$0xff] }
0x1031   : > { %v7855_v10 = vmul.f32 %v7761_v21, %v3680_v35  ;;  %v7858_v2 = vmul.f32 %v7763_v4, %v3680_v35  ;;  %4843 = vmatmul.mubr.msk.f32.gmra.mrb[28].mxu0 %vm961_vm8, %v3189_v6 }
0x1032   : > { %3390 = vmatprep.mubr.f32.mxu0 %v8489_v27  ;;  %v3190_v27 = vld [vmem:[%s8417_s9 + $0x18] sm:$0xff] }
0x1033   : > { %v3705_v21 = vadd.f32 %v7849_v42, %v7855_v10  ;;  %v3714_v4 = vadd.f32 %v7852_v25, %v7858_v2 }
0x1034   : > { %v3695_v51 = vpop.permute.xlu1 %3694 }
0x1035   : > { %v7862_v62 = vmul.f32 %v7783_v24, %v3695_v51  ;;  %v7865_v50 = vmul.f32 %v7785_v37, %v3695_v51  ;;  %4844 = vmatmul.mubr.msk.f32.gmra.mrb[30].mxu0 %vm961_vm8, %v3190_v27  ;;  %v8512_v27 = vld [vmem:[#allocation3_spill] sm:$0xff]  ;;  %vm3770_vm8 = vcmp.lt.s32.totalorder %v5935_v11, 50 }
0x1037   : > { %v3727_v37 = vmax.f32 %v7849_v42, %v7862_v62  ;;  %v3736_v3 = vmax.f32 %v7852_v25, %v7865_v50 }
0x1038   : > { %v3690_v39 = vpop.permute.xlu1 %3689 }
0x1039   : > { %v7876_v63 = vmul.f32 %v7777_v38, %v3690_v39  ;;  %v7879_v24 = vmul.f32 %v7779_v55, %v3690_v39 }
0x103b   : > { %v3706_v16 = vadd.f32 %v3705_v21, %v7876_v63  ;;  %v3715_v46 = vadd.f32 %v3714_v4, %v7879_v24  ;;  %v3726_v36 = vmax.f32 %v7855_v10, %v7876_v63  ;;  %v3735_v38 = vmax.f32 %v7858_v2, %v7879_v24 }
0x103d   : > { %v3707_v55 = vadd.f32 %v3706_v16, %v7862_v62  ;;  %v3716_v58 = vadd.f32 %v3715_v46, %v7865_v50  ;;  %v3728_v54 = vmax.f32 %v3726_v36, %v3727_v37  ;;  %v3737_v26 = vmax.f32 %v3735_v38, %v3736_v3  ;;  %v7981_v16 = vld [vmem:[%s8413_s5] sm:$0xff]  ;;  %v7986_v46 = vld [vmem:[%s8413_s5 + $0x8] sm:$0xff] }
0x103f   : > { %v3708_v57 = vrot.slane %v3707_v55, 4  ;;  %v3717_v1 = vrot.slane %v3716_v58, 4  ;;  %v3729_v60 = vrot.slane %v3728_v54, 4  ;;  %v3738_v61 = vrot.slane %v3737_v26, 4 }
0x1041   : > { %v3709_v23 = vadd.f32 %v3708_v57, %v3707_v55  ;;  %v3718_v20 = vadd.f32 %v3717_v1, %v3716_v58  ;;  %v3730_v43 = vmax.f32 %v3728_v54, %v3729_v60  ;;  %v3739_v32 = vmax.f32 %v3737_v26, %v3738_v61  ;;  %v8513_v26 = vld [vmem:[#allocation4_spill] sm:$0xff] }
0x1042   : > { %v3759_v55 = vrot.slane %v7981_v16, %v8512_v27  ;;  %v3763_v58 = vrot.slane %v7986_v46, %v8512_v27  ;;  %v3776_v57 = vrot.slane %v7981_v16, %v8513_v26  ;;  %v3780_v1 = vrot.slane %v7986_v46, %v8513_v26 }
0x1043   : > { %v3710_v45 = vrot.slane %v3709_v23, 2  ;;  %v3719_v52 = vrot.slane %v3718_v20, 2  ;;  %v3731_v12 = vrot.slane %v3730_v43, 2  ;;  %v3740_v28 = vrot.slane %v3739_v32, 2 }
0x1045   : > { %v3711_v41 = vadd.f32 %v3710_v45, %v3709_v23  ;;  %v3720_v59 = vadd.f32 %v3719_v52, %v3718_v20  ;;  %v3732_v29 = vmax.f32 %v3730_v43, %v3731_v12  ;;  %v3741_v18 = vmax.f32 %v3739_v32, %v3740_v28  ;;  %v8005_v20 = vld [vmem:[%s8424_s16] sm:$0xf] }
0x1046   : > { %v4502_v52 = vrot.slane %v8005_v20, %v8513_v26 }
0x1047   : > { %v3712_v7 = vrot.slane %v3711_v41, 1  ;;  %v3721_v22 = vrot.slane %v3720_v59, 1  ;;  %v3733_v56 = vrot.slane %v3732_v29, 1  ;;  %v3742_v47 = vrot.slane %v3741_v18, 1 }
0x1048   : > { %4581 = vmatprep.mubr.f32.mxu1 %v4502_v52 }
0x1049   : > { %v3713_v35 = vadd.f32 %v3712_v7, %v3711_v41  ;;  %v3722_v44 = vadd.f32 %v3721_v22, %v3720_v59  ;;  %v3734_v6 = vmax.f32 %v3732_v29, %v3733_v56  ;;  %v3743_v39 = vmax.f32 %v3741_v18, %v3742_v47  ;;  %v8514_v59 = vld [vmem:[#allocation2_spill] sm:$0xff]  ;;  %v8515_v47 = vld [vmem:[#allocation5_spill] sm:$0xff] }
0x104a   : > { %v8014_v29 = vsub.s32 3, %v8514_v59 }
0x104b   : > { %v3724_v13 = vmul.f32 0.03125, %v3713_v35  ;;  %v3725_v51 = vmul.f32 0.03125, %v3722_v44  ;;  %v3793_v35 = vrot.slane %v7981_v16, %v8515_v47  ;;  %v3797_v44 = vrot.slane %v7986_v46, %v8515_v47 }
0x104d   : > { %v7898_v21 = vsel %vm3744_vm14, %v3724_v13, %v3734_v6  ;;  %v7900_v4 = vsel %vm3744_vm14, %v3725_v51, %v3743_v39  ;;  %v3810_v51 = vrot.slane %v7981_v16, %v8014_v29  ;;  %v3814_v6 = vrot.slane %v7986_v46, %v8014_v29 }
0x104e   : > { %v7904_v37 = vsel %vm3544_vm13, %v7898_v21, 0.0  ;;  %v7908_v3 = vsel %vm3544_vm13, %v7900_v4, 0.0  ;;  %vm3855_vm14 = vcmp.lt.s32.totalorder %v5935_v11, 45 }
0x104f   : > { %3751 = vrot.lane.b32.xlu1 %v7908_v3, %s5657_s22  ;;  %3749 = vrot.lane.b32.xlu0 %v7904_v37, %s5657_s22  ;;  %s5663_s22 = smov 45  }
0x1053   : > { %3768 = vrot.lane.b32.xlu1 %v7908_v3, %s5658_s18  ;;  %3766 = vrot.lane.b32.xlu0 %v7904_v37, %s5658_s18  ;;  %s5664_s18 = smov 35  }
0x1057   : > { %3785 = vrot.lane.b32.xlu1 %v7908_v3, %s5659_s0  ;;  %3783 = vrot.lane.b32.xlu0 %v7904_v37, %s5659_s0  ;;  %s5665_s0 = smov 34  }
0x105b   : > { %3802 = vrot.lane.b32.xlu1 %v7908_v3, %s5660_s21  ;;  %3800 = vrot.lane.b32.xlu0 %v7904_v37, %s5660_s21  ;;  %s5666_s21 = smov 33  }
0x105f   : > { %3819 = vrot.lane.b32.xlu1 %v7908_v3, %s5661_s30  ;;  %3817 = vrot.lane.b32.xlu0 %v7904_v37, %s5661_s30  ;;  %s5667_s30 = smov 32  }
0x1063   : > { %3836 = vrot.lane.b32.xlu1 %v7908_v3, %s5662_s1  ;;  %3834 = vrot.lane.b32.xlu0 %v7904_v37, %s5662_s1  ;;  %s5668_s1 = smov 31  }
0x1067   : > { %3853 = vrot.lane.b32.xlu1 %v7908_v3, %s5663_s22  ;;  %3851 = vrot.lane.b32.xlu0 %v7904_v37, %s5663_s22  ;;  %s5669_s22 = smov 30  }
0x106b   : > { %3870 = vrot.lane.b32.xlu1 %v7908_v3, %s5664_s18  ;;  %3868 = vrot.lane.b32.xlu0 %v7904_v37, %s5664_s18  ;;  %s5670_s18 = smov 29  }
0x106f   : > { %3887 = vrot.lane.b32.xlu1 %v7908_v3, %s5665_s0  ;;  %3885 = vrot.lane.b32.xlu0 %v7904_v37, %s5665_s0  ;;  %s5671_s0 = smov 19  }
0x1073   : > { %3904 = vrot.lane.b32.xlu1 %v7908_v3, %s5666_s21  ;;  %3902 = vrot.lane.b32.xlu0 %v7904_v37, %s5666_s21  ;;  %s5672_s21 = smov 18  }
0x1077   : > { %3921 = vrot.lane.b32.xlu1 %v7908_v3, %s5667_s30  ;;  %3919 = vrot.lane.b32.xlu0 %v7904_v37, %s5667_s30  ;;  %s8511_s30 = smov 17  }
0x107b   : > { %3938 = vrot.lane.b32.xlu1 %v7908_v3, %s5668_s1  ;;  %3936 = vrot.lane.b32.xlu0 %v7904_v37, %s5668_s1  ;;  %s5673_s1 = smov 14  }
0x107f   : > { %3955 = vrot.lane.b32.xlu1 %v7908_v3, %s5669_s22  ;;  %3953 = vrot.lane.b32.xlu0 %v7904_v37, %s5669_s22  ;;  %s5674_s22 = smov 13  }
0x1083   : > { %3972 = vrot.lane.b32.xlu1 %v7908_v3, %s5670_s18  ;;  %3970 = vrot.lane.b32.xlu0 %v7904_v37, %s5670_s18  ;;  %s5675_s18 = smov 3  }
0x1087   : > { %3989 = vrot.lane.b32.xlu1 %v7908_v3, %s5671_s0  ;;  %3987 = vrot.lane.b32.xlu0 %v7904_v37, %s5671_s0  ;;  %s5678_s0 = smov 125  }
0x108b   : > { %4006 = vrot.lane.b32.xlu1 %v7908_v3, %s5672_s21  ;;  %4004 = vrot.lane.b32.xlu0 %v7904_v37, %s5672_s21  ;;  %s5679_s21 = smov 115  }
0x108f   : > { %4023 = vrot.lane.b32.xlu1 %v7908_v3, %s8511_s30  ;;  %4021 = vrot.lane.b32.xlu0 %v7904_v37, %s8511_s30 }
0x1093   : > { %4031 = vrot.lane.b32.xlu1 %v7908_v3, %s8492_s23  ;;  %4029 = vrot.lane.b32.xlu0 %v7904_v37, %s8492_s23  ;;  %s5676_s23 = smov 2  }
0x1097   : > { %4039 = vrot.lane.b32.xlu1 %v7908_v3, %s8493_s25  ;;  %4037 = vrot.lane.b32.xlu0 %v7904_v37, %s8493_s25  ;;  %s5677_s25 = smov 126  }
0x109b   : > { %4047 = vrot.lane.b32.xlu1 %v7908_v3, %s5673_s1  ;;  %4045 = vrot.lane.b32.xlu0 %v7904_v37, %s5673_s1  ;;  %s5686_s1 = smov 96  }
0x109f   : > { %4064 = vrot.lane.b32.xlu1 %v7908_v3, %s5674_s22  ;;  %4062 = vrot.lane.b32.xlu0 %v7904_v37, %s5674_s22  ;;  %s5687_s22 = smov 95  }
0x10a3   : > { %4081 = vrot.lane.b32.xlu1 %v7908_v3, %s5675_s18  ;;  %4079 = vrot.lane.b32.xlu0 %v7904_v37, %s5675_s18  ;;  %s5688_s18 = smov 94  }
0x10a7   : > { %4098 = vrot.lane.b32.xlu1 %v7908_v3, %s5676_s23  ;;  %4096 = vrot.lane.b32.xlu0 %v7904_v37, %s5676_s23  ;;  %s5689_s23 = smov 93  }
0x10ab   : > { %4115 = vrot.lane.b32.xlu1 %v7908_v3, %s8494_s28  ;;  %4113 = vrot.lane.b32.xlu0 %v7904_v37, %s8494_s28  ;;  %s5680_s28 = smov 114  }
0x10af   : > { %4123 = vrot.lane.b32.xlu1 %v7908_v3, %s8495_s20  ;;  %4121 = vrot.lane.b32.xlu0 %v7904_v37, %s8495_s20 }
0x10b3   : > { %4131 = vrot.lane.b32.xlu1 %v7908_v3, %s5677_s25  ;;  %4129 = vrot.lane.b32.xlu0 %v7904_v37, %s5677_s25  ;;  %s5684_s25 = smov 98  }
0x10b7   : > { %4148 = vrot.lane.b32.xlu1 %v7908_v3, %s5678_s0  ;;  %4146 = vrot.lane.b32.xlu0 %v7904_v37, %s5678_s0  ;;  %s5685_s0 = smov 97  }
0x10bb   : > { %4165 = vrot.lane.b32.xlu1 %v7908_v3, %s5679_s21  ;;  %4163 = vrot.lane.b32.xlu0 %v7904_v37, %s5679_s21  ;;  %s5695_s21 = smov 78  }
0x10bf   : > { %4182 = vrot.lane.b32.xlu1 %v7908_v3, %s5680_s28  ;;  %4180 = vrot.lane.b32.xlu0 %v7904_v37, %s5680_s28  ;;  %s5696_s28 = smov 77  }
0x10c1   : > { %v3752_v36 = vpop.permute.xlu1 %3751  ;;  %v3750_v38 = vpop.permute.xlu0 %3749 }
0x10c2   : > { %v3755_v54 = vsel %vm3753_vm15, %v3752_v36, %v3750_v38  ;;  %v3754_v60 = vsel %vm3753_vm15, %v3750_v38, %v3752_v36  ;;  %vm3872_vm15 = vcmp.lt.s32.totalorder %v5935_v11, 35 }
0x10c3   : > { %4199 = vrot.lane.b32.xlu1 %v7908_v3, %s8496_s29  ;;  %4197 = vrot.lane.b32.xlu0 %v7904_v37, %s8496_s29  ;;  %v3764_v43 = vmul.f32 %v3759_v55, %v3755_v54  ;;  %v3765_v12 = vmul.f32 %v3763_v58, %v3754_v60  ;;  %s5681_s29 = smov 110  }
0x10c5   : > { %v3769_v61 = vpop.permute.xlu1 %3768  ;;  %v3767_v23 = vpop.permute.xlu0 %3766 }
0x10c6   : > { %v3771_v32 = vsel %vm3770_vm8, %v3767_v23, %v3769_v61  ;;  %v3772_v45 = vsel %vm3770_vm8, %v3769_v61, %v3767_v23  ;;  %v8036_v23 = vsub.s32 5, %v8514_v59  ;;  %vm3889_vm8 = vcmp.lt.s32.totalorder %v5935_v11, 34 }
0x10c7   : > { %v3781_v28 = vmul.f32 %v3776_v57, %v3772_v45  ;;  %v3782_v41 = vmul.f32 %v3780_v1, %v3771_v32  ;;  %4207 = vrot.lane.b32.xlu1 %v7908_v3, %s8507_s27  ;;  %4205 = vrot.lane.b32.xlu0 %v7904_v37, %s8507_s27  ;;  %v8031_v57 = vsub.s32 4, %v8514_v59  ;;  %s5683_s27 = smov 99  }
0x10c8   : > { %v3844_v59 = vrot.slane %v7981_v16, %v8036_v23 }
0x10c9   : > { %v5288_v18 = vpack.c.bf16 %v3781_v28, %v3764_v43  ;;  %v3786_v7 = vpop.permute.xlu1 %3785  ;;  %v3784_v22 = vpop.permute.xlu0 %3783  ;;  %v5286_v56 = vpack.c.bf16 %v3782_v41, %v3765_v12  ;;  %v3827_v12 = vrot.slane %v7981_v16, %v8031_v57  ;;  %v3831_v28 = vrot.slane %v7986_v46, %v8031_v57 }
0x10ca   : > { %v3789_v13 = vsel %vm3787_vm9, %v3786_v7, %v3784_v22  ;;  %v3788_v39 = vsel %vm3787_vm9, %v3784_v22, %v3786_v7  ;;  %vm3906_vm9 = vcmp.lt.s32.totalorder %v5935_v11, 33 }
0x10cb   : > { %4215 = vrot.lane.b32.xlu1 %v7908_v3, %s8497_s19  ;;  %4213 = vrot.lane.b32.xlu0 %v7904_v37, %s8497_s19  ;;  %v3798_v55 = vmul.f32 %v3793_v35, %v3789_v13  ;;  %v3799_v1 = vmul.f32 %v3797_v44, %v3788_v39  ;;  %s5682_s19 = smov 109  }
0x10cc   : > { %5287 = vmatprep.subr.bf16.mxu1 %v5286_v56 }
0x10cd   : > { %5289 = vmatpush1.bf16.msra.mxu1 %v5288_v18  ;;  %v3803_v36 = vpop.permute.xlu1 %3802  ;;  %v3801_v38 = vpop.permute.xlu0 %3800  ;;  %v3848_v18 = vrot.slane %v7986_v46, %v8036_v23 }
0x10ce   : > { %v3805_v58 = vsel %vm3804_vm10, %v3801_v38, %v3803_v36  ;;  %v3806_v54 = vsel %vm3804_vm10, %v3803_v36, %v3801_v38  ;;  %vm3923_vm10 = vcmp.lt.s32.totalorder %v5935_v11, 32 }
0x10cf   : > { %v3815_v60 = vmul.f32 %v3810_v51, %v3806_v54  ;;  %v3816_v61 = vmul.f32 %v3814_v6, %v3805_v58  ;;  %4223 = vrot.lane.b32.xlu1 %v7908_v3, %s5681_s29  ;;  %4221 = vrot.lane.b32.xlu0 %v7904_v37, %s5681_s29  ;;  %v8516_v54 = vld [vmem:[#allocation11_spill] sm:$0xff]  ;;  %s5690_s29 = smov 83  }
0x10d1   : > { %v5292_v43 = vpack.c.bf16 %v3815_v60, %v3798_v55  ;;  %v3820_v32 = vpop.permute.xlu1 %3819  ;;  %v3818_v45 = vpop.permute.xlu0 %3817  ;;  %v5290_v52 = vpack.c.bf16 %v3816_v61, %v3799_v1  ;;  %v3861_v1 = vrot.slane %v7981_v16, %v8516_v54  ;;  %v3865_v60 = vrot.slane %v7986_v46, %v8516_v54 }
0x10d2   : > { %v3823_v41 = vsel %vm3821_vm11, %v3820_v32, %v3818_v45  ;;  %v3822_v7 = vsel %vm3821_vm11, %v3818_v45, %v3820_v32  ;;  %vm3940_vm11 = vcmp.lt.s32.totalorder %v5935_v11, 31 }
0x10d3   : > { %4240 = vrot.lane.b32.xlu1 %v7908_v3, %s5682_s19  ;;  %4238 = vrot.lane.b32.xlu0 %v7904_v37, %s5682_s19  ;;  %v3832_v35 = vmul.f32 %v3827_v12, %v3823_v41  ;;  %v3833_v51 = vmul.f32 %v3831_v28, %v3822_v7  ;;  %s5691_s19 = smov 82  }
0x10d4   : > { %5291 = vmatprep.subr.bf16.mxu1 %v5290_v52 }
0x10d5   : > { %5293 = vmatpush1.bf16.msra.mxu1 %v5292_v43  ;;  %v3837_v22 = vpop.permute.xlu1 %3836  ;;  %v3835_v56 = vpop.permute.xlu0 %3834  ;;  %v8517_v43 = vld [vmem:[#allocation6_spill] sm:$0xff] }
0x10d6   : > { %v3839_v44 = vsel %vm3838_vm12, %v3835_v56, %v3837_v22  ;;  %v3840_v13 = vsel %vm3838_vm12, %v3837_v22, %v3835_v56  ;;  %v3878_v32 = vrot.slane %v7981_v16, %v8517_v43  ;;  %v3882_v45 = vrot.slane %v7986_v46, %v8517_v43  ;;  %v8069_v16 = vld [vmem:[%s8413_s5 + $0x10] sm:$0xff]  ;;  %v8074_v46 = vld [vmem:[%s8413_s5 + $0x18] sm:$0xff] }
0x10d7   : > { %v3849_v6 = vmul.f32 %v3844_v59, %v3840_v13  ;;  %v3850_v39 = vmul.f32 %v3848_v18, %v3839_v44  ;;  %4257 = vrot.lane.b32.xlu1 %v7908_v3, %s5683_s27  ;;  %4255 = vrot.lane.b32.xlu0 %v7904_v37, %s5683_s27  ;;  %vm3957_vm12 = vcmp.lt.s32.totalorder %v5935_v11, 30  ;;  %s5692_s27 = smov 81  }
0x10d9   : > { %v5296_v36 = vpack.c.bf16 %v3849_v6, %v3832_v35  ;;  %v3854_v38 = vpop.permute.xlu1 %3853  ;;  %v3852_v55 = vpop.permute.xlu0 %3851  ;;  %v5294_v58 = vpack.c.bf16 %v3850_v39, %v3833_v51  ;;  %v3895_v6 = vrot.slane %v8069_v16, %v8512_v27  ;;  %v3899_v39 = vrot.slane %v8074_v46, %v8512_v27 }
0x10da   : > { %v3857_v61 = vsel %vm3855_vm14, %v3854_v38, %v3852_v55  ;;  %v3856_v52 = vsel %vm3855_vm14, %v3852_v55, %v3854_v38  ;;  %v3912_v38 = vrot.slane %v8069_v16, %v8513_v26  ;;  %v3916_v55 = vrot.slane %v8074_v46, %v8513_v26 }
0x10db   : > { %4274 = vrot.lane.b32.xlu1 %v7908_v3, %s5684_s25  ;;  %4272 = vrot.lane.b32.xlu0 %v7904_v37, %s5684_s25  ;;  %v3866_v41 = vmul.f32 %v3861_v1, %v3857_v61  ;;  %v3867_v7 = vmul.f32 %v3865_v60, %v3856_v52  ;;  %vm3974_vm14 = vcmp.lt.s32.totalorder %v5935_v11, 29  ;;  %s5693_s25 = smov 80  }
0x10dc   : > { %5295 = vmatprep.subr.bf16.mxu1 %v5294_v58 }
0x10dd   : > { %5297 = vmatpush1.bf16.msra.mxu1 %v5296_v36  ;;  %v3871_v12 = vpop.permute.xlu1 %3870  ;;  %v3869_v28 = vpop.permute.xlu0 %3868 }
0x10de   : > { %v3873_v59 = vsel %vm3872_vm15, %v3869_v28, %v3871_v12  ;;  %v3874_v18 = vsel %vm3872_vm15, %v3871_v12, %v3869_v28  ;;  %vm3991_vm15 = vcmp.lt.s32.totalorder %v5935_v11, 19 }
0x10df   : > { %v3883_v22 = vmul.f32 %v3878_v32, %v3874_v18  ;;  %v3884_v56 = vmul.f32 %v3882_v45, %v3873_v59  ;;  %4291 = vrot.lane.b32.xlu1 %v7908_v3, %s5685_s0  ;;  %4289 = vrot.lane.b32.xlu0 %v7904_v37, %s5685_s0  ;;  %s5694_s0 = smov 79  }
0x10e1   : > { %v5300_v35 = vpack.c.bf16 %v3883_v22, %v3866_v41  ;;  %v3888_v44 = vpop.permute.xlu1 %3887  ;;  %v3886_v13 = vpop.permute.xlu0 %3885  ;;  %v5298_v51 = vpack.c.bf16 %v3884_v56, %v3867_v7  ;;  %v3929_v22 = vrot.slane %v8069_v16, %v8515_v47  ;;  %v3933_v56 = vrot.slane %v8074_v46, %v8515_v47 }
0x10e2   : > { %v3891_v36 = vsel %vm3889_vm8, %v3888_v44, %v3886_v13  ;;  %v3890_v58 = vsel %vm3889_vm8, %v3886_v13, %v3888_v44  ;;  %v3946_v44 = vrot.slane %v8069_v16, %v8014_v29  ;;  %v3950_v13 = vrot.slane %v8074_v46, %v8014_v29 }
0x10e3   : > { %4308 = vrot.lane.b32.xlu1 %v7908_v3, %s5686_s1  ;;  %4306 = vrot.lane.b32.xlu0 %v7904_v37, %s5686_s1  ;;  %v3900_v61 = vmul.f32 %v3895_v6, %v3891_v36  ;;  %v3901_v52 = vmul.f32 %v3899_v39, %v3890_v58  ;;  %vm4008_vm8 = vcmp.lt.s32.totalorder %v5935_v11, 18 }
0x10e4   : > { %5299 = vmatprep.subr.bf16.mxu1 %v5298_v51 }
0x10e5   : > { %5301 = vmatpush1.bf16.msra.mxu1 %v5300_v35  ;;  %v3905_v1 = vpop.permute.xlu1 %3904  ;;  %v3903_v60 = vpop.permute.xlu0 %3902 }
0x10e6   : > { %v3907_v32 = vsel %vm3906_vm9, %v3903_v60, %v3905_v1  ;;  %v3908_v45 = vsel %vm3906_vm9, %v3905_v1, %v3903_v60  ;;  %vm4100_vm9 = vcmp.lt.s32.totalorder %v5935_v11, 2 }
0x10e7   : > { %v3917_v12 = vmul.f32 %v3912_v38, %v3908_v45  ;;  %v3918_v28 = vmul.f32 %v3916_v55, %v3907_v32  ;;  %4325 = vrot.lane.b32.xlu1 %v7908_v3, %s5687_s22  ;;  %4323 = vrot.lane.b32.xlu0 %v7904_v37, %s5687_s22 }
0x10e9   : > { %v5304_v41 = vpack.c.bf16 %v3917_v12, %v3900_v61  ;;  %v3922_v59 = vpop.permute.xlu1 %3921  ;;  %v3920_v18 = vpop.permute.xlu0 %3919  ;;  %v5302_v7 = vpack.c.bf16 %v3918_v28, %v3901_v52  ;;  %v3963_v12 = vrot.slane %v8069_v16, %v8031_v57  ;;  %v3967_v28 = vrot.slane %v8074_v46, %v8031_v57 }
0x10ea   : > { %v3925_v35 = vsel %vm3923_vm10, %v3922_v59, %v3920_v18  ;;  %v3924_v51 = vsel %vm3923_vm10, %v3920_v18, %v3922_v59  ;;  %v3980_v59 = vrot.slane %v8069_v16, %v8036_v23  ;;  %v3984_v18 = vrot.slane %v8074_v46, %v8036_v23 }
0x10eb   : > { %4342 = vrot.lane.b32.xlu1 %v7908_v3, %s5688_s18  ;;  %4340 = vrot.lane.b32.xlu0 %v7904_v37, %s5688_s18  ;;  %v3934_v36 = vmul.f32 %v3929_v22, %v3925_v35  ;;  %v3935_v58 = vmul.f32 %v3933_v56, %v3924_v51 }
0x10ec   : > { %5303 = vmatprep.subr.bf16.mxu1 %v5302_v7 }
0x10ed   : > { %5305 = vmatpush1.bf16.msra.mxu1 %v5304_v41  ;;  %v3939_v6 = vpop.permute.xlu1 %3938  ;;  %v3937_v39 = vpop.permute.xlu0 %3936 }
0x10ee   : > { %v3941_v38 = vsel %vm3940_vm11, %v3937_v39, %v3939_v6  ;;  %v3942_v55 = vsel %vm3940_vm11, %v3939_v6, %v3937_v39  ;;  %vm4133_vm11 = vcmp.lt.s32.totalorder %v5935_v11, 126 }
0x10ef   : > { %v3951_v1 = vmul.f32 %v3946_v44, %v3942_v55  ;;  %v3952_v60 = vmul.f32 %v3950_v13, %v3941_v38  ;;  %4359 = vrot.lane.b32.xlu1 %v7908_v3, %s5689_s23  ;;  %4357 = vrot.lane.b32.xlu0 %v7904_v37, %s5689_s23 }
0x10f1   : > { %v5308_v61 = vpack.c.bf16 %v3951_v1, %v3934_v36  ;;  %v3956_v32 = vpop.permute.xlu1 %3955  ;;  %v3954_v45 = vpop.permute.xlu0 %3953  ;;  %v5306_v52 = vpack.c.bf16 %v3952_v60, %v3935_v58  ;;  %v3997_v1 = vrot.slane %v8069_v16, %v8516_v54  ;;  %v4001_v60 = vrot.slane %v8074_v46, %v8516_v54 }
0x10f2   : > { %v3959_v41 = vsel %vm3957_vm12, %v3956_v32, %v3954_v45  ;;  %v3958_v7 = vsel %vm3957_vm12, %v3954_v45, %v3956_v32  ;;  %v4014_v32 = vrot.slane %v8069_v16, %v8517_v43  ;;  %v4018_v45 = vrot.slane %v8074_v46, %v8517_v43 }
0x10f3   : > { %4376 = vrot.lane.b32.xlu1 %v7908_v3, %s5690_s29  ;;  %4374 = vrot.lane.b32.xlu0 %v7904_v37, %s5690_s29  ;;  %v3968_v35 = vmul.f32 %v3963_v12, %v3959_v41  ;;  %v3969_v51 = vmul.f32 %v3967_v28, %v3958_v7  ;;  %vm4184_vm12 = vcmp.lt.s32.totalorder %v5935_v11, 114  ;;  %s568_s29 = scalar_lea.vmem %s8425_s17, %s5796_s26 }
0x10f4   : > { %5307 = vmatprep.subr.bf16.mxu1 %v5306_v52 }
0x10f5   : > { %5309 = vmatpush1.bf16.msra.mxu1 %v5308_v61  ;;  %v3973_v22 = vpop.permute.xlu1 %3972  ;;  %v3971_v56 = vpop.permute.xlu0 %3970 }
0x10f6   : > { %v3975_v44 = vsel %vm3974_vm14, %v3971_v56, %v3973_v22  ;;  %v3976_v13 = vsel %vm3974_vm14, %v3973_v22, %v3971_v56  ;;  %vm4259_vm14 = vcmp.lt.s32.totalorder %v5935_v11, 99 }
0x10f7   : > { %v3985_v6 = vmul.f32 %v3980_v59, %v3976_v13  ;;  %v3986_v39 = vmul.f32 %v3984_v18, %v3975_v44  ;;  %4393 = vrot.lane.b32.xlu1 %v7908_v3, %s5691_s19  ;;  %4391 = vrot.lane.b32.xlu0 %v7904_v37, %s5691_s19 }
0x10f9   : > { %v5312_v36 = vpack.c.bf16 %v3985_v6, %v3968_v35  ;;  %v3990_v38 = vpop.permute.xlu1 %3989  ;;  %v3988_v55 = vpop.permute.xlu0 %3987  ;;  %v5310_v58 = vpack.c.bf16 %v3986_v39, %v3969_v51 }
0x10fa   : > { %v3993_v61 = vsel %vm3991_vm15, %v3990_v38, %v3988_v55  ;;  %v3992_v52 = vsel %vm3991_vm15, %v3988_v55, %v3990_v38  ;;  %vm4276_vm15 = vcmp.lt.s32.totalorder %v5935_v11, 98 }
0x10fb   : > { %4410 = vrot.lane.b32.xlu1 %v7908_v3, %s5692_s27  ;;  %4408 = vrot.lane.b32.xlu0 %v7904_v37, %s5692_s27  ;;  %v4002_v41 = vmul.f32 %v3997_v1, %v3993_v61  ;;  %v4003_v7 = vmul.f32 %v4001_v60, %v3992_v52 }
0x10fc   : > { %5311 = vmatprep.subr.bf16.mxu1 %v5310_v58  ;;  %v8143_v58 = vpop.f32.mrb[24].mxu0 }
0x10fd   : > { %5313 = vmatpush1.bf16.msra.mxu1 %v5312_v36  ;;  %v4007_v12 = vpop.permute.xlu1 %4006  ;;  %v4005_v28 = vpop.permute.xlu0 %4004 }
0x10fe   : > { %v4009_v59 = vsel %vm4008_vm8, %v4005_v28, %v4007_v12  ;;  %v4010_v18 = vsel %vm4008_vm8, %v4007_v12, %v4005_v28  ;;  %vm4293_vm8 = vcmp.lt.s32.totalorder %v5935_v11, 97 }
0x10ff   : > { %v4019_v22 = vmul.f32 %v4014_v32, %v4010_v18  ;;  %v4020_v56 = vmul.f32 %v4018_v45, %v4009_v59  ;;  %4427 = vrot.lane.b32.xlu1 %v7908_v3, %s5693_s25  ;;  %4425 = vrot.lane.b32.xlu0 %v7904_v37, %s5693_s25  ;;  %v8171_v59 = vld [vmem:[%s8413_s5 + $0x28] sm:$0xff] }
0x1101   : > { %v5316_v16 = vpack.c.bf16 %v4019_v22, %v4002_v41  ;;  %v4024_v35 = vpop.permute.xlu1 %4023  ;;  %v4022_v44 = vpop.permute.xlu0 %4021  ;;  %v5314_v46 = vpack.c.bf16 %v4020_v56, %v4003_v7 }
0x1102   : > { %v4026_v13 = vsel %vm625_vm0, %v4024_v35, %v4022_v44  ;;  %v4025_v51 = vsel %vm625_vm0, %v4022_v44, %v4024_v35  ;;  %vm4049_vm0 = vcmp.lt.s32.totalorder %v5935_v11, 14 }
0x1103   : > { %4444 = vrot.lane.b32.xlu1 %v7908_v3, %s5694_s0  ;;  %4442 = vrot.lane.b32.xlu0 %v7904_v37, %s5694_s0  ;;  %v4027_v36 = vmul.f32 %v4026_v13, %v5967_v19  ;;  %v4028_v1 = vmul.f32 %v4025_v51, %v5957_v17  ;;  %v8150_v19 = vpop.f32.mrb[25].mxu0  ;;  %v5625_v13 = vld [vmem:[%s8421_s13 + $0x8] sm:$0xff]  ;;  %v5626_v51 = vld [vmem:[%s8421_s13] sm:$0xff] }
0x1104   : > { %5315 = vmatprep.subr.bf16.mxu1 %v5314_v46  ;;  %v8152_v32 = vpop.f32.mrb[26].mxu0 }
0x1105   : > { %5317 = vmatpush1.bf16.msra.mxu1 %v5316_v16  ;;  %v4032_v6 = vpop.permute.xlu1 %4031  ;;  %v4030_v39 = vpop.permute.xlu0 %4029 }
0x1106   : > { %v4033_v38 = vsel %vm666_vm1, %v4030_v39, %v4032_v6  ;;  %v4034_v55 = vsel %vm666_vm1, %v4032_v6, %v4030_v39  ;;  %v8154_v41 = vpop.f32.mrb[27].mxu0  ;;  %vm4066_vm1 = vcmp.lt.s32.totalorder %v5935_v11, 13 }
0x1107   : > { %v4035_v60 = vmul.f32 %v4034_v55, %v6005_v48  ;;  %v4036_v61 = vmul.f32 %v4033_v38, %v6009_v49  ;;  %4461 = vrot.lane.b32.xlu1 %v7908_v3, %s5695_s21  ;;  %4459 = vrot.lane.b32.xlu0 %v7904_v37, %s5695_s21  ;;  %v8164_v48 = vld [vmem:[%s8413_s5 + $0x20] sm:$0xff]  ;;  %v8185_v6 = vpop.f32.mrb[28].mxu0 }
0x1108   : > { %v4055_v49 = vrot.slane %v8164_v48, %v8014_v29  ;;  %v8187_v39 = vpop.f32.mrb[29].mxu0  ;;  %v4072_v55 = vrot.slane %v8164_v48, %v8031_v57 }
0x1109   : > { %v5320_v45 = vpack.c.bf16 %v4035_v60, %v4027_v36  ;;  %v4040_v52 = vpop.permute.xlu1 %4039  ;;  %v4038_v12 = vpop.permute.xlu0 %4037  ;;  %v5318_v28 = vpack.c.bf16 %v4036_v61, %v4028_v1  ;;  %v4076_v60 = vrot.slane %v8171_v59, %v8031_v57  ;;  %v5627_v61 = vld [vmem:[%s8421_s13 + $0x18] sm:$0xff] }
0x110a   : > { %v4042_v17 = vsel %vm707_vm2, %v4040_v52, %v4038_v12  ;;  %v8192_v1 = vpop.f32.mrb[30].mxu0 }
0x110b   : > { %4478 = vrot.lane.b32.xlu1 %v7908_v3, %s5696_s28  ;;  %4476 = vrot.lane.b32.xlu0 %v7904_v37, %s5696_s28  ;;  %v4059_v3 = vrot.slane %v8171_v59, %v8014_v29  ;;  %v4041_v37 = vsel %vm707_vm2, %v4038_v12, %v4040_v52  ;;  %v4043_v22 = vmul.f32 %v4042_v17, %v6041_v30  ;;  %vm4083_vm2 = vcmp.lt.s32.totalorder %v5935_v11, 3 }
0x110c   : > { %5319 = vmatprep.subr.bf16.mxu1 %v5318_v28  ;;  %v4044_v35 = vmul.f32 %v4041_v37, %v6045_v31  ;;  %v4089_v52 = vrot.slane %v8164_v48, %v8036_v23  ;;  %v4093_v12 = vrot.slane %v8171_v59, %v8036_v23  ;;  %v8207_v28 = vpop.f32.mrb[31].mxu0 }
0x110d   : > { %5321 = vmatpush1.bf16.msra.mxu1 %v5320_v45  ;;  %v4048_v18 = vpop.permute.xlu1 %4047  ;;  %v4046_v7 = vpop.permute.xlu0 %4045  ;;  %v5628_v45 = vld [vmem:[%s8421_s13 + $0x10] sm:$0xff] }
0x110e   : > { %v4050_v56 = vsel %vm4049_vm0, %v4046_v7, %v4048_v18  ;;  %v4051_v16 = vsel %vm4049_vm0, %v4048_v18, %v4046_v7  ;;  %vm4310_vm0 = vcmp.lt.s32.totalorder %v5935_v11, 96 }
0x110f   : > { %v4060_v44 = vmul.f32 %v4055_v49, %v4051_v16  ;;  %v4061_v46 = vmul.f32 %v4059_v3, %v4050_v56  ;;  %3402 = vperm.xlu1 %5523, %v5625_v13   ;;  %3398 = vperm.xlu0 %5522, %v5626_v51  }
0x1111   : > { %v5324_v30 = vpack.c.bf16 %v4060_v44, %v4043_v22  ;;  %v4065_v36 = vpop.permute.xlu1 %4064  ;;  %v4063_v31 = vpop.permute.xlu0 %4062  ;;  %v5322_v38 = vpack.c.bf16 %v4061_v46, %v4044_v35 }
0x1112   : > { %v4067_v17 = vsel %vm4066_vm1, %v4063_v31, %v4065_v36  ;;  %v4068_v49 = vsel %vm4066_vm1, %v4065_v36, %v4063_v31  ;;  %vm4327_vm1 = vcmp.lt.s32.totalorder %v5935_v11, 95 }
0x1113   : > { %3410 = vperm.xlu1 %5523, %v5627_v61   ;;  %3406 = vperm.xlu0 %5522, %v5628_v45   ;;  %v4077_v22 = vmul.f32 %v4072_v55, %v4068_v49  ;;  %v4078_v56 = vmul.f32 %v4076_v60, %v4067_v17  ;;  %v4106_v61 = vrot.slane %v8164_v48, %v8516_v54 }
0x1114   : > { %5323 = vmatprep.subr.bf16.mxu1 %v5322_v38 }
0x1115   : > { %5325 = vmatpush1.bf16.msra.mxu1 %v5324_v30  ;;  %v4082_v3 = vpop.permute.xlu1 %4081  ;;  %v4080_v37 = vpop.permute.xlu0 %4079  ;;  %v4110_v30 = vrot.slane %v8171_v59, %v8516_v54 }
0x1116   : > { %v4084_v18 = vsel %vm4083_vm2, %v4080_v37, %v4082_v3  ;;  %v4085_v7 = vsel %vm4083_vm2, %v4082_v3, %v4080_v37  ;;  %vm4344_vm2 = vcmp.lt.s32.totalorder %v5935_v11, 94 }
0x1117   : > { %v4094_v16 = vmul.f32 %v4089_v52, %v4085_v7  ;;  %v4095_v35 = vmul.f32 %v4093_v12, %v4084_v18 }
0x1119   : > { %v5328_v44 = vpack.c.bf16 %v4094_v16, %v4077_v22  ;;  %v4099_v46 = vpop.permute.xlu1 %4098  ;;  %v4097_v13 = vpop.permute.xlu0 %4096  ;;  %v5326_v51 = vpack.c.bf16 %v4095_v35, %v4078_v56 }
0x111a   : > { %v4101_v36 = vsel %vm4100_vm9, %v4097_v13, %v4099_v46  ;;  %v4102_v31 = vsel %vm4100_vm9, %v4099_v46, %v4097_v13  ;;  %v5630_v46 = vld [vmem:[%s8413_s5 + $0x38] sm:$0xff]  ;;  %vm4361_vm9 = vcmp.lt.s32.totalorder %v5935_v11, 93 }
0x111b   : > { %5327 = vmatprep.subr.bf16.mxu1 %v5326_v51  ;;  %v4111_v52 = vmul.f32 %v4106_v61, %v4102_v31  ;;  %v4112_v12 = vmul.f32 %v4110_v30, %v4101_v36  ;;  %v4143_v13 = vrot.slane %v5630_v46, %v8515_v47 }
0x111c   : > { %5329 = vmatpush1.bf16.msra.mxu1 %v5328_v44 }
0x111d   : > { %v4116_v38 = vpop.permute.xlu1 %4115  ;;  %v4114_v55 = vpop.permute.xlu0 %4113 }
0x111e   : > { %v4117_v60 = vsel %vm748_vm3, %v4114_v55, %v4116_v38  ;;  %v4118_v45 = vsel %vm748_vm3, %v4116_v38, %v4114_v55  ;;  %vm5697_vm3 = vmmov 1  }
0x111f   : > { %v4119_v17 = vmul.f32 %v4118_v45, %v6077_v8  ;;  %v4120_v48 = vmul.f32 %v4117_v60, %v6081_v9  ;;  %vm8227_vm10 = vmpackc.low %vm5697_vm3, %vm3544_vm13  ;;  %vm4167_vm13 = vcmp.lt.s32.totalorder %v5935_v11, 115  ;;  %vm4378_vm3 = vcmp.lt.s32.totalorder %v5935_v11, 83 }
0x1121   : > { %v5332_v49 = vpack.c.bf16 %v4119_v17, %v4111_v52  ;;  %v4124_v59 = vpop.permute.xlu1 %4123  ;;  %v4122_v3 = vpop.permute.xlu0 %4121  ;;  %v5330_v37 = vpack.c.bf16 %v4120_v48, %v4112_v12 }
0x1122   : > { %v4125_v18 = vsel %vm789_vm4, %v4122_v3, %v4124_v59  ;;  %v4126_v7 = vsel %vm789_vm4, %v4124_v59, %v4122_v3  ;;  %vm4150_vm4 = vcmp.lt.s32.totalorder %v5935_v11, 125  ;;  %v4177_v3 = vrot.slane %v5630_v46, %v8031_v57 }
0x1123   : > { %v4127_v22 = vmul.f32 %v4125_v18, %v6132_v0  ;;  %v4128_v56 = vmul.f32 %v4126_v7, %v6124_v53  ;;  %5331 = vmatprep.subr.bf16.mxu1 %v5330_v37  ;;  %v5629_v53 = vld [vmem:[%s8413_s5 + $0x30] sm:$0xff]  ;;  %v4194_v18 = vrot.slane %v5630_v46, %v8036_v23 }
0x1124   : > { %5333 = vmatpush1.bf16.msra.mxu1 %v5332_v49  ;;  %v4139_v0 = vrot.slane %v5629_v53, %v8515_v47  ;;  %v4173_v59 = vrot.slane %v5629_v53, %v8031_v57  ;;  %v4190_v37 = vrot.slane %v5629_v53, %v8036_v23 }
0x1125   : > { %v5334_v9 = vpack.c.bf16 %v4128_v56, %v7900_v4  ;;  %v5337_v16 = vpack.c.bf16 %v4127_v22, %v7898_v21  ;;  %v4132_v35 = vpop.permute.xlu1 %4131  ;;  %v4130_v44 = vpop.permute.xlu0 %4129  ;;  %v4156_v21 = vrot.slane %v5629_v53, %v8014_v29  ;;  %v4160_v4 = vrot.slane %v5630_v46, %v8014_v29 }
0x1126   : > { %v4134_v51 = vsel %vm4133_vm11, %v4130_v44, %v4132_v35  ;;  %v4135_v61 = vsel %vm4133_vm11, %v4132_v35, %v4130_v44  ;;  %vm4412_vm11 = vcmp.lt.s32.totalorder %v5935_v11, 81 }
0x1127   : > { %5336 = vmatprep.subr.msk.bf16.mxu1 %vm8227_vm10, %v5334_v9  ;;  %v4144_v55 = vmul.f32 %v4139_v0, %v4134_v51  ;;  %v4145_v60 = vmul.f32 %v4143_v13, %v4135_v61 }
0x1128   : > { %5339 = vmatpush1.bf16.msk.msra.mxu1 %vm8227_vm10, %v5337_v16  ;;  %vm4395_vm10 = vcmp.lt.s32.totalorder %v5935_v11, 82 }
0x1129   : > { %v4149_v30 = vpop.permute.xlu1 %4148  ;;  %v4147_v36 = vpop.permute.xlu0 %4146 }
0x112a   : > { %v4151_v31 = vsel %vm4150_vm4, %v4147_v36, %v4149_v30  ;;  %v4152_v38 = vsel %vm4150_vm4, %v4149_v30, %v4147_v36  ;;  %vm4429_vm4 = vcmp.lt.s32.totalorder %v5935_v11, 80 }
0x112b   : > { %v4161_v45 = vmul.f32 %v4156_v21, %v4151_v31  ;;  %v4162_v52 = vmul.f32 %v4160_v4, %v4152_v38 }
0x112d   : > { %v5342_v12 = vpack.c.bf16 %v4161_v45, %v4144_v55  ;;  %v4166_v17 = vpop.permute.xlu1 %4165  ;;  %v4164_v48 = vpop.permute.xlu0 %4163  ;;  %v5340_v49 = vpack.c.bf16 %v4162_v52, %v4145_v60 }
0x112e   : > { %v4168_v7 = vsel %vm4167_vm13, %v4164_v48, %v4166_v17  ;;  %v4169_v22 = vsel %vm4167_vm13, %v4166_v17, %v4164_v48  ;;  %vm4446_vm13 = vcmp.lt.s32.totalorder %v5935_v11, 79 }
0x112f   : > { %5341 = vmatprep.subr.bf16.mxu1 %v5340_v49  ;;  %v4178_v35 = vmul.f32 %v4173_v59, %v4168_v7  ;;  %v4179_v44 = vmul.f32 %v4177_v3, %v4169_v22  ;;  %v8271_v59 = vld [vmem:[%s8413_s5 + $0x40] sm:$0xff] }
0x1130   : > { %5343 = vmatpush1.bf16.msra.mxu1 %v5342_v12 }
0x1131   : > { %v4183_v56 = vpop.permute.xlu1 %4182  ;;  %v4181_v8 = vpop.permute.xlu0 %4180 }
0x1132   : > { %v4185_v9 = vsel %vm4184_vm12, %v4181_v8, %v4183_v56  ;;  %v4186_v16 = vsel %vm4184_vm12, %v4183_v56, %v4181_v8  ;;  %vm4463_vm12 = vcmp.lt.s32.totalorder %v5935_v11, 78 }
0x1133   : > { %v4195_v0 = vmul.f32 %v4190_v37, %v4185_v9  ;;  %v4196_v13 = vmul.f32 %v4194_v18, %v4186_v16  ;;  %v4510_v18 = vrot.slane %v8005_v20, %v8014_v29 }
0x1135   : > { %v5346_v21 = vpack.c.bf16 %v4195_v0, %v4178_v35  ;;  %v4200_v4 = vpop.permute.xlu1 %4199  ;;  %v4198_v51 = vpop.permute.xlu0 %4197  ;;  %v5344_v61 = vpack.c.bf16 %v4196_v13, %v4179_v44 }
0x1136   : > { %v4201_v53 = vsel %vm830_vm5, %v4198_v51, %v4200_v4  ;;  %v4202_v46 = vsel %vm830_vm5, %v4200_v4, %v4198_v51  ;;  %vm4225_vm5 = vcmp.lt.s32.totalorder %v5935_v11, 110 }
0x1137   : > { %5345 = vmatprep.subr.bf16.mxu1 %v5344_v61  ;;  %v4203_v55 = vmul.f32 %v4201_v53, %v6176_v33  ;;  %v4204_v60 = vmul.f32 %v4202_v46, %v6180_v34  ;;  %v4231_v33 = vrot.slane %v8271_v59, %v8513_v26  ;;  %v8278_v34 = vld [vmem:[%s8413_s5 + $0x48] sm:$0xff] }
0x1138   : > { %5347 = vmatpush1.bf16.msra.mxu1 %v5346_v21  ;;  %v4252_v51 = vrot.slane %v8278_v34, %v8515_v47 }
0x1139   : > { %v4208_v30 = vpop.permute.xlu1 %4207  ;;  %v4206_v36 = vpop.permute.xlu0 %4205 }
0x113a   : > { %v4209_v31 = vsel %vm871_vm6, %v4206_v36, %v4208_v30  ;;  %v4210_v38 = vsel %vm871_vm6, %v4208_v30, %v4206_v36  ;;  %vm4514_vm6 = vcmask 64512  }
0x113b   : > { %v4211_v45 = vmul.f32 %v4209_v31, %v6209_v5  ;;  %v4212_v52 = vmul.f32 %v4210_v38, %v6213_v14  ;;  %v4235_v5 = vrot.slane %v8278_v34, %v8513_v26  ;;  %v4498_v14 = vrot.slane %v8005_v20, %v8512_v27 }
0x113c   : > { %v4248_v20 = vrot.slane %v8271_v59, %v8515_v47 }
0x113d   : > { %v5350_v12 = vpack.c.bf16 %v4211_v45, %v4203_v55  ;;  %v4216_v17 = vpop.permute.xlu1 %4215  ;;  %v4214_v48 = vpop.permute.xlu0 %4213  ;;  %v5348_v49 = vpack.c.bf16 %v4212_v52, %v4204_v60 }
0x113e   : > { %v4217_v3 = vsel %vm912_vm7, %v4214_v48, %v4216_v17  ;;  %v4218_v37 = vsel %vm912_vm7, %v4216_v17, %v4214_v48  ;;  %vm4242_vm7 = vcmp.lt.s32.totalorder %v5935_v11, 109 }
0x113f   : > { %5349 = vmatprep.subr.bf16.mxu1 %v5348_v49  ;;  %v4219_v9 = vmul.f32 %v4217_v3, %v8501_v40  ;;  %v4220_v16 = vmul.f32 %v4218_v37, %v8502_v15  ;;  %v4265_v40 = vrot.slane %v8271_v59, %v8014_v29  ;;  %v4269_v15 = vrot.slane %v8278_v34, %v8014_v29 }
0x1140   : > { %5351 = vmatpush1.bf16.msra.mxu1 %v5350_v12  ;;  %v4282_v49 = vrot.slane %v8271_v59, %v8031_v57 }
0x1141   : > { %v4224_v7 = vpop.permute.xlu1 %4223  ;;  %v4222_v22 = vpop.permute.xlu0 %4221 }
0x1142   : > { %v4226_v56 = vsel %vm4225_vm5, %v4222_v22, %v4224_v7  ;;  %v4227_v8 = vsel %vm4225_vm5, %v4224_v7, %v4222_v22  ;;  %vm4480_vm5 = vcmp.lt.s32.totalorder %v5935_v11, 77  ;;  %v5633_v11 = vld [vmem:[%s8424_s16] sm:$0xf] }
0x1143   : > { %v4236_v35 = vmul.f32 %v4231_v33, %v4226_v56  ;;  %v4237_v44 = vmul.f32 %v4235_v5, %v4227_v8  ;;  %4582 = vmatmul.mubr.f32.vlgmr.msra.gmra.mrb[46].mxu1 %v4498_v14  ;;  %v4286_v33 = vrot.slane %v8278_v34, %v8031_v57  ;;  %v4299_v5 = vrot.slane %v8271_v59, %v8036_v23 }
0x1144   : > { %4859 = vmatprep.mubr.msk.f32.mxu1 %vm4514_vm6, %v4510_v18  ;;  %v4303_v14 = vrot.slane %v8278_v34, %v8036_v23 }
0x1145   : > { %v5354_v0 = vpack.c.bf16 %v4236_v35, %v4219_v9  ;;  %v4241_v13 = vpop.permute.xlu1 %4240  ;;  %v4239_v21 = vpop.permute.xlu0 %4238  ;;  %v5352_v4 = vpack.c.bf16 %v4237_v44, %v4220_v16 }
0x1146   : > { %v4243_v61 = vsel %vm4242_vm7, %v4239_v21, %v4241_v13  ;;  %v4244_v53 = vsel %vm4242_vm7, %v4241_v13, %v4239_v21 }
0x1147   : > { %5353 = vmatprep.subr.bf16.mxu1 %v5352_v4  ;;  %v4253_v38 = vmul.f32 %v4248_v20, %v4243_v61  ;;  %v4254_v55 = vmul.f32 %v4252_v51, %v4244_v53  ;;  %v4316_v4 = vrot.slane %v8271_v59, %v8516_v54  ;;  %v4320_v20 = vrot.slane %v8278_v34, %v8516_v54 }
0x1148   : > { %5355 = vmatpush1.bf16.msra.mxu1 %v5354_v0  ;;  %v4333_v51 = vrot.slane %v8271_v59, %v8517_v43  ;;  %v8330_v59 = vld [vmem:[%s8413_s5 + $0x58] sm:$0xff] }
0x1149   : > { %v4258_v46 = vpop.permute.xlu1 %4257  ;;  %v4256_v30 = vpop.permute.xlu0 %4255 }
0x114a   : > { %v4260_v36 = vsel %vm4259_vm14, %v4256_v30, %v4258_v46  ;;  %v4261_v31 = vsel %vm4259_vm14, %v4258_v46, %v4256_v30 }
0x114b   : > { %v4270_v60 = vmul.f32 %v4265_v40, %v4260_v36  ;;  %v4271_v45 = vmul.f32 %v4269_v15, %v4261_v31  ;;  %v4337_v40 = vrot.slane %v8278_v34, %v8517_v43 }
0x114d   : > { %v5358_v52 = vpack.c.bf16 %v4270_v60, %v4253_v38  ;;  %v4275_v12 = vpop.permute.xlu1 %4274  ;;  %v4273_v17 = vpop.permute.xlu0 %4272  ;;  %v5356_v48 = vpack.c.bf16 %v4271_v45, %v4254_v55  ;;  %v8325_v45 = vld [vmem:[%s8413_s5 + $0x50] sm:$0xff] }
0x114e   : > { %v4277_v3 = vsel %vm4276_vm15, %v4273_v17, %v4275_v12  ;;  %v4278_v37 = vsel %vm4276_vm15, %v4275_v12, %v4273_v17 }
0x114f   : > { %5357 = vmatprep.subr.bf16.mxu1 %v5356_v48  ;;  %v4287_v8 = vmul.f32 %v4282_v49, %v4277_v3  ;;  %v4288_v9 = vmul.f32 %v4286_v33, %v4278_v37  ;;  %v4350_v48 = vrot.slane %v8325_v45, %v8512_v27  ;;  %v4354_v49 = vrot.slane %v8330_v59, %v8512_v27 }
0x1150   : > { %5359 = vmatpush1.bf16.msra.mxu1 %v5358_v52  ;;  %v4367_v33 = vrot.slane %v8325_v45, %v8513_v26 }
0x1151   : > { %v4292_v18 = vpop.permute.xlu1 %4291  ;;  %v4290_v7 = vpop.permute.xlu0 %4289 }
0x1152   : > { %v4294_v22 = vsel %vm4293_vm8, %v4290_v7, %v4292_v18  ;;  %v4295_v56 = vsel %vm4293_vm8, %v4292_v18, %v4290_v7 }
0x1153   : > { %v4304_v16 = vmul.f32 %v4299_v5, %v4294_v22  ;;  %v4305_v35 = vmul.f32 %v4303_v14, %v4295_v56  ;;  %v4371_v5 = vrot.slane %v8330_v59, %v8513_v26  ;;  %v4384_v26 = vrot.slane %v8325_v45, %v8515_v47 }
0x1155   : > { %v5362_v44 = vpack.c.bf16 %v4304_v16, %v4287_v8  ;;  %v4309_v0 = vpop.permute.xlu1 %4308  ;;  %v4307_v13 = vpop.permute.xlu0 %4306  ;;  %v5360_v21 = vpack.c.bf16 %v4305_v35, %v4288_v9 }
0x1156   : > { %v4311_v15 = vsel %vm4310_vm0, %v4307_v13, %v4309_v0  ;;  %v4312_v61 = vsel %vm4310_vm0, %v4309_v0, %v4307_v13 }
0x1157   : > { %5361 = vmatprep.subr.bf16.mxu1 %v5360_v21  ;;  %v4321_v31 = vmul.f32 %v4316_v4, %v4311_v15  ;;  %v4322_v38 = vmul.f32 %v4320_v20, %v4312_v61  ;;  %v4388_v21 = vrot.slane %v8330_v59, %v8515_v47  ;;  %v4401_v4 = vrot.slane %v8325_v45, %v8014_v29 }
0x1158   : > { %5363 = vmatpush1.bf16.msra.mxu1 %v5362_v44  ;;  %v4405_v20 = vrot.slane %v8330_v59, %v8014_v29  ;;  %v4418_v29 = vrot.slane %v8325_v45, %v8031_v57 }
0x1159   : > { %v4326_v53 = vpop.permute.xlu1 %4325  ;;  %v4324_v46 = vpop.permute.xlu0 %4323 }
0x115a   : > { %v4328_v30 = vsel %vm4327_vm1, %v4324_v46, %v4326_v53  ;;  %v4329_v36 = vsel %vm4327_vm1, %v4326_v53, %v4324_v46 }
0x115b   : > { %v4338_v55 = vmul.f32 %v4333_v51, %v4328_v30  ;;  %v4339_v60 = vmul.f32 %v4337_v40, %v4329_v36 }
0x115d   : > { %v5366_v34 = vpack.c.bf16 %v4338_v55, %v4321_v31  ;;  %v4343_v52 = vpop.permute.xlu1 %4342  ;;  %v4341_v12 = vpop.permute.xlu0 %4340  ;;  %v5364_v17 = vpack.c.bf16 %v4339_v60, %v4322_v38 }
0x115e   : > { %v4345_v14 = vsel %vm4344_vm2, %v4341_v12, %v4343_v52  ;;  %v4346_v3 = vsel %vm4344_vm2, %v4343_v52, %v4341_v12  ;;  %v4422_v12 = vrot.slane %v8330_v59, %v8031_v57 }
0x115f   : > { %5365 = vmatprep.subr.bf16.mxu1 %v5364_v17  ;;  %v4355_v56 = vmul.f32 %v4350_v48, %v4345_v14  ;;  %v4356_v8 = vmul.f32 %v4354_v49, %v4346_v3  ;;  %v4435_v17 = vrot.slane %v8325_v45, %v8036_v23  ;;  %v4439_v48 = vrot.slane %v8330_v59, %v8036_v23 }
0x1160   : > { %5367 = vmatpush1.bf16.msra.mxu1 %v5366_v34  ;;  %v4452_v23 = vrot.slane %v8325_v45, %v8516_v54 }
0x1161   : > { %v4360_v37 = vpop.permute.xlu1 %4359  ;;  %v4358_v18 = vpop.permute.xlu0 %4357 }
0x1162   : > { %v4362_v7 = vsel %vm4361_vm9, %v4358_v18, %v4360_v37  ;;  %v4363_v22 = vsel %vm4361_vm9, %v4360_v37, %v4358_v18 }
0x1163   : > { %v4372_v9 = vmul.f32 %v4367_v33, %v4362_v7  ;;  %v4373_v16 = vmul.f32 %v4371_v5, %v4363_v22 }
0x1165   : > { %v5370_v35 = vpack.c.bf16 %v4372_v9, %v4355_v56  ;;  %v4377_v44 = vpop.permute.xlu1 %4376  ;;  %v4375_v0 = vpop.permute.xlu0 %4374  ;;  %v5368_v13 = vpack.c.bf16 %v4373_v16, %v4356_v8 }
0x1166   : > { %v4379_v51 = vsel %vm4378_vm3, %v4375_v0, %v4377_v44  ;;  %v4380_v40 = vsel %vm4378_vm3, %v4377_v44, %v4375_v0  ;;  %v4469_v44 = vrot.slane %v8325_v45, %v8517_v43  ;;  %v4473_v0 = vrot.slane %v8330_v59, %v8517_v43  ;;  %v4856_v45 = vld [vmem:[%s8413_s5 + $0x68] ss:$0 sm:$0xff] }
0x1167   : > { %5369 = vmatprep.subr.bf16.mxu1 %v5368_v13  ;;  %v4389_v30 = vmul.f32 %v4384_v26, %v4379_v51  ;;  %v4390_v36 = vmul.f32 %v4388_v21, %v4380_v40 }
0x1168   : > { %5371 = vmatpush1.bf16.msra.mxu1 %v5370_v35  ;;  %v4456_v35 = vrot.slane %v8330_v59, %v8516_v54 }
0x1169   : > { %v4394_v15 = vpop.permute.xlu1 %4393  ;;  %v4392_v61 = vpop.permute.xlu0 %4391 }
0x116a   : > { %v4396_v53 = vsel %vm4395_vm10, %v4392_v61, %v4394_v15  ;;  %v4397_v46 = vsel %vm4395_vm10, %v4394_v15, %v4392_v61 }
0x116b   : > { %v4406_v31 = vmul.f32 %v4401_v4, %v4396_v53  ;;  %v4407_v38 = vmul.f32 %v4405_v20, %v4397_v46 }
0x116d   : > { %v5374_v55 = vpack.c.bf16 %v4406_v31, %v4389_v30  ;;  %v4411_v60 = vpop.permute.xlu1 %4410  ;;  %v4409_v34 = vpop.permute.xlu0 %4408  ;;  %v5372_v52 = vpack.c.bf16 %v4407_v38, %v4390_v36  ;;  %v4855_v36 = vld [vmem:[%s8413_s5 + $0x60] ss:$0 sm:$0xff] }
0x116e   : > { %v4413_v49 = vsel %vm4412_vm11, %v4409_v34, %v4411_v60  ;;  %v4414_v33 = vsel %vm4412_vm11, %v4411_v60, %v4409_v34 }
0x116f   : > { %5373 = vmatprep.subr.bf16.mxu1 %v5372_v52  ;;  %v4423_v18 = vmul.f32 %v4418_v29, %v4413_v49  ;;  %v4424_v7 = vmul.f32 %v4422_v12, %v4414_v33 }
0x1170   : > { %5375 = vmatpush1.bf16.msra.mxu1 %v5374_v55  ;;  %v4506_v55 = vrot.slane %v5633_v11, %v8515_v47 }
0x1171   : > { %v4428_v5 = vpop.permute.xlu1 %4427  ;;  %v4426_v14 = vpop.permute.xlu0 %4425 }
0x1172   : > { %v4430_v3 = vsel %vm4429_vm4, %v4426_v14, %v4428_v5  ;;  %v4431_v37 = vsel %vm4429_vm4, %v4428_v5, %v4426_v14 }
0x1173   : > { %v4440_v22 = vmul.f32 %v4435_v17, %v4430_v3  ;;  %v4441_v57 = vmul.f32 %v4439_v48, %v4431_v37 }
0x1175   : > { %v5378_v56 = vpack.c.bf16 %v4440_v22, %v4423_v18  ;;  %v4445_v8 = vpop.permute.xlu1 %4444  ;;  %v4443_v9 = vpop.permute.xlu0 %4442  ;;  %v5376_v16 = vpack.c.bf16 %v4441_v57, %v4424_v7 }
0x1176   : > { %v4447_v13 = vsel %vm4446_vm13, %v4443_v9, %v4445_v8  ;;  %v4448_v26 = vsel %vm4446_vm13, %v4445_v8, %v4443_v9 }
0x1177   : > { %5377 = vmatprep.subr.bf16.mxu1 %v5376_v16  ;;  %v4457_v40 = vmul.f32 %v4452_v23, %v4447_v13  ;;  %v4458_v54 = vmul.f32 %v4456_v35, %v4448_v26 }
0x1178   : > { %5379 = vmatpush1.bf16.msra.mxu1 %v5378_v56 }
0x1179   : > { %v4462_v21 = vpop.permute.xlu1 %4461  ;;  %v4460_v4 = vpop.permute.xlu0 %4459 }
0x117a   : > { %v4464_v20 = vsel %vm4463_vm12, %v4460_v4, %v4462_v21  ;;  %v4465_v51 = vsel %vm4463_vm12, %v4462_v21, %v4460_v4 }
0x117b   : > { %v4474_v15 = vmul.f32 %v4469_v44, %v4464_v20  ;;  %v4475_v61 = vmul.f32 %v4473_v0, %v4465_v51 }
0x117d   : > { %v5382_v53 = vpack.c.bf16 %v4474_v15, %v4457_v40  ;;  %v4479_v46 = vpop.permute.xlu1 %4478  ;;  %v4477_v43 = vpop.permute.xlu0 %4476  ;;  %v5380_v59 = vpack.c.bf16 %v4475_v61, %v4458_v54 }
0x117e   : > { %v4482_v30 = vsel %vm4480_vm5, %v4479_v46, %v4477_v43  ;;  %v4481_v31 = vsel %vm4480_vm5, %v4477_v43, %v4479_v46 }
0x117f   : > { %v4492_v38 = vmul.f32 %v4856_v45, %v4482_v30  ;;  %5381 = vmatprep.subr.bf16.mxu1 %v5380_v59  ;;  %v4491_v60 = vmul.f32 %v4855_v36, %v4481_v31 }
0x1180   : > { %5383 = vmatpush1.bf16.msra.mxu1 %v5382_v53 }
0x1181   : > { %4620 = vmatprep.subr.mxu1 %v4492_v38 }
0x1184   : > { %4621 = vmatpush1.msra.mxu1 %v4491_v60 }
0x1185   : > { %4653 = vmatmul.mubr.f32.vlgmr.msra.gmra.mrb[46].mxu1 %v4506_v55 }
0x118e   : > { %v3403_v5 = vpop.permute.xlu1 %3402  ;;  %v3399_v14 = vpop.permute.xlu0 %3398 }
0x118f   : > { %v3415_v18 = vadd.f32 %v3403_v5, %v8152_v32  ;;  %v3416_v7 = vadd.f32 %v3403_v5, %v8154_v41  ;;  %v3413_v57 = vadd.f32 %v3399_v14, %v8143_v58  ;;  %v3414_v56 = vadd.f32 %v3399_v14, %v8150_v19 }
0x1192   : > { %v3411_v3 = vpop.permute.xlu1 %3410  ;;  %v3407_v37 = vpop.permute.xlu0 %3406 }
0x1193   : > { %v3419_v8 = vadd.f32 %v3411_v3, %v8192_v1  ;;  %v3420_v16 = vadd.f32 %v3411_v3, %v8207_v28  ;;  %v3417_v23 = vadd.f32 %v3407_v37, %v8185_v6  ;;  %v3418_v35 = vadd.f32 %v3407_v37, %v8187_v39 }
0x1258   : > { %v4654_v34 = vpop.f32.mrb[46].mxu1 }
0x1259   : > { %v4860_v52 = vmul.f32 -1.442695, %v4654_v34  ;;  %v4656_v29 = vpop.f32.mrb[47].mxu1 }
0x125a   : > { %v4861_v12 = vmul.f32 -1.442695, %v4656_v29 }
0x125b   : > { %5612 = vpow2.f32 %v4860_v52 }
0x125c   : > { %5614 = vpow2.f32 %v4861_v12 }
0x1265   : > { %v5613_v17 = vpop.eup %5612 }
0x1266   : > { %v5615_v48 = vpop.eup %5614  ;;  %v4665_v49 = vadd.f32 1.0, %v5613_v17 }
0x1267   : > { %v4666_v33 = vadd.f32 1.0, %v5615_v48 }
0x1268   : > { %5616 = vrcp.f32 %v4665_v49 }
0x1269   : > { %5618 = vrcp.f32 %v4666_v33 }
0x1272   : > { %v5617_v47 = vpop.eup %5616 }
0x1273   : > { %v5619_v22 = vpop.eup %5618  ;;  %v4674_v9 = vrot.slane %v5617_v47, %v8512_v27 }
0x1274   : > { %v4678_v32 = vrot.slane %v5619_v22, %v8512_v27 }
0x1275   : > { %v4679_v41 = vmul.f32 %v4674_v9, %v7855_v10  ;;  %v4681_v44 = vmul.f32 %v4674_v9, %v7849_v42  ;;  %v4683_v58 = vmul.f32 %v4674_v9, %v7876_v63  ;;  %v4685_v19 = vmul.f32 %v4674_v9, %v7862_v62 }
0x1276   : > { %v4680_v1 = vmul.f32 %v4678_v32, %v7858_v2  ;;  %v4682_v0 = vmul.f32 %v4678_v32, %v7852_v25  ;;  %v4684_v28 = vmul.f32 %v4678_v32, %v7879_v24  ;;  %v4686_v6 = vmul.f32 %v4678_v32, %v7865_v50 }
0x1277   : > { %v4687_v13 = vadd.f32 %v4679_v41, %v3413_v57  ;;  %v4689_v39 = vadd.f32 %v4681_v44, %v3415_v18  ;;  %v4691_v26 = vadd.f32 %v4683_v58, %v3417_v23  ;;  %v4693_v27 = vadd.f32 %v4685_v19, %v3419_v8 }
0x1278   : > { %v4688_v42 = vadd.f32 %v4680_v1, %v3414_v56  ;;  %v4690_v10 = vadd.f32 %v4682_v0, %v3416_v7  ;;  %v4692_v63 = vadd.f32 %v4684_v28, %v3418_v35  ;;  %v4694_v62 = vadd.f32 %v4686_v6, %v3420_v16 }
0x1279   : > { %v4695_v21 = vmax.f32 %v4687_v13, 0.0  ;;  %v4697_v2 = vmax.f32 %v4689_v39, 0.0  ;;  %v4699_v4 = vmax.f32 %v4691_v26, 0.0  ;;  %v4701_v25 = vmax.f32 %v4693_v27, 0.0 }
0x127a   : > { %v4696_v20 = vmax.f32 %v4688_v42, 0.0  ;;  %v4698_v24 = vmax.f32 %v4690_v10, 0.0  ;;  %v4700_v51 = vmax.f32 %v4692_v63, 0.0  ;;  %v4702_v50 = vmax.f32 %v4694_v62, 0.0 }
0x127b   : > { %4703 = vst [vmem:[%s568_s29] sm:$0xff] %v4695_v21  ;;  %4705 = vst [vmem:[%s568_s29 + $0x10] sm:$0xff] %v4697_v2 }
0x127c   : > { %4707 = vst [vmem:[%s568_s29 + $0x20] sm:$0xff] %v4699_v4  ;;  %4709 = vst [vmem:[%s568_s29 + $0x30] sm:$0xff] %v4701_v25 }
0x127d   : > { %4704 = vst [vmem:[%s568_s29 + $0x8] sm:$0xff] %v4696_v20  ;;  %4706 = vst [vmem:[%s568_s29 + $0x18] sm:$0xff] %v4698_v24 }
0x127e   : > { %4708 = vst [vmem:[%s568_s29 + $0x28] sm:$0xff] %v4700_v51  ;;  %4710 = vst [vmem:[%s568_s29 + $0x38] sm:$0xff] %v4702_v50 }
0x127f PF: > { %s27_s24 = sadd.s32 1, %s5640_s24  }
0x1280   : > { %p24_p4 = scmp.ge.s32.totalorder %s27_s24, 4  }
0x1282   :  { %26 = sbr.rel (!%p24_p4) target bundleno = 3 (0x3), region = 121 }

</bundles_post_ra>
